<compile_context>
chip_gen: v7x
topology: tpu7x:2x2x1
jax: 0.10.0
libtpu: 0.0.40
codegen_flags: <defaults>
</compile_context>

<pallas_src>
import functools

import numpy as np
import jax
import jax.numpy as jnp
from jax.experimental import pallas as pl
from jax.experimental.pallas import tpu as pltpu

GF_DIM = 64          # gf_dim
C_DIM = 1
IMAGE_SIZE = 64
H0 = W0 = 16         # spatial size after fc
H1 = W1 = 32         # spatial size after deconv1
_K = 4               # ConvTranspose2d kernel size (stride 2, padding 1)


# ----------------------------------------------------------------------------
# Pallas kernel body: fused  out = act(x @ w + b)  on 2-D VMEM tiles.
# N is always a multiple of 128 for the conv layers -> unmasked, lane-dense
# stores; MXU accumulates in f32.
# ----------------------------------------------------------------------------
def _fused_matmul_kernel(x_ref, w_ref, b_ref, o_ref, *, act):
    acc = jnp.dot(x_ref[...], w_ref[...], preferred_element_type=jnp.float32)
    acc = acc + b_ref[...]
    if act == "relu":
        acc = jnp.maximum(acc, 0.0)
    elif act == "sigmoid":
        acc = jax.nn.sigmoid(acc)
    o_ref[...] = acc.astype(o_ref.dtype)


def fc_dense(x, w, b, *, tn=2048):
    """fc layer: x:(B,K), w:(K,16384), b:(1,16384) -> relu(x@w+b).

    N-tiled grid (parallel): weight streams in (K,TN) tiles double-buffered
    behind compute; epilogue works on a (B,TN) tile instead of (B,16384).
    Per step VMEM ~ 2*(K*TN + B*TN + B*K)*4 B  ~= 0.6 MiB at B=2.
    """
    M, Kd = x.shape
    N = w.shape[1]
    assert N % tn == 0
    return pl.pallas_call(
        functools.partial(_fused_matmul_kernel, act="relu"),
        out_shape=jax.ShapeDtypeStruct((M, N), jnp.float32),
        grid=(N // tn,),
        in_specs=[
            pl.BlockSpec((M, Kd), lambda j: (0, 0)),
            pl.BlockSpec((Kd, tn), lambda j: (0, j)),
            pl.BlockSpec((1, tn), lambda j: (0, j)),
        ],
        out_specs=pl.BlockSpec((M, tn), lambda j: (0, j)),
        compiler_params=pltpu.CompilerParams(
            dimension_semantics=("parallel",)),
    )(x, w, b)


def deconv1_dense(pat, w, b, *, tm=128):
    """deconv1 + deconv1b merged along N (576 x 256), M-tiled over rows.

    pat:(B*256, 576), w:(576,256), b:(1,256) -> relu(pat@w+b):(B*256,256).
    Weight/bias index_maps are constant -> loaded once, VMEM resident, while
    (TM,576) activation tiles stream.  TM=128 divides B*256 for every B.
    Per step VMEM ~ 2*(128*576 + 128*256)*4 + 2*576*256*4 ~= 2.2 MiB.
    """
    M, Kd = pat.shape
    N = w.shape[1]
    assert M % tm == 0
    return pl.pallas_call(
        functools.partial(_fused_matmul_kernel, act="relu"),
        out_shape=jax.ShapeDtypeStruct((M, N), jnp.float32),
        grid=(M // tm,),
        in_specs=[
            pl.BlockSpec((tm, Kd), lambda i: (i, 0)),
            pl.BlockSpec((Kd, N), lambda i: (0, 0)),
            pl.BlockSpec((1, N), lambda i: (0, 0)),
        ],
        out_specs=pl.BlockSpec((tm, N), lambda i: (i, 0)),
        compiler_params=pltpu.CompilerParams(
            dimension_semantics=("parallel",)),
    )(pat, w, b)


def deconv2_dense(pat, w, b, *, tm=32):
    """deconv2 / deconv2b: branch axis outermost + M tile of one image.

    pat:(2, B*32, 3072), w:(2,3072,128), b:(2,1,128) -> sigmoid(...):(2,B*32,128).
    Branch is the slow grid axis so each 1.5 MiB weight is DMA'd once per
    branch; TM=32 rows (= one image) keeps per-step VMEM batch-independent
    (~4 MiB incl. the resident weight).  Columns are (row-phase, out-width)
    = 128 -> lane-dense stores; rows are (branch, b, out-row-pair) so the
    final reshape to (2B, 4096) is free (== torch.cat((x1,x2),0)).
    """
    _, Mb, Kd = pat.shape
    N = w.shape[2]
    assert Mb % tm == 0
    return pl.pallas_call(
        functools.partial(_fused_matmul_kernel, act="sigmoid"),
        out_shape=jax.ShapeDtypeStruct((2, Mb, N), jnp.float32),
        grid=(2, Mb // tm),
        in_specs=[
            pl.BlockSpec((None, tm, Kd), lambda br, i: (br, i, 0)),
            pl.BlockSpec((None, Kd, N), lambda br, i: (br, 0, 0)),
            pl.BlockSpec((None, 1, N), lambda br, i: (br, 0, 0)),
        ],
        out_specs=pl.BlockSpec((None, tm, N), lambda br, i: (br, i, 0)),
        compiler_params=pltpu.CompilerParams(
            dimension_semantics=("parallel", "parallel")),
    )(pat, w, b)


# ----------------------------------------------------------------------------
# Forward pass
# ----------------------------------------------------------------------------
def conv_decoder_2ch(z, kp):
    """Pallas forward.  Returns (2B, 4096) == torch.cat((x1, x2), 0)."""
    B = z.shape[0]

    # fc + ReLU.  fc weights are pre-permuted so the flat output is already in
    # NHWC order -> torch's .view(-1,64,16,16) + layout change is free.
    h = fc_dense(z, kp["fc_w"], kp["fc_b"])                        # (B, 16384)
    x = h.reshape(B, H0, W0, GF_DIM)                               # (B,16,16,64)

    # deconv1/deconv1b in sub-pixel form: 9 dense shifted taps (K = 576), one
    # matmul with both branches stacked along N (256 = 2 * 4 phases * 32 ch).
    # TODO(synk): build this compact patch in-kernel from shifted VMEM slices.
    xp = jnp.pad(x, ((0, 0), (1, 1), (1, 1), (0, 0)))              # (B,18,18,64)
    pat1 = jnp.concatenate(
        [xp[:, a:a + H0, c:c + W0, :] for a in range(3) for c in range(3)],
        axis=-1)                                                   # (B,16,16,576)
    pat1 = pat1.reshape(B * H0 * W0, 9 * GF_DIM)
    y = deconv1_dense(pat1, kp["d1_w"], kp["d1_b"])                # (B*256, 256)

    # split branches + pixel shuffle: cols (br, ph, pw, co) -> NHWC per branch.
    y = y.reshape(B, H0, W0, 2, 2, 2, 32)                          # b,r,cc,br,ph,pw,co
    y = y.transpose(3, 0, 1, 4, 2, 5, 6).reshape(2, B, H1, W1, 32)

    # deconv2/deconv2b (Cout = 1): fold (row-phase, output-width) into N=128
    # and (row-tap, input-width, cin) into K=3072.
    yp = jnp.pad(y, ((0, 0), (0, 0), (1, 1), (0, 0), (0, 0)))      # (2,B,34,32,32)
    pat2 = jnp.concatenate(
        [yp[:, :, a:a + H1, :, :].reshape(2, B * H1, W1 * 32)
         for a in range(3)], axis=-1)                              # (2,B*32,3072)
    out = deconv2_dense(pat2, kp["d2_w"], kp["d2_b"])              # (2,B*32,128)

    # rows are (branch, b, r); columns are (ph, ow):  flat index per image is
    # r*128 + ph*64 + ow = oh*64 + ow, so this reshape IS torch.cat((x1,x2),0).
    return out.reshape(2 * B, IMAGE_SIZE * IMAGE_SIZE * C_DIM)


# ----------------------------------------------------------------------------
# Parameters: torch-layout init + one-time (hoisted) re-layout for the kernels
# ----------------------------------------------------------------------------
def init_torch_params(key, observation_dim):
    """Parameters in the PyTorch module's native layout."""
    ks = jax.random.split(key, 10)

    def u(k, shape, bound):
        return jax.random.uniform(k, shape, jnp.float32, -bound, bound)

    fc_out = H0 * W0 * GF_DIM
    b_fc = 1.0 / np.sqrt(observation_dim)
    b_d1 = 1.0 / np.sqrt(GF_DIM * _K * _K)
    b_d2 = 1.0 / np.sqrt(32 * _K * _K)
    return {
        "fc_w": u(ks[0], (fc_out, observation_dim), b_fc),   # (out, in)
        "fc_b": u(ks[1], (fc_out,), b_fc),
        "d1_w": u(ks[2], (GF_DIM, 32, _K, _K), b_d1),        # (Cin, Cout, k, k)
        "d1_b": u(ks[3], (32,), b_d1),
        "d2_w": u(ks[4], (32, C_DIM, _K, _K), b_d2),
        "d2_b": u(ks[5], (C_DIM,), b_d2),
        "d1b_w": u(ks[6], (GF_DIM, 32, _K, _K), b_d1),
        "d1b_b": u(ks[7], (32,), b_d1),
        "d2b_w": u(ks[8], (32, C_DIM, _K, _K), b_d2),
        "d2b_b": u(ks[9], (C_DIM,), b_d2),
    }


def _row_phase_selector():
    # A[a, ph, kh] = 1 iff output row 2r+ph reads 1-padded input row r+a with
    # kernel row kh (ConvTranspose2d k=4, s=2, p=1).
    A = np.zeros((3, 2, _K), np.float32)
    for a in range(3):
        for ph in range(2):
            if 0 <= a - ph <= 1:
                A[a, ph, 3 + ph - 2 * a] = 1.0
    return A


def _width_selector(w_in):
    # S[iw, ow, kw] = 1 iff output column ow reads input column iw with kernel
    # column kw (implicit zero padding handled by omission).
    S = np.zeros((w_in, 2 * w_in, _K), np.float32)
    for iw in range(w_in):
        for kw in range(_K):
            ow = 2 * iw - 1 + kw
            if 0 <= ow < 2 * w_in:
                S[iw, ow, kw] = 1.0
    return S


def prepare_params(tp, observation_dim):
    """One-time weight re-layout (torch layout -> Pallas matmul matrices)."""
    A = jnp.asarray(_row_phase_selector())
    S = jnp.asarray(_width_selector(W1))

    # fc: transpose + permute output columns NCHW -> NHWC.
    fc_w = tp["fc_w"].T.reshape(observation_dim, GF_DIM, H0, W0)
    fc_w = fc_w.transpose(0, 2, 3, 1).reshape(observation_dim, H0 * W0 * GF_DIM)
    fc_b = tp["fc_b"].reshape(GF_DIM, H0, W0).transpose(1, 2, 0).reshape(1, -1)

    # deconv1: (Cin,Cout,4,4) -> (9*Cin, 4*Cout); rows (a,b,ci), cols (ph,pw,co)
    def d1_mat(wt):
        m = jnp.einsum("aph,dqk,cohk->adcpqo", A, A, wt)
        return m.reshape(9 * GF_DIM, 4 * 32)

    # deconv2: (Cin,1,4,4) -> (3*W1*Cin, 2*64); rows (a,iw,ci), cols (ph,ow)
    def d2_mat(wt):
        m = jnp.einsum("aph,iok,chk->aicpo", A, S, wt[:, 0, :, :])
        return m.reshape(3 * W1 * 32, 2 * IMAGE_SIZE)

    # Branches stacked along N for deconv1 (shared input patch, N=256 fills
    # the 256-wide v6e/v7x MXU); stacked along a leading (grid) axis for
    # deconv2 (different inputs per branch).
    d1_w = jnp.concatenate([d1_mat(tp["d1_w"]), d1_mat(tp["d1b_w"])], axis=1)
    d1_b = jnp.concatenate([jnp.tile(tp["d1_b"], 4),
                            jnp.tile(tp["d1b_b"], 4)]).reshape(1, 256)
    d2_w = jnp.stack([d2_mat(tp["d2_w"]), d2_mat(tp["d2b_w"])], axis=0)
    d2_b = jnp.stack([jnp.tile(tp["d2_b"], 2 * IMAGE_SIZE),
                      jnp.tile(tp["d2b_b"], 2 * IMAGE_SIZE)],
                     axis=0).reshape(2, 1, 128)
    return {"fc_w": fc_w, "fc_b": fc_b,
            "d1_w": d1_w, "d1_b": d1_b,
            "d2_w": d2_w, "d2_b": d2_b}


# ----------------------------------------------------------------------------
# Pure-JAX reference (exact ConvTranspose2d) for numerical validation
# ----------------------------------------------------------------------------
def _convt_ref(x_nhwc, wt, b):
    rhs = jnp.flip(wt, (2, 3)).transpose(2, 3, 0, 1)           # (kh,kw,Cin,Cout)
    y = jax.lax.conv_general_dilated(
        x_nhwc, rhs, window_strides=(1, 1), padding=[(2, 2), (2, 2)],
        lhs_dilation=(2, 2), dimension_numbers=("NHWC", "HWIO", "NHWC"),
        precision=jax.lax.Precision.HIGHEST)
    return y + b


def reference_forward(z, tp):
    B = z.shape[0]
    h = jnp.maximum(
        jnp.dot(z, tp["fc_w"].T, precision=jax.lax.Precision.HIGHEST)
        + tp["fc_b"], 0.0)
    x = h.reshape(B, GF_DIM, H0, W0).transpose(0, 2, 3, 1)     # NHWC

    def branch(w1, b1, w2, b2):
        t = jnp.maximum(_convt_ref(x, w1, b1), 0.0)
        t = jax.nn.sigmoid(_convt_ref(t, w2, b2))
        return t.reshape(B, IMAGE_SIZE * IMAGE_SIZE * C_DIM)   # c_dim == 1

    x1 = branch(tp["d1_w"], tp["d1_b"], tp["d2_w"], tp["d2_b"])
    x2 = branch(tp["d1b_w"], tp["d1b_b"], tp["d2b_w"], tp["d2b_b"])
    return jnp.concatenate([x1, x2], axis=0)


if __name__ == "__main__":
    observation_dim = 32
    batch = 2
    key = jax.random.PRNGKey(0)
    pkey, zkey = jax.random.split(key)

    torch_params = init_torch_params(pkey, observation_dim)
    kernel_params = prepare_params(torch_params, observation_dim)   # hoisted
    z = jax.random.normal(zkey, (batch, observation_dim), dtype=jnp.float32)

    fwd = jax.jit(conv_decoder_2ch)
    out = jax.block_until_ready(fwd(z, kernel_params))

    shape = tuple(out.shape)
    assert shape == (2 * batch, IMAGE_SIZE * IMAGE_SIZE * C_DIM), shape
    assert bool(jnp.all(jnp.isfinite(out)))
    assert bool(jnp.all((out >= 0.0) & (out <= 1.0)))

    ref = jax.block_until_ready(reference_forward(z, torch_params))
    np.testing.assert_allclose(np.asarray(out), np.asarray(ref),
                               rtol=2e-3, atol=2e-3)
    print("KERNEL_OK")
</pallas_src>

<mosaic_0001>
module attributes {stable_mosaic.version = 11 : i64} {
  func.func @_fused_matmul_kernel(%arg0: i32, %arg1: memref<2x32xf32, #tpu.memory_space<vmem>>, %arg2: memref<32x2048xf32, #tpu.memory_space<vmem>>, %arg3: memref<1x2048xf32, #tpu.memory_space<vmem>>, %arg4: memref<2x2048xf32, #tpu.memory_space<vmem>>) attributes {dimension_semantics = [#tpu.dimension_semantics<parallel>], iteration_bounds = array<i64: 8>, scalar_prefetch = 0 : i64, scratch_operands = 0 : i64, tpu.core_type = #tpu.core_type<tc>, window_params = [{pipeline_mode = #tpu.pipeline_mode<synchronous>, transform_indices = @transform_0, window_bounds = array<i64: 2, 32>}, {transform_indices = @transform_1, window_bounds = array<i64: 32, 2048>}, {transform_indices = @transform_2, window_bounds = array<i64: 1, 2048>}, {transform_indices = @transform_3, window_bounds = array<i64: 2, 2048>}]} {
    %c0 = arith.constant 0 : index
    %c0_0 = arith.constant 0 : index
    %0 = vector.load %arg1[%c0, %c0_0] : memref<2x32xf32, #tpu.memory_space<vmem>>, vector<2x32xf32>
    %c0_1 = arith.constant 0 : index
    %c0_2 = arith.constant 0 : index
    %1 = vector.load %arg2[%c0_1, %c0_2] : memref<32x2048xf32, #tpu.memory_space<vmem>>, vector<32x2048xf32>
    %cst = arith.constant dense<0.000000e+00> : vector<2x2048xf32>
    %2 = tpu.matmul %0, %1, %cst {dimension_numbers = #tpu.dot_dimension_numbers<[1], [0], [0], [1], [0, 0, 1, 1], [], []>} : vector<2x32xf32>, vector<32x2048xf32>, vector<2x2048xf32> -> vector<2x2048xf32>
    %c0_3 = arith.constant 0 : index
    %c0_4 = arith.constant 0 : index
    %3 = vector.load %arg3[%c0_3, %c0_4] : memref<1x2048xf32, #tpu.memory_space<vmem>>, vector<1x2048xf32>
    %4 = vector.broadcast %3 : vector<1x2048xf32> to vector<2x2048xf32>
    %5 = arith.addf %2, %4 : vector<2x2048xf32>
    %cst_5 = arith.constant 0.000000e+00 : f32
    %6 = vector.broadcast %cst_5 : f32 to vector<2x2048xf32>
    %7 = arith.maximumf %5, %6 : vector<2x2048xf32>
    %c0_6 = arith.constant 0 : index
    %c0_7 = arith.constant 0 : index
    %8 = vector.load %arg4[%c0_6, %c0_7] : memref<2x2048xf32, #tpu.memory_space<vmem>>, vector<2x2048xf32>
    tpu.vector_store %arg4[%c0_6, %c0_7], %7 {strides = array<i32>} : memref<2x2048xf32, #tpu.memory_space<vmem>>, vector<2x2048xf32>,
    return
  }
  func.func @transform_0(%arg0: i32) -> (i32, i32) {
    %c0_i32 = arith.constant 0 : i32
    %c0_i32_0 = arith.constant 0 : i32
    %c0_i32_1 = arith.constant 0 : i32
    return %c0_i32, %c0_i32_0 : i32, i32
  }
  func.func @transform_1(%arg0: i32) -> (i32, i32) {
    %c0_i32 = arith.constant 0 : i32
    %c0_i32_0 = arith.constant 0 : i32
    return %c0_i32, %arg0 : i32, i32
  }
  func.func @transform_2(%arg0: i32) -> (i32, i32) {
    %c0_i32 = arith.constant 0 : i32
    %c0_i32_0 = arith.constant 0 : i32
    return %c0_i32, %arg0 : i32, i32
  }
  func.func @transform_3(%arg0: i32) -> (i32, i32) {
    %c0_i32 = arith.constant 0 : i32
    %c0_i32_0 = arith.constant 0 : i32
    return %c0_i32, %arg0 : i32, i32
  }
}

module attributes {stable_mosaic.version = 11 : i64} {
  func.func @_fused_matmul_kernel(%arg0: i32, %arg1: memref<128x576xf32, #tpu.memory_space<vmem>>, %arg2: memref<576x256xf32, #tpu.memory_space<vmem>>, %arg3: memref<1x256xf32, #tpu.memory_space<vmem>>, %arg4: memref<128x256xf32, #tpu.memory_space<vmem>>) attributes {dimension_semantics = [#tpu.dimension_semantics<parallel>], iteration_bounds = array<i64: 4>, scalar_prefetch = 0 : i64, scratch_operands = 0 : i64, tpu.core_type = #tpu.core_type<tc>, window_params = [{transform_indices = @transform_0, window_bounds = array<i64: 128, 576>}, {pipeline_mode = #tpu.pipeline_mode<synchronous>, transform_indices = @transform_1, window_bounds = array<i64: 576, 256>}, {pipeline_mode = #tpu.pipeline_mode<synchronous>, transform_indices = @transform_2, window_bounds = array<i64: 1, 256>}, {transform_indices = @transform_3, window_bounds = array<i64: 128, 256>}]} {
    %c0 = arith.constant 0 : index
    %c0_0 = arith.constant 0 : index
    %0 = vector.load %arg1[%c0, %c0_0] : memref<128x576xf32, #tpu.memory_space<vmem>>, vector<128x576xf32>
    %c0_1 = arith.constant 0 : index
    %c0_2 = arith.constant 0 : index
    %1 = vector.load %arg2[%c0_1, %c0_2] : memref<576x256xf32, #tpu.memory_space<vmem>>, vector<576x256xf32>
    %cst = arith.constant dense<0.000000e+00> : vector<128x256xf32>
    %2 = tpu.matmul %0, %1, %cst {dimension_numbers = #tpu.dot_dimension_numbers<[1], [0], [0], [1], [0, 0, 1, 1], [], []>} : vector<128x576xf32>, vector<576x256xf32>, vector<128x256xf32> -> vector<128x256xf32>
    %c0_3 = arith.constant 0 : index
    %c0_4 = arith.constant 0 : index
    %3 = vector.load %arg3[%c0_3, %c0_4] : memref<1x256xf32, #tpu.memory_space<vmem>>, vector<1x256xf32>
    %4 = vector.broadcast %3 : vector<1x256xf32> to vector<128x256xf32>
    %5 = arith.addf %2, %4 : vector<128x256xf32>
    %cst_5 = arith.constant 0.000000e+00 : f32
    %6 = vector.broadcast %cst_5 : f32 to vector<128x256xf32>
    %7 = arith.maximumf %5, %6 : vector<128x256xf32>
    %c0_6 = arith.constant 0 : index
    %c0_7 = arith.constant 0 : index
    %8 = vector.load %arg4[%c0_6, %c0_7] : memref<128x256xf32, #tpu.memory_space<vmem>>, vector<128x256xf32>
    tpu.vector_store %arg4[%c0_6, %c0_7], %7 {strides = array<i32>} : memref<128x256xf32, #tpu.memory_space<vmem>>, vector<128x256xf32>,
    return
  }
  func.func @transform_0(%arg0: i32) -> (i32, i32) {
    %c0_i32 = arith.constant 0 : i32
    %c0_i32_0 = arith.constant 0 : i32
    return %arg0, %c0_i32 : i32, i32
  }
  func.func @transform_1(%arg0: i32) -> (i32, i32) {
    %c0_i32 = arith.constant 0 : i32
    %c0_i32_0 = arith.constant 0 : i32
    %c0_i32_1 = arith.constant 0 : i32
    return %c0_i32, %c0_i32_0 : i32, i32
  }
  func.func @transform_2(%arg0: i32) -> (i32, i32) {
    %c0_i32 = arith.constant 0 : i32
    %c0_i32_0 = arith.constant 0 : i32
    %c0_i32_1 = arith.constant 0 : i32
    return %c0_i32, %c0_i32_0 : i32, i32
  }
  func.func @transform_3(%arg0: i32) -> (i32, i32) {
    %c0_i32 = arith.constant 0 : i32
    %c0_i32_0 = arith.constant 0 : i32
    return %arg0, %c0_i32 : i32, i32
  }
}

module attributes {stable_mosaic.version = 11 : i64} {
  func.func @_fused_matmul_kernel(%arg0: i32, %arg1: i32, %arg2: memref<1x32x3072xf32, #tpu.memory_space<vmem>>, %arg3: memref<1x3072x128xf32, #tpu.memory_space<vmem>>, %arg4: memref<1x1x128xf32, #tpu.memory_space<vmem>>, %arg5: memref<1x32x128xf32, #tpu.memory_space<vmem>>) attributes {dimension_semantics = [#tpu.dimension_semantics<parallel>, #tpu.dimension_semantics<parallel>], iteration_bounds = array<i64: 2, 2>, scalar_prefetch = 0 : i64, scratch_operands = 0 : i64, tpu.core_type = #tpu.core_type<tc>, window_params = [{transform_indices = @transform_0, window_bounds = array<i64: 1, 32, 3072>}, {transform_indices = @transform_1, window_bounds = array<i64: 1, 3072, 128>}, {transform_indices = @transform_2, window_bounds = array<i64: 1, 1, 128>}, {transform_indices = @transform_3, window_bounds = array<i64: 1, 32, 128>}]} {
    %c0 = arith.constant 0 : index
    %c0_0 = arith.constant 0 : index
    %c0_1 = arith.constant 0 : index
    %0 = vector.load %arg2[%c0, %c0_0, %c0_1] : memref<1x32x3072xf32, #tpu.memory_space<vmem>>, vector<1x32x3072xf32>
    %1 = vector.shape_cast %0 : vector<1x32x3072xf32> to vector<32x3072xf32>
    %c0_2 = arith.constant 0 : index
    %c0_3 = arith.constant 0 : index
    %c0_4 = arith.constant 0 : index
    %2 = vector.load %arg3[%c0_2, %c0_3, %c0_4] : memref<1x3072x128xf32, #tpu.memory_space<vmem>>, vector<1x3072x128xf32>
    %3 = vector.shape_cast %2 : vector<1x3072x128xf32> to vector<3072x128xf32>
    %cst = arith.constant dense<0.000000e+00> : vector<32x128xf32>
    %4 = tpu.matmul %1, %3, %cst {dimension_numbers = #tpu.dot_dimension_numbers<[1], [0], [0], [1], [0, 0, 1, 1], [], []>} : vector<32x3072xf32>, vector<3072x128xf32>, vector<32x128xf32> -> vector<32x128xf32>
    %c0_5 = arith.constant 0 : index
    %c0_6 = arith.constant 0 : index
    %c0_7 = arith.constant 0 : index
    %5 = vector.load %arg4[%c0_5, %c0_6, %c0_7] : memref<1x1x128xf32, #tpu.memory_space<vmem>>, vector<1x1x128xf32>
    %6 = vector.shape_cast %5 : vector<1x1x128xf32> to vector<1x128xf32>
    %7 = vector.broadcast %6 : vector<1x128xf32> to vector<32x128xf32>
    %8 = arith.addf %4, %7 : vector<32x128xf32>
    %9 = arith.negf %8 : vector<32x128xf32>
    %10 = math.exp %9 : vector<32x128xf32>
    %cst_8 = arith.constant 1.000000e+00 : f32
    %11 = vector.broadcast %cst_8 : f32 to vector<32x128xf32>
    %12 = arith.addf %11, %10 : vector<32x128xf32>
    %13 = arith.divf %11, %12 : vector<32x128xf32>
    %c0_9 = arith.constant 0 : index
    %c0_10 = arith.constant 0 : index
    %c0_11 = arith.constant 0 : index
    %14 = vector.load %arg5[%c0_9, %c0_10, %c0_11] : memref<1x32x128xf32, #tpu.memory_space<vmem>>, vector<1x32x128xf32>
    %15 = vector.shape_cast %14 : vector<1x32x128xf32> to vector<32x128xf32>
    %16 = vector.shape_cast %13 : vector<32x128xf32> to vector<1x32x128xf32>
    tpu.vector_store %arg5[%c0_9, %c0_10, %c0_11], %16 {strides = array<i32>} : memref<1x32x128xf32, #tpu.memory_space<vmem>>, vector<1x32x128xf32>,
    return
  }
  func.func @transform_0(%arg0: i32, %arg1: i32) -> (i32, i32, i32) {
    %c0_i32 = arith.constant 0 : i32
    %c0_i32_0 = arith.constant 0 : i32
    return %arg0, %arg1, %c0_i32 : i32, i32, i32
  }
  func.func @transform_1(%arg0: i32, %arg1: i32) -> (i32, i32, i32) {
    %c0_i32 = arith.constant 0 : i32
    %c0_i32_0 = arith.constant 0 : i32
    %c0_i32_1 = arith.constant 0 : i32
    return %arg0, %c0_i32, %c0_i32_0 : i32, i32, i32
  }
  func.func @transform_2(%arg0: i32, %arg1: i32) -> (i32, i32, i32) {
    %c0_i32 = arith.constant 0 : i32
    %c0_i32_0 = arith.constant 0 : i32
    %c0_i32_1 = arith.constant 0 : i32
    return %arg0, %c0_i32, %c0_i32_0 : i32, i32, i32
  }
  func.func @transform_3(%arg0: i32, %arg1: i32) -> (i32, i32, i32) {
    %c0_i32 = arith.constant 0 : i32
    %c0_i32_0 = arith.constant 0 : i32
    return %arg0, %arg1, %c0_i32 : i32, i32, i32
  }
}

</mosaic_0001>

<bundles_post_ra>
// kernel: conv_decoder_2ch.3
= control target key start
LH: loop header
LB: loop body
LE: loop exit
PB: predicated region body
PF: predicated region fallthrough
CT: control target
= control target key end

     0   :  { %8 = vsyncpa [#allocation3], 0  ;;  %s1797_s0 = inlined_call_operand.hbm [shape: f32[2,32], index: 0, kind: input, shape index: {}]   ;;  %s1798_s1 = inlined_call_operand.hbm [shape: f32[32,16384], index: 1, kind: input, shape index: {}]   ;;  %s1799_s2 = inlined_call_operand.hbm [shape: f32[1,16384], index: 2, kind: input, shape index: {}]   ;;  %s1800_s3 = inlined_call_operand.vmem [shape: f32[2,16384], index: 3, kind: output, shape index: {}]  }
   0x1   :  { %9 = vsyncpa [#allocation5], 0 }
   0x2   :  { %11 = vsyncpa [#allocation5 + $0x1], 0  ;;  %s1479_s12 = smov 0   ;;  %s1481_s13 = smov 0  }
   0x3   :  { %s1483_s14 = smov 0   ;;  %s1485_s15 = smov 0  }
   0x4 LB: > { %s1500_s16 = sadd.s32 1, %s1449_s15   ;;  %s45_s17 = sadd.s32 1, %s1445_s14  ;;  %s1449_s15 = sphi %s1485_s15, %s1822_s15   ;;  %s1445_s14 = sphi %s1483_s14, %s1821_s14   ;;  %s1441_s13 = sphi %s1481_s13, %s1820_s13   ;;  %s1437_s12 = sphi %s1479_s12, %s1819_s12  }
   0x5   : > { %s42_s18 = ssub.s32 %s1449_s15, %s1500_s16  ;;  %p52_p0 = scmp.ne.s32.totalorder %s1445_s14, %s1441_s13 }
   0x6   : > { %p43_p1 = scmp.eq.s32.totalorder %s42_s18, 0  ;;  %p53_p2 = scmp.eq.s32.totalorder %s1449_s15, 0 }
   0x7   : > { %p1283_p3 = scmp.lt.s32.totalorder %s1449_s15, 8  ;;  %s145_s20 = sand.u32 1, %s1449_s15  }
   0x8   : > { %s1510_s19 = scalar_select %p43_p1, %s1445_s14, %s45_s17  }
   0x9   : > { %p54_p4 = por %p53_p2, %p52_p0  ;;  %s147_s21 = sand.u32 1, %s1445_s14  }
   0xa   : > { %s1175_s22 = sshll.u32 %s147_s21, 9  ;;  %s1197_s23 = sshll.u32 %s1449_s15, 11 }
   0xb   : > { %s1520_s26 = scalar_lea.hbm %s1798_s1, %s1197_s23  ;;  %s149_s27 = scalar_lea.vmem [#allocation4], %s1175_s22 }
   0xc   : > { %s156_s28 = sshll.u32 %s149_s27, 4  ;;  %p1522_p5 = pnand %p1283_p3, %p54_p4  ;;  %s1526_s28 = int_to_ptr.vmem [resolvable:$true] %s156_s28 }
   0xd   : > { %s1528_s30 = scalar_lea.sflag [#allocation5], %s145_s20  ;;  %s1323_s4 = scalar_lea.hbm %s1520_s26, 8192 }
   0xe   : > { %s1807_s29 = scalar_select %p1522_p5, 1, 0 }
   0xf   : > { %p1324_p6 = scmp.ne.s32.totalorder %s1520_s26, %s1323_s4  ;;  %p1802_p7 = pneg %p1522_p5 }
  0x10   : > { %s1328_s7 = scalar_lea.hbm %s1798_s1, 65536  ;;  %p1329_p10 = scmp.lt.u32.totalorder %s1520_s26, %s1798_s1 }
  0x11   : > { %p1326_p8 = pnand %p1802_p7, %p1324_p6  ;;  %p1330_p11 = scmp.lt.u32.totalorder %s1328_s7, %s1323_s4 }
  0x12   : > { %p1332_p13 = scmp.lt.u32.totalorder %s1323_s4, %s1520_s26 }
  0x13   : > { %p1327_p9 = pneg %p1326_p8  ;;  %p1331_p12 = por %p1330_p11, %p1329_p10 }
  0x15   : > { %p1333_p0 = por %p1332_p13, %p1331_p12 }
  0x17   : > { %p1334_p1 = pnand %p1333_p0, %p1327_p9 }
  0x19   : > { %1337 = shalt.err (!%p1334_p1)
}
  0x1a   : > { %s1338_s10 = scalar_lea.vmem %s1526_s28, 8192  ;;  %s1451_s11 = smov [#allocation4]  }
  0x1b   : > { %p1339_p2 = scmp.ne.s32.totalorder %s1526_s28, %s1338_s10  ;;  %s1343_s17 = sshll.u32 %s1451_s11, 4  ;;  %s1344_s17 = int_to_ptr.vmem [resolvable:$false] %s1343_s17 }
  0x1c   : > { %s1345_s18 = scalar_lea.vmem %s1344_s17, 16384  ;;  %p1346_p6 = scmp.lt.s32.totalorder %s1526_s28, %s1344_s17 }
  0x1d   : > { %p1341_p3 = pnand %p1339_p2, %p1802_p7  ;;  %p1347_p8 = scmp.lt.s32.totalorder %s1345_s18, %s1338_s10 }
  0x1f   : > { %p1342_p4 = pneg %p1341_p3  ;;  %p1348_p10 = por %p1347_p8, %p1346_p6 }
  0x21   : > { %p1349_p11 = pnand %p1348_p10, %p1342_p4 }
  0x23   : > { %1352 = shalt.err (!%p1349_p11)
}
  0x24   : > { %s1452_s20 = smov 16384   ;;  %s1453_s22 = smov 2048  }
  0x25   : > { %s1454_s23 = smov 128   ;;  %s1557_s24 = sadd.s32 4294967295, %s1449_s15  }
  0x26   : > { %1278 = dma.hbm_to_vmem [thread:$0]  (!%p1522_p5), %s1520_s26, 8192, %s1526_s28, %s1528_s30, %s1452_s20, %s1453_s22, %s1454_s23  }
  0x27   : > { %p58_p9 = scmp.ne.s32.totalorder %s1441_s13, %s1437_s12  ;;  %p1801_p12 = scmp.eq.s32.totalorder %s1557_s24, 0 }
  0x28   : > { %p1172_p13 = scmp.ge.s32.totalorder %s1449_s15, 1  ;;  %p121_p0 = scmp.lt.s32.totalorder %s1449_s15, 9 }
  0x29   : > { %p1566_p1 = por %p1801_p12, %p58_p9  ;;  %s1455_s26 = smov [#allocation2]  }
  0x2a   : > { %p1570_p2 = pnand %p1172_p13, %p121_p0  ;;  %s134_s28 = sshll.u32 %s1455_s26, 4  ;;  %s135_s28 = int_to_ptr.vmem [resolvable:$true] %s134_s28 }
  0x2b   : > { %s1808_s25 = scalar_select %p1566_p1, 1, 0 }
  0x2c   : > { %s1809_s27 = scalar_select %p1570_p2, 1, 0 }
  0x2d   : > { %s1178_s4 = sshll.u32 %s147_s21, 4  ;;  %p1271_p3 = pneg %p1570_p2 }
  0x2e   : > { %s1198_s12 = sshll.u32 %s1449_s15, 8  ;;  %s170_s9 = scalar_lea.vmem [#allocation6], %s1178_s4 }
  0x2f   : > { %p1581_p4 = pnand %p1271_p3, %p1801_p12  ;;  %s1588_s8 = scalar_lea.hbm %s1799_s2, %s1198_s12 }
  0x30   : > { %s178_s10 = sshll.u32 %s170_s9, 4  ;;  %s1353_s15 = scalar_lea.hbm %s1797_s0, 32  ;;  %s1590_s10 = int_to_ptr.vmem [resolvable:$true] %s178_s10 }
  0x31   : > { %p1354_p6 = scmp.ne.s32.totalorder %s1797_s0, %s1353_s15  ;;  %p1355_p8 = pneg %p1581_p4 }
  0x32   : > { %p1360_p9 = scmp.lt.u32.totalorder %s1353_s15, %s1797_s0 }
  0x33   : > { %p1356_p10 = pnand %p1355_p8, %p1354_p6 }
  0x35   : > { %p1357_p11 = pneg %p1356_p10 }
  0x37   : > { %p1362_p13 = pnand %p1360_p9, %p1357_p11 }
  0x39   : > { %1365 = shalt.err (!%p1362_p13)
}
  0x3a   : > { %s1366_s23 = scalar_lea.vmem %s135_s28, 32  ;;  %p1374_p7 = scmp.lt.s32.totalorder %s135_s28, %s135_s28 }
  0x3b   : > { %p1367_p0 = scmp.ne.s32.totalorder %s135_s28, %s1366_s23  ;;  %p1375_p1 = scmp.lt.s32.totalorder %s1366_s23, %s1366_s23 }
  0x3d   : > { %p1369_p3 = pnand %p1367_p0, %p1355_p8  ;;  %p1376_p2 = por %p1375_p1, %p1374_p7 }
  0x3f   : > { %p1370_p12 = pneg %p1369_p3 }
  0x41   : > { %p1377_p5 = pnand %p1376_p2, %p1370_p12 }
  0x43   : > { %1380 = shalt.err (!%p1377_p5)
}
  0x44   : > { %1274 = dma.hbm_to_vmem [thread:$0]  (!%p1581_p4), %s1797_s0, 32, %s135_s28, [#allocation3]  }
  0x45   : > { %s1381_s12 = scalar_lea.hbm %s1588_s8, 256  ;;  %p1811_p8 = scmp.ne.s32.totalorder %s1807_s29, 0 }
  0x46   : > { %p1382_p6 = scmp.ne.s32.totalorder %s1588_s8, %s1381_s12  ;;  %s1386_s9 = scalar_lea.hbm %s1799_s2, 2048 }
  0x47   : > { %p1812_p10 = pneg %p1811_p8  ;;  %p1387_p5 = scmp.lt.u32.totalorder %s1588_s8, %s1799_s2 }
  0x48   : > { %p1388_p7 = scmp.lt.u32.totalorder %s1386_s9, %s1381_s12  ;;  %p1390_p1 = scmp.lt.u32.totalorder %s1381_s12, %s1588_s8 }
  0x49   : > { %p1384_p11 = pnand %p1382_p6, %p1812_p10 }
  0x4a   : > { %p1389_p12 = por %p1388_p7, %p1387_p5 }
  0x4b   : > { %p1385_p9 = pneg %p1384_p11 }
  0x4c   : > { %p1391_p2 = por %p1390_p1, %p1389_p12 }
  0x4e   : > { %p1392_p13 = pnand %p1391_p2, %p1385_p9 }
  0x50   : > { %1395 = shalt.err (!%p1392_p13)
}
  0x51   : > { %s1396_s28 = scalar_lea.vmem %s1590_s10, 256  ;;  %p1813_p0 = pmov %p1812_p10 }
  0x52   : > { %p1397_p4 = scmp.ne.s32.totalorder %s1590_s10, %s1396_s28  ;;  %s1456_s11 = smov [#allocation6]  }
  0x53   : > { %s1401_s15 = sshll.u32 %s1456_s11, 4  ;;  %s1402_s15 = int_to_ptr.vmem [resolvable:$false] %s1401_s15 }
  0x54   : > { %p1399_p3 = pnand %p1397_p4, %p1813_p0  ;;  %s1403_s17 = scalar_lea.vmem %s1402_s15, 512 }
  0x55   : > { %p1404_p10 = scmp.lt.s32.totalorder %s1590_s10, %s1402_s15  ;;  %p1405_p11 = scmp.lt.s32.totalorder %s1403_s17, %s1396_s28 }
  0x56   : > { %p1400_p6 = pneg %p1399_p3 }
  0x57   : > { %p1406_p5 = por %p1405_p11, %p1404_p10 }
  0x59   : > { %p1407_p7 = pnand %p1406_p5, %p1400_p6 }
  0x5b   : > { %1410 = shalt.err (!%p1407_p7)
}
  0x5c   : > { %1281 = dma.hbm_to_vmem [thread:$0]  (!%p1811_p8), %s1588_s8, 256, %s1590_s10, %s1528_s30  }
  0x5d   : > { %p1814_p9 = scmp.ne.s32.totalorder %s1809_s27, 0 }
  0x5e   : > { %p1815_p12 = scmp.eq.s32.totalorder (!%p1814_p9), %s1557_s24, 0 }
  0x5f   : > { %187 = sbr.rel (%p1814_p9) target bundleno = 369 (0x171), region = 32 }
  0x66   : > { %1428 = dma.done.wait (%p1815_p12), [#allocation3], 32   ;;  %p1816_p1 = pmov %p1815_p12 }
  0x67   : > { %s193_s18 = sand.u32 1, %s1557_s24   ;;  %s195_s20 = sand.u32 1, %s1441_s13  }
  0x68   : > { %1430 = vsyncadd (%p1816_p1), [#allocation3], 4294967264  ;;  %s1183_s29 = sshll.u32 %s195_s20, 9  ;;  %s194_s22 = scalar_lea.sflag [#allocation5], %s193_s18 }
  0x69   : > { %s1642_s23 = scalar_lea.vmem [#allocation4], %s1183_s29  ;;  %p1817_p8 = scmp.ne.s32.totalorder %s1808_s25, 0 }
  0x6b   : > { %1432 = dma.done.wait (%p1817_p8), %s194_s22, 8448  }
  0x6c   : > { %1434 = vsyncadd (%p1817_p8), %s194_s22, 4294958848  ;;  %v1457_v0 = vmov 0.0   ;;  %v244_v1 = vld [vmem:[%s1642_s23 + $0x8] sm:$0xff]  ;;  %v246_v3 = vld [vmem:[%s1642_s23 + $0x18] sm:$0xff]  ;;  %vm391_vm0 = vcmask 261120   ;;  %s1740_s30 = sshll.u32 %s195_s20, 4 }
  0x6d   : > { %459 = vmatprep.mubr.f32.mxu0 %v1457_v0  ;;  %530 = vmatprep.mubr.f32.mxu1 %v1457_v0  ;;  %v260_v2 = vld [vmem:[%s1642_s23 + $0x88] sm:$0xff]  ;;  %v262_v5 = vld [vmem:[%s1642_s23 + $0x98] sm:$0xff]  ;;  %v243_v6 = vld [vmem:[%s1642_s23] sm:$0xff]  ;;  %s206_s25 = scalar_lea.vmem [#allocation6], %s1740_s30  ;;  %s1185_s27 = sshll.u32 %s1557_s24, 4 }
  0x6e   : > { %v1199_v4 = vpack.c.bf16 %v260_v2, %v244_v1  ;;  %v259_v7 = vld [vmem:[%s1642_s23 + $0x80] sm:$0xff]  ;;  %v1207_v8 = vpack.c.bf16 %v262_v5, %v246_v3  ;;  %v245_v10 = vld [vmem:[%s1642_s23 + $0x10] sm:$0xff]  ;;  %v276_v12 = vld [vmem:[%s1642_s23 + $0x108] sm:$0xff]  ;;  %p1752_p2 = scmp.lt.s32.totalorder %s1185_s27, 127 }
  0x6f   : > { %v1201_v9 = vpack.c.bf16 %v259_v7, %v243_v6  ;;  %v261_v11 = vld [vmem:[%s1642_s23 + $0x90] sm:$0xff]  ;;  %v292_v14 = vld [vmem:[%s1642_s23 + $0x188] sm:$0xff]  ;;  %v278_v15 = vld [vmem:[%s1642_s23 + $0x118] sm:$0xff] }
  0x70   : > { %1200 = vmatprep.subr.bf16.mxu0 %v1199_v4  ;;  %v1209_v13 = vpack.c.bf16 %v261_v11, %v245_v10  ;;  %v294_v16 = vld [vmem:[%s1642_s23 + $0x198] sm:$0xff]  ;;  %1208 = vmatprep.subr.bf16.mxu1 %v1207_v8  ;;  %v1203_v17 = vpack.c.bf16 %v292_v14, %v276_v12  ;;  %v275_v19 = vld [vmem:[%s1642_s23 + $0x100] sm:$0xff]  ;;  %v277_v21 = vld [vmem:[%s1642_s23 + $0x110] sm:$0xff]  ;;  %s1824_s27 = smov (!%p1752_p2, %s1185_s27), 127 }
  0x71   : > { %1202 = vmatpush1.bf16.msra.mxu0 %v1201_v9  ;;  %v1211_v18 = vpack.c.bf16 %v294_v16, %v278_v15  ;;  %v291_v20 = vld [vmem:[%s1642_s23 + $0x180] sm:$0xff]  ;;  %v293_v23 = vld [vmem:[%s1642_s23 + $0x190] sm:$0xff]  ;;  %v248_v24 = vld [vmem:[%s1642_s23 + $0x28] sm:$0xff]  ;;  %s1186_s24 = sshll.u32 %s1824_s27, 1 }
  0x72   : > { %1210 = vmatpush1.bf16.msra.mxu1 %v1209_v13  ;;  %v1205_v22 = vpack.c.bf16 %v291_v20, %v275_v19  ;;  %1204 = vmatprep.subr.bf16.mxu0 %v1203_v17  ;;  %v1213_v25 = vpack.c.bf16 %v293_v23, %v277_v21  ;;  %v1667_v26 = vld [vmem:[#allocation2] sm:$0x3]  ;;  %v264_v27 = vld [vmem:[%s1642_s23 + $0xa8] sm:$0xff]  ;;  %v247_v32 = vld [vmem:[%s1642_s23 + $0x20] sm:$0xff]  ;;  %s1770_s4 = scalar_lea.vmem %s1800_s3, %s1186_s24 }
  0x73   : > { %1212 = vmatprep.subr.bf16.mxu1 %v1211_v18  ;;  %v250_v28 = vld [vmem:[%s1642_s23 + $0x38] sm:$0xff]  ;;  %v1215_v30 = vpack.c.bf16 %v264_v27, %v248_v24  ;;  %v263_v33 = vld [vmem:[%s1642_s23 + $0xa0] sm:$0xff]  ;;  %v249_v34 = vld [vmem:[%s1642_s23 + $0x30] sm:$0xff] }
  0x74   : > { %v266_v29 = vld [vmem:[%s1642_s23 + $0xb8] sm:$0xff]  ;;  %v1217_v35 = vpack.c.bf16 %v263_v33, %v247_v32  ;;  %v265_v36 = vld [vmem:[%s1642_s23 + $0xb0] sm:$0xff]  ;;  %v280_v37 = vld [vmem:[%s1642_s23 + $0x128] sm:$0xff] }
  0x75   : > { %v1223_v31 = vpack.c.bf16 %v266_v29, %v250_v28  ;;  %1206 = vmatpush1.bf16.msra.mxu0 %v1205_v22  ;;  %v296_v38 = vld [vmem:[%s1642_s23 + $0x1a8] sm:$0xff]  ;;  %v1225_v39 = vpack.c.bf16 %v265_v36, %v249_v34  ;;  %v282_v41 = vld [vmem:[%s1642_s23 + $0x138] sm:$0xff]  ;;  %v279_v43 = vld [vmem:[%s1642_s23 + $0x120] sm:$0xff]  ;;  %v311_v36 = vlaneseq }
  0x76   : > { %1214 = vmatpush1.bf16.msra.mxu1 %v1213_v25  ;;  %1216 = vmatprep.subr.bf16.mxu0 %v1215_v30  ;;  %v1219_v40 = vpack.c.bf16 %v296_v38, %v280_v37  ;;  %v298_v42 = vld [vmem:[%s1642_s23 + $0x1b8] sm:$0xff]  ;;  %v295_v45 = vld [vmem:[%s1642_s23 + $0x1a0] sm:$0xff]  ;;  %v281_v46 = vld [vmem:[%s1642_s23 + $0x130] sm:$0xff] }
  0x77   : > { %1224 = vmatprep.subr.bf16.mxu1 %v1223_v31  ;;  %v1227_v44 = vpack.c.bf16 %v298_v42, %v282_v41  ;;  %v297_v47 = vld [vmem:[%s1642_s23 + $0x1b0] sm:$0xff]  ;;  %v252_v48 = vld [vmem:[%s1642_s23 + $0x48] sm:$0xff]  ;;  %v254_v50 = vld [vmem:[%s1642_s23 + $0x58] sm:$0xff]  ;;  %v1221_v51 = vpack.c.bf16 %v295_v45, %v279_v43  ;;  %v1742_v37 = vshrl.u32 %v311_v36, 7 }
  0x78   : > { %1187 = vmatmul.mubr.msk.f32.vlgmr.msra.gmra.mrb[0].mxu0 %vm391_vm0, %v1667_v26  ;;  %v268_v49 = vld [vmem:[%s1642_s23 + $0xc8] sm:$0xff]  ;;  %v270_v52 = vld [vmem:[%s1642_s23 + $0xd8] sm:$0xff]  ;;  %v1229_v53 = vpack.c.bf16 %v297_v47, %v281_v46  ;;  %v251_v55 = vld [vmem:[%s1642_s23 + $0x40] sm:$0xff] }
  0x79   : > { %1188 = vmatmul.mubr.msk.f32.vlgmr.msra.gmra.mrb[0].mxu1 %vm391_vm0, %v1667_v26  ;;  %1218 = vmatpush1.bf16.msra.mxu0 %v1217_v35  ;;  %v1231_v54 = vpack.c.bf16 %v268_v49, %v252_v48  ;;  %v267_v56 = vld [vmem:[%s1642_s23 + $0xc0] sm:$0xff]  ;;  %v253_v57 = vld [vmem:[%s1642_s23 + $0x50] sm:$0xff]  ;;  %v1239_v58 = vpack.c.bf16 %v270_v52, %v254_v50  ;;  %v284_v60 = vld [vmem:[%s1642_s23 + $0x148] sm:$0xff]  ;;  %v313_v38 = vsub.s32 0, %v1742_v37  ;;  %v325_v41 = vsub.s32 3, %v1742_v37 }
  0x7a   : > { %1226 = vmatpush1.bf16.msra.mxu1 %v1225_v39  ;;  %1220 = vmatprep.subr.bf16.mxu0 %v1219_v40  ;;  %v269_v59 = vld [vmem:[%s1642_s23 + $0xd0] sm:$0xff]  ;;  %v300_v61 = vld [vmem:[%s1642_s23 + $0x1c8] sm:$0xff]  ;;  %v286_v62 = vld [vmem:[%s1642_s23 + $0x158] sm:$0xff]  ;;  %v1233_v1 = vpack.c.bf16 %v267_v56, %v251_v55  ;;  %v321_v39 = vsub.s32 2, %v1742_v37  ;;  %v317_v40 = vsub.s32 1, %v1742_v37  ;;  %v329_v52 = vsub.s32 4, %v1742_v37 }
  0x7b   : > { %1228 = vmatprep.subr.bf16.mxu1 %v1227_v44  ;;  %601 = vmatprep.mubr.f32.mxu0 %v1457_v0  ;;  %v302_v63 = vld [vmem:[%s1642_s23 + $0x1d8] sm:$0xff]  ;;  %v1241_v2 = vpack.c.bf16 %v269_v59, %v253_v57  ;;  %v1235_v3 = vpack.c.bf16 %v300_v61, %v284_v60  ;;  %v283_v4 = vld [vmem:[%s1642_s23 + $0x140] sm:$0xff]  ;;  %v285_v6 = vld [vmem:[%s1642_s23 + $0x150] sm:$0xff]  ;;  %v337_v56 = vsub.s32 6, %v1742_v37  ;;  %v333_v57 = vsub.s32 5, %v1742_v37 }
  0x7c   : > { %672 = vmatprep.mubr.f32.mxu1 %v1457_v0  ;;  %v299_v5 = vld [vmem:[%s1642_s23 + $0x1c0] sm:$0xff]  ;;  %v1243_v7 = vpack.c.bf16 %v302_v63, %v286_v62  ;;  %v301_v8 = vld [vmem:[%s1642_s23 + $0x1d0] sm:$0xff]  ;;  %v256_v9 = vld [vmem:[%s1642_s23 + $0x68] sm:$0xff]  ;;  %v341_v60 = vsub.s32 7, %v1742_v37 }
  0x7d   : > { %1222 = vmatpush1.bf16.msra.mxu0 %v1221_v51  ;;  %v272_v10 = vld [vmem:[%s1642_s23 + $0xe8] sm:$0xff]  ;;  %v258_v11 = vld [vmem:[%s1642_s23 + $0x78] sm:$0xff]  ;;  %v1237_v13 = vpack.c.bf16 %v299_v5, %v283_v4  ;;  %v1245_v14 = vpack.c.bf16 %v301_v8, %v285_v6  ;;  %v255_v16 = vld [vmem:[%s1642_s23 + $0x60] sm:$0xff] }
  0x7e   : > { %1230 = vmatpush1.bf16.msra.mxu1 %v1229_v53  ;;  %1232 = vmatprep.subr.bf16.mxu0 %v1231_v54  ;;  %v274_v12 = vld [vmem:[%s1642_s23 + $0xf8] sm:$0xff]  ;;  %v1247_v15 = vpack.c.bf16 %v272_v10, %v256_v9  ;;  %v271_v17 = vld [vmem:[%s1642_s23 + $0xe0] sm:$0xff]  ;;  %v257_v18 = vld [vmem:[%s1642_s23 + $0x70] sm:$0xff] }
  0x7f   : > { %1240 = vmatprep.subr.bf16.mxu1 %v1239_v58  ;;  %v1255_v19 = vpack.c.bf16 %v274_v12, %v258_v11  ;;  %v273_v20 = vld [vmem:[%s1642_s23 + $0xf0] sm:$0xff]  ;;  %v288_v21 = vld [vmem:[%s1642_s23 + $0x168] sm:$0xff]  ;;  %v290_v23 = vld [vmem:[%s1642_s23 + $0x178] sm:$0xff]  ;;  %v1249_v25 = vpack.c.bf16 %v271_v17, %v255_v16 }
  0x80   : > { %1189 = vmatmul.mubr.msk.f32.vlgmr.msra.gmra.mrb[2].mxu0 %vm391_vm0, %v1667_v26  ;;  %v304_v22 = vld [vmem:[%s1642_s23 + $0x1e8] sm:$0xff]  ;;  %v306_v24 = vld [vmem:[%s1642_s23 + $0x1f8] sm:$0xff]  ;;  %v1257_v27 = vpack.c.bf16 %v273_v20, %v257_v18  ;;  %v287_v29 = vld [vmem:[%s1642_s23 + $0x160] sm:$0xff] }
  0x81   : > { %1190 = vmatmul.mubr.msk.f32.vlgmr.msra.gmra.mrb[2].mxu1 %vm391_vm0, %v1667_v26  ;;  %1234 = vmatpush1.bf16.msra.mxu0 %v1233_v1  ;;  %v1251_v28 = vpack.c.bf16 %v304_v22, %v288_v21  ;;  %v303_v30 = vld [vmem:[%s1642_s23 + $0x1e0] sm:$0xff]  ;;  %v1259_v31 = vpack.c.bf16 %v306_v24, %v290_v23  ;;  %v289_v32 = vld [vmem:[%s1642_s23 + $0x170] sm:$0xff]  ;;  %v308_v17 = vld [vmem:[%s206_s25 + $0x8] sm:$0xff] }
  0x82   : > { %1242 = vmatpush1.bf16.msra.mxu1 %v1241_v2  ;;  %1236 = vmatprep.subr.bf16.mxu0 %v1235_v3  ;;  %v305_v33 = vld [vmem:[%s1642_s23 + $0x1f0] sm:$0xff]  ;;  %v1253_v34 = vpack.c.bf16 %v303_v30, %v287_v29  ;;  %v346_v24 = vrot.slane %v308_v17, %v313_v38  ;;  %v358_v30 = vrot.slane %v308_v17, %v325_v41 }
  0x83   : > { %1244 = vmatprep.subr.bf16.mxu1 %v1243_v7  ;;  %743 = vmatprep.mubr.f32.mxu0 %v1457_v0  ;;  %v1261_v35 = vpack.c.bf16 %v305_v33, %v289_v32 }
  0x84   : > { %814 = vmatprep.mubr.f32.mxu1 %v1457_v0 }
  0x85   : > { %1238 = vmatpush1.bf16.msra.mxu0 %v1237_v13 }
  0x86   : > { %1246 = vmatpush1.bf16.msra.mxu1 %v1245_v14  ;;  %1248 = vmatprep.subr.bf16.mxu0 %v1247_v15 }
  0x87   : > { %1256 = vmatprep.subr.bf16.mxu1 %v1255_v19 }
  0x88   : > { %1191 = vmatmul.mubr.msk.f32.vlgmr.msra.gmra.mrb[4].mxu0 %vm391_vm0, %v1667_v26 }
  0x89   : > { %1192 = vmatmul.mubr.msk.f32.vlgmr.msra.gmra.mrb[4].mxu1 %vm391_vm0, %v1667_v26  ;;  %1250 = vmatpush1.bf16.msra.mxu0 %v1249_v25 }
  0x8a   : > { %1258 = vmatpush1.bf16.msra.mxu1 %v1257_v27  ;;  %1252 = vmatprep.subr.bf16.mxu0 %v1251_v28  ;;  %v354_v27 = vrot.slane %v308_v17, %v321_v39  ;;  %v350_v28 = vrot.slane %v308_v17, %v317_v40 }
  0x8b   : > { %1260 = vmatprep.subr.bf16.mxu1 %v1259_v31  ;;  %885 = vmatprep.mubr.f32.mxu0 %v1457_v0 }
  0x8c   : > { %956 = vmatprep.mubr.f32.mxu1 %v1457_v0  ;;  %v307_v0 = vld [vmem:[%s206_s25] sm:$0xff] }
  0x8d   : > { %1254 = vmatpush1.bf16.msra.mxu0 %v1253_v34  ;;  %v314_v43 = vrot.slane %v307_v0, %v313_v38  ;;  %v322_v44 = vrot.slane %v307_v0, %v321_v39  ;;  %v318_v45 = vrot.slane %v307_v0, %v317_v40  ;;  %v326_v46 = vrot.slane %v307_v0, %v325_v41 }
  0x8e   : > { %1262 = vmatpush1.bf16.msra.mxu1 %v1261_v35  ;;  %v330_v2 = vrot.slane %v307_v0, %v329_v52  ;;  %v338_v4 = vrot.slane %v307_v0, %v337_v56  ;;  %v334_v5 = vrot.slane %v307_v0, %v333_v57  ;;  %v342_v7 = vrot.slane %v307_v0, %v341_v60 }
  0x90   : > { %1193 = vmatmul.mubr.msk.f32.vlgmr.msra.gmra.mrb[6].mxu0 %vm391_vm0, %v1667_v26 }
  0x91   : > { %1194 = vmatmul.mubr.msk.f32.vlgmr.msra.gmra.mrb[6].mxu1 %vm391_vm0, %v1667_v26  ;;  %v1458_v26 = vmov 1983009808  }
  0x92   : > { %v998_v42 = vunpack.c.l.s4 %v1458_v26 }
  0x94   : > { %v999_v48 = vunpack.c.0.s8 %v998_v42 }
  0x96   : > { %v1763_v63 = vsub.s32 %v999_v48, %v1742_v37 }
 0x14b   : > { %v461_v47 = vpop.f32.mrb[0].mxu0 }
 0x14c   : > { %v462_v49 = vadd.f32 %v461_v47, %v314_v43  ;;  %v532_v50 = vpop.f32.mrb[0].mxu1  ;;  %v463_v51 = vpop.f32.mrb[1].mxu0  ;;  %v366_v47 = vrot.slane %v308_v17, %v333_v57 }
 0x14d   : > { %v533_v53 = vadd.f32 %v532_v50, %v322_v44  ;;  %v464_v54 = vadd.f32 %v463_v51, %v318_v45  ;;  %v534_v55 = vpop.f32.mrb[1].mxu1  ;;  %v362_v45 = vrot.slane %v308_v17, %v329_v52 }
 0x14e   : > { %v963_v58 = vmax.f32 %v462_v49, 0.0  ;;  %v535_v59 = vadd.f32 %v534_v55, %v326_v46  ;;  %v370_v46 = vrot.slane %v308_v17, %v337_v56  ;;  %v374_v49 = vrot.slane %v308_v17, %v341_v60 }
 0x14f   : > { %v965_v61 = vmax.f32 %v533_v53, 0.0  ;;  %v964_v62 = vmax.f32 %v464_v54, 0.0 }
 0x150   : > { %v966_v1 = vmax.f32 %v535_v59, 0.0 }
 0x151   : > { %v995_v3 = vcombine.low %v963_v58, %v964_v62 }
 0x152   : > { %v996_v6 = vcombine.low %v965_v61, %v966_v1 }
 0x153   : > { %v1003_v8 = vrot.slane %v995_v3, %v1763_v63  ;;  %v603_v9 = vpop.f32.mrb[2].mxu0 }
 0x154   : > { %v1010_v10 = vrot.slane %v996_v6, %v1763_v63  ;;  %v604_v11 = vadd.f32 %v603_v9, %v330_v2  ;;  %v674_v12 = vpop.f32.mrb[2].mxu1  ;;  %v605_v13 = vpop.f32.mrb[3].mxu0 }
 0x155   : > { %v675_v14 = vadd.f32 %v674_v12, %v338_v4  ;;  %v606_v15 = vadd.f32 %v605_v13, %v334_v5  ;;  %v676_v16 = vpop.f32.mrb[3].mxu1 }
 0x156   : > { %v1011_v18 = vcombine.low %v1003_v8, %v1010_v10  ;;  %v967_v19 = vmax.f32 %v604_v11, 0.0  ;;  %v677_v20 = vadd.f32 %v676_v16, %v342_v7 }
 0x157   : > { %v969_v21 = vmax.f32 %v675_v14, 0.0  ;;  %v968_v22 = vmax.f32 %v606_v15, 0.0 }
 0x158   : > { %1067 = vst [vmem:[%s1770_s4] sm:$0xff] %v1011_v18  ;;  %v970_v23 = vmax.f32 %v677_v20, 0.0 }
 0x159   : > { %v1012_v25 = vcombine.low %v967_v19, %v968_v22 }
 0x15a   : > { %v1013_v29 = vcombine.low %v969_v21, %v970_v23 }
 0x15b   : > { %v1020_v31 = vrot.slane %v1012_v25, %v1763_v63  ;;  %v745_v32 = vpop.f32.mrb[4].mxu0 }
 0x15c   : > { %v1027_v33 = vrot.slane %v1013_v29, %v1763_v63  ;;  %v746_v34 = vadd.f32 %v745_v32, %v346_v24  ;;  %v816_v35 = vpop.f32.mrb[4].mxu1  ;;  %v747_v36 = vpop.f32.mrb[5].mxu0 }
 0x15d   : > { %v817_v37 = vadd.f32 %v816_v35, %v354_v27  ;;  %v748_v0 = vadd.f32 %v747_v36, %v350_v28  ;;  %v818_v26 = vpop.f32.mrb[5].mxu1 }
 0x15e   : > { %v1028_v42 = vcombine.low %v1020_v31, %v1027_v33  ;;  %v971_v43 = vmax.f32 %v746_v34, 0.0  ;;  %v819_v38 = vadd.f32 %v818_v26, %v358_v30 }
 0x15f   : > { %v973_v44 = vmax.f32 %v817_v37, 0.0  ;;  %v972_v39 = vmax.f32 %v748_v0, 0.0 }
 0x160   : > { %1068 = vst [vmem:[%s1770_s4 + $0x8] sm:$0xff] %v1028_v42  ;;  %v974_v40 = vmax.f32 %v819_v38, 0.0 }
 0x161   : > { %v1029_v41 = vcombine.low %v971_v43, %v972_v39 }
 0x162   : > { %v1030_v48 = vcombine.low %v973_v44, %v974_v40 }
 0x163   : > { %v1037_v50 = vrot.slane %v1029_v41, %v1763_v63  ;;  %v887_v51 = vpop.f32.mrb[6].mxu0 }
 0x164   : > { %v1044_v53 = vrot.slane %v1030_v48, %v1763_v63  ;;  %v888_v54 = vadd.f32 %v887_v51, %v362_v45  ;;  %v958_v55 = vpop.f32.mrb[6].mxu1  ;;  %v889_v58 = vpop.f32.mrb[7].mxu0 }
 0x165   : > { %v959_v59 = vadd.f32 %v958_v55, %v370_v46  ;;  %v890_v61 = vadd.f32 %v889_v58, %v366_v47  ;;  %v960_v62 = vpop.f32.mrb[7].mxu1 }
 0x166   : > { %v1045_v1 = vcombine.low %v1037_v50, %v1044_v53  ;;  %v975_v52 = vmax.f32 %v888_v54, 0.0  ;;  %v961_v2 = vadd.f32 %v960_v62, %v374_v49 }
 0x167   : > { %v977_v56 = vmax.f32 %v959_v59, 0.0  ;;  %v976_v57 = vmax.f32 %v890_v61, 0.0 }
 0x168   : > { %1069 = vst [vmem:[%s1770_s4 + $0x10] sm:$0xff] %v1045_v1  ;;  %v978_v3 = vmax.f32 %v961_v2, 0.0 }
 0x169   : > { %v1046_v60 = vcombine.low %v975_v52, %v976_v57 }
 0x16a   : > { %v1047_v4 = vcombine.low %v977_v56, %v978_v3 }
 0x16b   : > { %v1054_v5 = vrot.slane %v1046_v60, %v1763_v63 }
 0x16c   : > { %v1061_v6 = vrot.slane %v1047_v4, %v1763_v63 }
 0x16e   : > { %v1062_v7 = vcombine.low %v1054_v5, %v1061_v6 }
 0x170   : > { %1070 = vst [vmem:[%s1770_s4 + $0x18] sm:$0xff] %v1062_v7 }
 0x171 PF: > { %p14_p13 = scmp.ge.s32.totalorder %s1500_s16, 10   ;;  %s1819_s12 = smov %s1441_s13 }
 0x172   : > { %s1820_s13 = smov %s1445_s14  ;;  %s1821_s14 = smov %s1510_s19 }
 0x173   : > { %s1822_s15 = smov %s1500_s16  ;;  %16 = sbr.rel (!%p14_p13) target bundleno = 4 (0x4), region = 88 }
 0x17a   :  { %1093 = vsyncpa [#allocation3], 1 }
 0x17b   :  { %1095 = vsyncpa [#allocation3 + $0x1], 1 }
 0x17c   :  { %1096 = vsyncpa [#allocation5], 1 }
 0x17d   :  { %1098 = vsyncpa [#allocation5 + $0x1], 1 }

// kernel: conv_decoder_2ch.4
= control target key start
LH: loop header
LB: loop body
LE: loop exit
PB: predicated region body
PF: predicated region fallthrough
CT: control target
= control target key end

     0   :  { %s1409_s12 = smov 0   ;;  %s2197_s0 = inlined_call_operand.vmem [shape: f32[512,576], index: 0, kind: input, shape index: {}]   ;;  %s2198_s1 = inlined_call_operand.vmem [shape: f32[576,256], index: 1, kind: input, shape index: {}]   ;;  %s2199_s2 = inlined_call_operand.vmem [shape: f32[1,256], index: 2, kind: input, shape index: {}]   ;;  %s2200_s3 = inlined_call_operand.vmem [shape: f32[512,256], index: 3, kind: output, shape index: {}]  }
   0x1 LB: > { %s1069_s13 = sadd.s32 4294967295, %s1386_s12   ;;  %p1073_p0 = scmp.ge.s32.totalorder %s1386_s12, 1  ;;  %s1386_s12 = sphi %s1409_s12, %s13_s12  }
   0x2   : > { %p139_p1 = scmp.lt.s32.totalorder %s1386_s12, 5 }
   0x4   : > { %p140_p2 = pnand %p1073_p0, %p139_p1 }
   0x5   : > { %v260_v0 = vld [vmem:[%s2198_s1 + $0x8] sm:$0xff] (!%p140_p2)  ;;  %v262_v1 = vld [vmem:[%s2198_s1 + $0x18] sm:$0xff] (!%p140_p2)  ;;  %v259_v5 = vld [vmem:[%s2198_s1] sm:$0xff] (!%p140_p2)  ;;  %s1636_s7 = sshll.u32 (!%p140_p2), %s1069_s13, 4  ;;  %vm415_vm0 = vcmask (!%p140_p2), 523264  }
   0x6   : > { %143 = sbr.rel (%p140_p2) target bundleno = 384 (0x180), region = 32  ;;  %v324_v2 = vld [vmem:[%s2198_s1 + $0x208] sm:$0xff] (!%p140_p2)  ;;  %v1098_v3 = vpack.c.bf16 (!%p140_p2), %v262_v1, %v260_v0  ;;  %v326_v4 = vld [vmem:[%s2198_s1 + $0x218] sm:$0xff] (!%p140_p2)  ;;  %v261_v6 = vld [vmem:[%s2198_s1 + $0x10] sm:$0xff] (!%p140_p2)  ;;  %p166_p3 = scmp.lt.s32.totalorder (!%p140_p2), %s1636_s7, 63 }
   0x7   : > { %v1435_v7 = vpack.c.bf16 (!%p140_p2), %v326_v4, %v324_v2  ;;  %v1100_v8 = vpack.c.bf16 (!%p140_p2), %v261_v6, %v259_v5  ;;  %v323_v9 = vld [vmem:[%s2198_s1 + $0x200] sm:$0xff] (!%p140_p2)  ;;  %v325_v10 = vld [vmem:[%s2198_s1 + $0x210] sm:$0xff] (!%p140_p2)  ;;  %v264_v11 = vld [vmem:[%s2198_s1 + $0x28] sm:$0xff] (!%p140_p2) }
   0x8   : > { %1099 = vmatprep.subr.bf16.mxu1 (!%p140_p2), %v1098_v3  ;;  %v1446_v12 = vpack.c.bf16 (!%p140_p2), %v325_v10, %v323_v9  ;;  %v266_v13 = vld [vmem:[%s2198_s1 + $0x38] sm:$0xff] (!%p140_p2)  ;;  %v328_v14 = vld [vmem:[%s2198_s1 + $0x228] sm:$0xff] (!%p140_p2)  ;;  %v263_v18 = vld [vmem:[%s2198_s1 + $0x20] sm:$0xff] (!%p140_p2) }
   0x9   : > { %v330_v15 = vld [vmem:[%s2198_s1 + $0x238] sm:$0xff] (!%p140_p2)  ;;  %1163 = vmatprep.subr.bf16.mxu0 (!%p140_p2), %v1435_v7  ;;  %1101 = vmatpush1.bf16.msra.mxu1 (!%p140_p2), %v1100_v8  ;;  %v1102_v16 = vpack.c.bf16 (!%p140_p2), %v266_v13, %v264_v11  ;;  %v265_v19 = vld [vmem:[%s2198_s1 + $0x30] sm:$0xff] (!%p140_p2)  ;;  %v327_v20 = vld [vmem:[%s2198_s1 + $0x220] sm:$0xff] (!%p140_p2) }
   0xa   : > { %v1458_v17 = vpack.c.bf16 (!%p140_p2), %v330_v15, %v328_v14  ;;  %1165 = vmatpush1.bf16.msra.mxu0 (!%p140_p2), %v1446_v12  ;;  %v1104_v21 = vpack.c.bf16 (!%p140_p2), %v265_v19, %v263_v18  ;;  %v329_v22 = vld [vmem:[%s2198_s1 + $0x230] sm:$0xff] (!%p140_p2)  ;;  %v268_v23 = vld [vmem:[%s2198_s1 + $0x48] sm:$0xff] (!%p140_p2)  ;;  %v270_v24 = vld [vmem:[%s2198_s1 + $0x58] sm:$0xff] (!%p140_p2) }
   0xb   : > { %1103 = vmatprep.subr.bf16.mxu1 (!%p140_p2), %v1102_v16  ;;  %v1480_v25 = vpack.c.bf16 (!%p140_p2), %v329_v22, %v327_v20  ;;  %v1106_v26 = vpack.c.bf16 (!%p140_p2), %v270_v24, %v268_v23  ;;  %v332_v27 = vld [vmem:[%s2198_s1 + $0x248] sm:$0xff] (!%p140_p2)  ;;  %v334_v28 = vld [vmem:[%s2198_s1 + $0x258] sm:$0xff] (!%p140_p2)  ;;  %v267_v29 = vld [vmem:[%s2198_s1 + $0x40] sm:$0xff] (!%p140_p2) }
   0xc   : > { %1167 = vmatprep.subr.bf16.mxu0 (!%p140_p2), %v1458_v17  ;;  %v1491_v30 = vpack.c.bf16 (!%p140_p2), %v334_v28, %v332_v27  ;;  %v269_v31 = vld [vmem:[%s2198_s1 + $0x50] sm:$0xff] (!%p140_p2)  ;;  %v331_v32 = vld [vmem:[%s2198_s1 + $0x240] sm:$0xff] (!%p140_p2)  ;;  %v272_v35 = vld [vmem:[%s2198_s1 + $0x68] sm:$0xff] (!%p140_p2) }
   0xd   : > { %v333_v33 = vld [vmem:[%s2198_s1 + $0x250] sm:$0xff]  ;;  %1105 = vmatpush1.bf16.msra.mxu1 %v1104_v21  ;;  %v1108_v34 = vpack.c.bf16 %v269_v31, %v267_v29  ;;  %v274_v36 = vld [vmem:[%s2198_s1 + $0x78] sm:$0xff]  ;;  %v336_v37 = vld [vmem:[%s2198_s1 + $0x268] sm:$0xff]  ;;  %s2202_s7 = smov (!%p166_p3, %s1636_s7), 63 }
   0xe   : > { %1169 = vmatpush1.bf16.msra.mxu0 %v1480_v25  ;;  %1107 = vmatprep.subr.bf16.mxu1 %v1106_v26  ;;  %v1512_v38 = vpack.c.bf16 %v333_v33, %v331_v32  ;;  %v1110_v39 = vpack.c.bf16 %v274_v36, %v272_v35  ;;  %v338_v40 = vld [vmem:[%s2198_s1 + $0x278] sm:$0xff]  ;;  %v271_v41 = vld [vmem:[%s2198_s1 + $0x60] sm:$0xff]  ;;  %v273_v42 = vld [vmem:[%s2198_s1 + $0x70] sm:$0xff]  ;;  %s1370_s5 = smul.u32 40, %s2202_s7  ;;  %s1097_s10 = sshll.u32 %s2202_s7, 4 }
   0xf   : > { %1171 = vmatprep.subr.bf16.mxu0 %v1491_v30  ;;  %v1524_v43 = vpack.c.bf16 %v338_v40, %v336_v37  ;;  %v335_v44 = vld [vmem:[%s2198_s1 + $0x260] sm:$0xff]  ;;  %v337_v45 = vld [vmem:[%s2198_s1 + $0x270] sm:$0xff]  ;;  %v276_v46 = vld [vmem:[%s2198_s1 + $0x88] sm:$0xff]  ;;  %v1112_v50 = vpack.c.bf16 %v273_v42, %v271_v41  ;;  %s2126_s15 = scalar_lea.vmem %s2200_s3, %s1097_s10 }
  0x10   : > { %v278_v47 = vld [vmem:[%s2198_s1 + $0x98] sm:$0xff]  ;;  %v340_v48 = vld [vmem:[%s2198_s1 + $0x288] sm:$0xff]  ;;  %v1545_v51 = vpack.c.bf16 %v337_v45, %v335_v44  ;;  %v275_v53 = vld [vmem:[%s2198_s1 + $0x80] sm:$0xff]  ;;  %s1768_s26 = scalar_lea.vmem %s2197_s0, %s1370_s5 }
  0x11   : > { %v342_v49 = vld [vmem:[%s2198_s1 + $0x298] sm:$0xff]  ;;  %1109 = vmatpush1.bf16.msra.mxu1 %v1108_v34  ;;  %v1114_v52 = vpack.c.bf16 %v278_v47, %v276_v46  ;;  %v277_v54 = vld [vmem:[%s2198_s1 + $0x90] sm:$0xff]  ;;  %v339_v55 = vld [vmem:[%s2198_s1 + $0x280] sm:$0xff] }
  0x12   : > { %1173 = vmatpush1.bf16.msra.mxu0 %v1512_v38  ;;  %1111 = vmatprep.subr.bf16.mxu1 %v1110_v39  ;;  %v1557_v56 = vpack.c.bf16 %v342_v49, %v340_v48  ;;  %v341_v57 = vld [vmem:[%s2198_s1 + $0x290] sm:$0xff]  ;;  %v280_v58 = vld [vmem:[%s2198_s1 + $0xa8] sm:$0xff]  ;;  %v282_v59 = vld [vmem:[%s2198_s1 + $0xb8] sm:$0xff]  ;;  %v1116_v62 = vpack.c.bf16 %v277_v54, %v275_v53 }
  0x13   : > { %1175 = vmatprep.subr.bf16.mxu0 %v1524_v43  ;;  %v344_v60 = vld [vmem:[%s2198_s1 + $0x2a8] sm:$0xff]  ;;  %v346_v61 = vld [vmem:[%s2198_s1 + $0x2b8] sm:$0xff]  ;;  %v1575_v63 = vpack.c.bf16 %v341_v57, %v339_v55  ;;  %v1118_v0 = vpack.c.bf16 %v282_v59, %v280_v58  ;;  %v279_v1 = vld [vmem:[%s2198_s1 + $0xa0] sm:$0xff] }
  0x14   : > { %v281_v2 = vld [vmem:[%s2198_s1 + $0xb0] sm:$0xff]  ;;  %v343_v3 = vld [vmem:[%s2198_s1 + $0x2a0] sm:$0xff]  ;;  %v1587_v4 = vpack.c.bf16 %v346_v61, %v344_v60  ;;  %v284_v6 = vld [vmem:[%s2198_s1 + $0xc8] sm:$0xff] }
  0x15   : > { %1113 = vmatpush1.bf16.msra.mxu1 %v1112_v50  ;;  %v345_v5 = vld [vmem:[%s2198_s1 + $0x2b0] sm:$0xff]  ;;  %v286_v8 = vld [vmem:[%s2198_s1 + $0xd8] sm:$0xff]  ;;  %v348_v9 = vld [vmem:[%s2198_s1 + $0x2c8] sm:$0xff]  ;;  %v1120_v11 = vpack.c.bf16 %v281_v2, %v279_v1 }
  0x16   : > { %1177 = vmatpush1.bf16.msra.mxu0 %v1545_v51  ;;  %1115 = vmatprep.subr.bf16.mxu1 %v1114_v52  ;;  %v350_v10 = vld [vmem:[%s2198_s1 + $0x2d8] sm:$0xff]  ;;  %v1605_v13 = vpack.c.bf16 %v345_v5, %v343_v3  ;;  %v1122_v14 = vpack.c.bf16 %v286_v8, %v284_v6  ;;  %v283_v15 = vld [vmem:[%s2198_s1 + $0xc0] sm:$0xff]  ;;  %v285_v16 = vld [vmem:[%s2198_s1 + $0xd0] sm:$0xff] }
  0x17   : > { %1179 = vmatprep.subr.bf16.mxu0 %v1557_v56  ;;  %v347_v18 = vld [vmem:[%s2198_s1 + $0x2c0] sm:$0xff]  ;;  %v1617_v19 = vpack.c.bf16 %v350_v10, %v348_v9  ;;  %v349_v20 = vld [vmem:[%s2198_s1 + $0x2d0] sm:$0xff]  ;;  %v288_v21 = vld [vmem:[%s2198_s1 + $0xe8] sm:$0xff]  ;;  %v1124_v26 = vpack.c.bf16 %v285_v16, %v283_v15 }
  0x18   : > { %v290_v22 = vld [vmem:[%s2198_s1 + $0xf8] sm:$0xff]  ;;  %v352_v23 = vld [vmem:[%s2198_s1 + $0x2e8] sm:$0xff]  ;;  %v1639_v27 = vpack.c.bf16 %v349_v20, %v347_v18  ;;  %v287_v29 = vld [vmem:[%s2198_s1 + $0xe0] sm:$0xff] }
  0x19   : > { %1117 = vmatpush1.bf16.msra.mxu1 %v1116_v62  ;;  %v354_v24 = vld [vmem:[%s2198_s1 + $0x2f8] sm:$0xff]  ;;  %v1126_v28 = vpack.c.bf16 %v290_v22, %v288_v21  ;;  %v289_v31 = vld [vmem:[%s2198_s1 + $0xf0] sm:$0xff]  ;;  %v351_v32 = vld [vmem:[%s2198_s1 + $0x2e0] sm:$0xff] }
  0x1a   : > { %1181 = vmatpush1.bf16.msra.mxu0 %v1575_v63  ;;  %1119 = vmatprep.subr.bf16.mxu1 %v1118_v0  ;;  %v1651_v33 = vpack.c.bf16 %v354_v24, %v352_v23  ;;  %v353_v34 = vld [vmem:[%s2198_s1 + $0x2f0] sm:$0xff]  ;;  %v292_v35 = vld [vmem:[%s2198_s1 + $0x108] sm:$0xff]  ;;  %v294_v36 = vld [vmem:[%s2198_s1 + $0x118] sm:$0xff]  ;;  %v1128_v40 = vpack.c.bf16 %v289_v31, %v287_v29 }
  0x1b   : > { %1183 = vmatprep.subr.bf16.mxu0 %v1587_v4  ;;  %v356_v37 = vld [vmem:[%s2198_s1 + $0x308] sm:$0xff]  ;;  %v358_v39 = vld [vmem:[%s2198_s1 + $0x318] sm:$0xff]  ;;  %v1670_v41 = vpack.c.bf16 %v353_v34, %v351_v32  ;;  %v1130_v42 = vpack.c.bf16 %v294_v36, %v292_v35  ;;  %v291_v44 = vld [vmem:[%s2198_s1 + $0x100] sm:$0xff] }
  0x1c   : > { %v293_v45 = vld [vmem:[%s2198_s1 + $0x110] sm:$0xff]  ;;  %v355_v46 = vld [vmem:[%s2198_s1 + $0x300] sm:$0xff]  ;;  %v1682_v47 = vpack.c.bf16 %v358_v39, %v356_v37  ;;  %v296_v49 = vld [vmem:[%s2198_s1 + $0x128] sm:$0xff] }
  0x1d   : > { %1121 = vmatpush1.bf16.msra.mxu1 %v1120_v11  ;;  %v357_v48 = vld [vmem:[%s2198_s1 + $0x310] sm:$0xff]  ;;  %v298_v50 = vld [vmem:[%s2198_s1 + $0x138] sm:$0xff]  ;;  %v360_v52 = vld [vmem:[%s2198_s1 + $0x328] sm:$0xff]  ;;  %v1132_v54 = vpack.c.bf16 %v293_v45, %v291_v44 }
  0x1e   : > { %1185 = vmatpush1.bf16.msra.mxu0 %v1605_v13  ;;  %1123 = vmatprep.subr.bf16.mxu1 %v1122_v14  ;;  %v362_v53 = vld [vmem:[%s2198_s1 + $0x338] sm:$0xff]  ;;  %v1705_v55 = vpack.c.bf16 %v357_v48, %v355_v46  ;;  %v1134_v57 = vpack.c.bf16 %v298_v50, %v296_v49  ;;  %v295_v58 = vld [vmem:[%s2198_s1 + $0x120] sm:$0xff]  ;;  %v297_v59 = vld [vmem:[%s2198_s1 + $0x130] sm:$0xff] }
  0x1f   : > { %1187 = vmatprep.subr.bf16.mxu0 %v1617_v19  ;;  %v359_v60 = vld [vmem:[%s2198_s1 + $0x320] sm:$0xff]  ;;  %v1717_v61 = vpack.c.bf16 %v362_v53, %v360_v52  ;;  %v361_v62 = vld [vmem:[%s2198_s1 + $0x330] sm:$0xff]  ;;  %v300_v0 = vld [vmem:[%s2198_s1 + $0x148] sm:$0xff]  ;;  %v1136_v5 = vpack.c.bf16 %v297_v59, %v295_v58 }
  0x20   : > { %v302_v1 = vld [vmem:[%s2198_s1 + $0x158] sm:$0xff]  ;;  %v364_v2 = vld [vmem:[%s2198_s1 + $0x348] sm:$0xff]  ;;  %v1736_v6 = vpack.c.bf16 %v361_v62, %v359_v60  ;;  %v299_v9 = vld [vmem:[%s2198_s1 + $0x140] sm:$0xff] }
  0x21   : > { %1125 = vmatpush1.bf16.msra.mxu1 %v1124_v26  ;;  %v366_v3 = vld [vmem:[%s2198_s1 + $0x358] sm:$0xff]  ;;  %v1138_v8 = vpack.c.bf16 %v302_v1, %v300_v0  ;;  %v301_v10 = vld [vmem:[%s2198_s1 + $0x150] sm:$0xff]  ;;  %v363_v11 = vld [vmem:[%s2198_s1 + $0x340] sm:$0xff] }
  0x22   : > { %1189 = vmatpush1.bf16.msra.mxu0 %v1639_v27  ;;  %1127 = vmatprep.subr.bf16.mxu1 %v1126_v28  ;;  %v1748_v14 = vpack.c.bf16 %v366_v3, %v364_v2  ;;  %v365_v15 = vld [vmem:[%s2198_s1 + $0x350] sm:$0xff]  ;;  %v304_v16 = vld [vmem:[%s2198_s1 + $0x168] sm:$0xff]  ;;  %v306_v18 = vld [vmem:[%s2198_s1 + $0x178] sm:$0xff]  ;;  %v1140_v22 = vpack.c.bf16 %v301_v10, %v299_v9 }
  0x23   : > { %1191 = vmatprep.subr.bf16.mxu0 %v1651_v33  ;;  %v368_v20 = vld [vmem:[%s2198_s1 + $0x368] sm:$0xff]  ;;  %v370_v21 = vld [vmem:[%s2198_s1 + $0x378] sm:$0xff]  ;;  %v303_v23 = vld [vmem:[%s2198_s1 + $0x160] sm:$0xff]  ;;  %v1774_v24 = vpack.c.bf16 %v365_v15, %v363_v11  ;;  %v1142_v26 = vpack.c.bf16 %v306_v18, %v304_v16 }
  0x24   : > { %v305_v28 = vld [vmem:[%s2198_s1 + $0x170] sm:$0xff]  ;;  %v367_v29 = vld [vmem:[%s2198_s1 + $0x360] sm:$0xff]  ;;  %v1786_v32 = vpack.c.bf16 %v370_v21, %v368_v20  ;;  %v308_v34 = vld [vmem:[%s2198_s1 + $0x188] sm:$0xff] }
  0x25   : > { %1129 = vmatpush1.bf16.msra.mxu1 %v1128_v40  ;;  %v369_v31 = vld [vmem:[%s2198_s1 + $0x370] sm:$0xff]  ;;  %v310_v35 = vld [vmem:[%s2198_s1 + $0x198] sm:$0xff]  ;;  %v180_v36 = vld [vmem:[%s1768_s26 + $0x8] sm:$0xff] }
  0x26   : > { %1193 = vmatpush1.bf16.msra.mxu0 %v1670_v41  ;;  %1131 = vmatprep.subr.bf16.mxu1 %v1130_v42  ;;  %v372_v37 = vld [vmem:[%s2198_s1 + $0x388] sm:$0xff]  ;;  %v374_v39 = vld [vmem:[%s2198_s1 + $0x398] sm:$0xff]  ;;  %v1144_v42 = vpack.c.bf16 %v305_v28, %v303_v23  ;;  %v1803_v44 = vpack.c.bf16 %v369_v31, %v367_v29  ;;  %v1146_v45 = vpack.c.bf16 %v310_v35, %v308_v34  ;;  %v307_v46 = vld [vmem:[%s2198_s1 + $0x180] sm:$0xff] }
  0x27   : > { %1195 = vmatprep.subr.bf16.mxu0 %v1682_v47  ;;  %528 = vmatprep.mubr.f32.mxu1 %v180_v36  ;;  %v182_v40 = vld [vmem:[%s1768_s26 + $0x18] sm:$0xff]  ;;  %v309_v48 = vld [vmem:[%s2198_s1 + $0x190] sm:$0xff]  ;;  %v371_v49 = vld [vmem:[%s2198_s1 + $0x380] sm:$0xff]  ;;  %v1815_v50 = vpack.c.bf16 %v374_v39, %v372_v37 }
  0x28   : > { %689 = vmatprep.mubr.f32.mxu0 %v182_v40  ;;  %v373_v52 = vld [vmem:[%s2198_s1 + $0x390] sm:$0xff]  ;;  %v312_v53 = vld [vmem:[%s2198_s1 + $0x1a8] sm:$0xff]  ;;  %v378_v58 = vld [vmem:[%s2198_s1 + $0x3b8] sm:$0xff]  ;;  %v1148_v59 = vpack.c.bf16 %v309_v48, %v307_v46 }
  0x29   : > { %1133 = vmatpush1.bf16.msra.mxu1 %v1132_v54  ;;  %v314_v54 = vld [vmem:[%s2198_s1 + $0x1b8] sm:$0xff]  ;;  %v1833_v60 = vpack.c.bf16 %v373_v52, %v371_v49  ;;  %v311_v0 = vld [vmem:[%s2198_s1 + $0x1a0] sm:$0xff]  ;;  %v313_v1 = vld [vmem:[%s2198_s1 + $0x1b0] sm:$0xff] }
  0x2a   : > { %1197 = vmatpush1.bf16.msra.mxu0 %v1705_v55  ;;  %1135 = vmatprep.subr.bf16.mxu1 %v1134_v57  ;;  %v376_v57 = vld [vmem:[%s2198_s1 + $0x3a8] sm:$0xff]  ;;  %v1150_v62 = vpack.c.bf16 %v314_v54, %v312_v53  ;;  %v375_v2 = vld [vmem:[%s2198_s1 + $0x3a0] sm:$0xff]  ;;  %v318_v9 = vld [vmem:[%s2198_s1 + $0x1d8] sm:$0xff]  ;;  %v1152_v15 = vpack.c.bf16 %v313_v1, %v311_v0 }
  0x2b   : > { %1199 = vmatprep.subr.bf16.mxu0 %v1717_v61  ;;  %v1845_v3 = vpack.c.bf16 %v378_v58, %v376_v57  ;;  %v380_v10 = vld [vmem:[%s2198_s1 + $0x3c8] sm:$0xff]  ;;  %v382_v11 = vld [vmem:[%s2198_s1 + $0x3d8] sm:$0xff]  ;;  %v315_v20 = vld [vmem:[%s2198_s1 + $0x1c0] sm:$0xff] }
  0x2c   : > { %v317_v21 = vld [vmem:[%s2198_s1 + $0x1d0] sm:$0xff]  ;;  %v1875_v23 = vpack.c.bf16 %v382_v11, %v380_v10  ;;  %v320_v28 = vld [vmem:[%s2198_s1 + $0x1e8] sm:$0xff]  ;;  %v322_v29 = vld [vmem:[%s2198_s1 + $0x1f8] sm:$0xff] }
  0x2d   : > { %1137 = vmatpush1.bf16.msra.mxu1 %v1136_v5  ;;  %v377_v5 = vld [vmem:[%s2198_s1 + $0x3b0] sm:$0xff]  ;;  %v384_v31 = vld [vmem:[%s2198_s1 + $0x3e8] sm:$0xff]  ;;  %v386_v34 = vld [vmem:[%s2198_s1 + $0x3f8] sm:$0xff]  ;;  %v1156_v35 = vpack.c.bf16 %v317_v21, %v315_v20  ;;  %v1158_v37 = vpack.c.bf16 %v322_v29, %v320_v28 }
  0x2e   : > { %1201 = vmatpush1.bf16.msra.mxu0 %v1736_v6  ;;  %1139 = vmatprep.subr.bf16.mxu1 %v1138_v8  ;;  %v316_v8 = vld [vmem:[%s2198_s1 + $0x1c8] sm:$0xff]  ;;  %v1863_v16 = vpack.c.bf16 %v377_v5, %v375_v2  ;;  %v319_v39 = vld [vmem:[%s2198_s1 + $0x1e0] sm:$0xff]  ;;  %v321_v40 = vld [vmem:[%s2198_s1 + $0x1f0] sm:$0xff] }
  0x2f   : > { %1203 = vmatprep.subr.bf16.mxu0 %v1748_v14  ;;  %v1154_v18 = vpack.c.bf16 %v318_v9, %v316_v8  ;;  %v385_v46 = vld [vmem:[%s2198_s1 + $0x3f0] sm:$0xff]  ;;  %v388_v48 = vld [vmem:[%s2198_s1 + $0x408] sm:$0xff]  ;;  %v390_v49 = vld [vmem:[%s2198_s1 + $0x418] sm:$0xff]  ;;  %v1160_v52 = vpack.c.bf16 %v321_v40, %v319_v39 }
  0x30   : > { %v1226_v54 = vpack.c.bf16 %v390_v49, %v388_v48  ;;  %v387_v57 = vld [vmem:[%s2198_s1 + $0x400] sm:$0xff]  ;;  %v389_v58 = vld [vmem:[%s2198_s1 + $0x410] sm:$0xff]  ;;  %v394_v0 = vld [vmem:[%s2198_s1 + $0x438] sm:$0xff] }
  0x31   : > { %1141 = vmatpush1.bf16.msra.mxu1 %v1140_v22  ;;  %v379_v22 = vld [vmem:[%s2198_s1 + $0x3c0] sm:$0xff]  ;;  %v181_v1 = vld [vmem:[%s1768_s26 + $0x10] sm:$0xff]  ;;  %v1228_v8 = vpack.c.bf16 %v389_v58, %v387_v57  ;;  %v186_v20 = vld [vmem:[%s1768_s26 + $0x38] sm:$0xff] }
  0x32   : > { %1205 = vmatpush1.bf16.msra.mxu0 %v1774_v24  ;;  %1143 = vmatprep.subr.bf16.mxu1 %v1142_v26  ;;  %v381_v26 = vld [vmem:[%s2198_s1 + $0x3d0] sm:$0xff]  ;;  %v187_v5 = vld [vmem:[%s1768_s26 + $0x40] sm:$0xff]  ;;  %v190_v21 = vld [vmem:[%s1768_s26 + $0x58] sm:$0xff] }
  0x33   : > { %1207 = vmatprep.subr.bf16.mxu0 %v1786_v32  ;;  %v1893_v36 = vpack.c.bf16 %v381_v26, %v379_v22  ;;  %v185_v2 = vld [vmem:[%s1768_s26 + $0x30] sm:$0xff]  ;;  %v391_v10 = vld [vmem:[%s2198_s1 + $0x420] sm:$0xff]  ;;  %v192_v22 = vld [vmem:[%s1768_s26 + $0x68] sm:$0xff] }
  0x34   : > { %v393_v11 = vld [vmem:[%s2198_s1 + $0x430] sm:$0xff]  ;;  %v395_v28 = vld [vmem:[%s2198_s1 + $0x440] sm:$0xff]  ;;  %v196_v48 = vld [vmem:[%s1768_s26 + $0x88] sm:$0xff] }
  0x35   : > { %1145 = vmatpush1.bf16.msra.mxu1 %v1144_v42  ;;  %v1902_v42 = vpack.c.bf16 %v386_v34, %v384_v31  ;;  %v397_v29 = vld [vmem:[%s2198_s1 + $0x450] sm:$0xff]  ;;  %v400_v31 = vld [vmem:[%s2198_s1 + $0x468] sm:$0xff]  ;;  %v402_v34 = vld [vmem:[%s2198_s1 + $0x478] sm:$0xff] }
  0x36   : > { %1209 = vmatpush1.bf16.msra.mxu0 %v1803_v44  ;;  %1147 = vmatprep.subr.bf16.mxu1 %v1146_v45  ;;  %v383_v45 = vld [vmem:[%s2198_s1 + $0x3e0] sm:$0xff]  ;;  %v197_v39 = vld [vmem:[%s1768_s26 + $0x90] sm:$0xff]  ;;  %v1238_v40 = vpack.c.bf16 %v402_v34, %v400_v31  ;;  %v200_v49 = vld [vmem:[%s1768_s26 + $0xa8] sm:$0xff] }
  0x37   : > { %1211 = vmatprep.subr.bf16.mxu0 %v1815_v50  ;;  %v1917_v53 = vpack.c.bf16 %v385_v46, %v383_v45  ;;  %v399_v45 = vld [vmem:[%s2198_s1 + $0x460] sm:$0xff]  ;;  %v401_v46 = vld [vmem:[%s2198_s1 + $0x470] sm:$0xff]  ;;  %v238_v31 = vld [vmem:[%s1768_s26 + $0x1d8] sm:$0xff] }
  0x38   : > { %v201_v57 = vld [vmem:[%s1768_s26 + $0xb0] sm:$0xff]  ;;  %v207_v58 = vld [vmem:[%s1768_s26 + $0xe0] sm:$0xff]  ;;  %v242_v34 = vld [vmem:[%s1768_s26 + $0x1f8] sm:$0xff] }
  0x39   : > { %1149 = vmatpush1.bf16.msra.mxu1 %v1148_v59  ;;  %v179_v59 = vld [vmem:[%s1768_s26] sm:$0xff] }
  0x3a   : > { %1213 = vmatpush1.bf16.msra.mxu0 %v1833_v60  ;;  %1151 = vmatprep.subr.bf16.mxu1 %v1150_v62  ;;  %v392_v62 = vld [vmem:[%s2198_s1 + $0x428] sm:$0xff] }
  0x3b   : > { %1215 = vmatprep.subr.bf16.mxu0 %v1845_v3  ;;  %v1230_v9 = vpack.c.bf16 %v394_v0, %v392_v62  ;;  %v210_v62 = vld [vmem:[%s1768_s26 + $0xf8] sm:$0xff]  ;;  %v209_v0 = vld [vmem:[%s1768_s26 + $0xf0] sm:$0xff] }
  0x3d   : > { %1153 = vmatpush1.bf16.msra.mxu1 %v1152_v15  ;;  %v396_v15 = vld [vmem:[%s2198_s1 + $0x448] sm:$0xff] }
  0x3e   : > { %1217 = vmatpush1.bf16.msra.mxu0 %v1863_v16  ;;  %1155 = vmatprep.subr.bf16.mxu1 %v1154_v18  ;;  %v398_v18 = vld [vmem:[%s2198_s1 + $0x458] sm:$0xff] }
  0x3f   : > { %1219 = vmatprep.subr.bf16.mxu0 %v1875_v23  ;;  %v1234_v26 = vpack.c.bf16 %v398_v18, %v396_v15  ;;  %v245_v15 = vld [vmem:[%s1768_s26 + $0x210] sm:$0xff]  ;;  %v250_v18 = vld [vmem:[%s1768_s26 + $0x238] sm:$0xff] }
  0x41   : > { %1157 = vmatpush1.bf16.msra.mxu1 %v1156_v35  ;;  %v191_v35 = vld [vmem:[%s1768_s26 + $0x60] sm:$0xff] }
  0x42   : > { %1221 = vmatpush1.bf16.msra.mxu0 %v1893_v36  ;;  %1159 = vmatprep.subr.bf16.mxu1 %v1158_v37  ;;  %v195_v37 = vld [vmem:[%s1768_s26 + $0x80] sm:$0xff] }
  0x43   : > { %1223 = vmatprep.subr.bf16.mxu0 %v1902_v42 }
  0x45   : > { %1161 = vmatpush1.bf16.msra.mxu1 %v1160_v52  ;;  %v202_v52 = vld [vmem:[%s1768_s26 + $0xb8] sm:$0xff] }
  0x46   : > { %1225 = vmatpush1.bf16.msra.mxu0 %v1917_v53  ;;  %1242 = vmatprep.subr.bf16.mxu1 %v1435_v7  ;;  %v184_v7 = vld [vmem:[%s1768_s26 + $0x28] sm:$0xff] }
  0x47   : > { %1227 = vmatprep.subr.bf16.mxu0 %v1226_v54  ;;  %v1240_v54 = vpack.c.bf16 %v401_v46, %v399_v45  ;;  %v252_v45 = vld [vmem:[%s1768_s26 + $0x248] sm:$0xff]  ;;  %v251_v46 = vld [vmem:[%s1768_s26 + $0x240] sm:$0xff] }
  0x48   : > { %529 = vmatmul.mubr.f32.vlgmr.msra.gmra.mrb[0].mxu1 %v179_v59  ;;  %v204_v59 = vld [vmem:[%s1768_s26 + $0xc8] sm:$0xff] }
  0x49   : > { %690 = vmatmul.mubr.f32.vlgmr.msra.gmra.mrb[0].mxu0 %v181_v1  ;;  %1258 = vmatpush1.bf16.msra.mxu1 %v1446_v12  ;;  %v1232_v12 = vpack.c.bf16 %v393_v11, %v391_v10  ;;  %v215_v1 = vld [vmem:[%s1768_s26 + $0x120] sm:$0xff]  ;;  %v230_v10 = vld [vmem:[%s1768_s26 + $0x198] sm:$0xff] }
  0x4a   : > { %534 = vmatprep.mubr.f32.mxu1 %v185_v2  ;;  %695 = vmatprep.mubr.f32.mxu0 %v187_v5  ;;  %v217_v2 = vld [vmem:[%s1768_s26 + $0x130] sm:$0xff]  ;;  %v220_v5 = vld [vmem:[%s1768_s26 + $0x148] sm:$0xff]  ;;  %v235_v11 = vld [vmem:[%s1768_s26 + $0x1c0] sm:$0xff] }
  0x4b   : > { %1229 = vmatpush1.bf16.msra.mxu0 %v1228_v8  ;;  %1243 = vmatprep.subr.bf16.mxu1 %v1458_v17  ;;  %v189_v17 = vld [vmem:[%s1768_s26 + $0x50] sm:$0xff]  ;;  %v1388_v8 = vmov 0.0  }
  0x4c   : > { %535 = vmatmul.mubr.f32.gmra.mrb[2].mxu1 %v184_v7  ;;  %1231 = vmatprep.subr.bf16.mxu0 %v1230_v9  ;;  %v225_v9 = vld [vmem:[%s1768_s26 + $0x170] sm:$0xff]  ;;  %v240_v7 = vld [vmem:[%s1768_s26 + $0x1e8] sm:$0xff] }
  0x4d   : > { %696 = vmatmul.mubr.f32.gmra.mrb[2].mxu0 %v186_v20  ;;  %1259 = vmatpush1.bf16.msra.mxu1 %v1480_v25  ;;  %v1236_v25 = vpack.c.bf16 %v397_v29, %v395_v28  ;;  %v255_v20 = vld [vmem:[%s1768_s26 + $0x260] sm:$0xff]  ;;  %v233_v28 = vld [vmem:[%s1768_s26 + $0x1b0] sm:$0xff] }
  0x4e   : > { %540 = vmatprep.mubr.f32.mxu1 %v190_v21  ;;  %701 = vmatprep.mubr.f32.mxu0 %v192_v22  ;;  %v222_v21 = vld [vmem:[%s1768_s26 + $0x158] sm:$0xff]  ;;  %v227_v22 = vld [vmem:[%s1768_s26 + $0x180] sm:$0xff]  ;;  %v237_v29 = vld [vmem:[%s1768_s26 + $0x1d0] sm:$0xff] }
  0x4f   : > { %1244 = vmatprep.subr.bf16.mxu1 %v1491_v30  ;;  %1233 = vmatpush1.bf16.msra.mxu0 %v1232_v12  ;;  %v194_v30 = vld [vmem:[%s1768_s26 + $0x78] sm:$0xff]  ;;  %v232_v12 = vld [vmem:[%s1768_s26 + $0x1a8] sm:$0xff] }
  0x50   : > { %541 = vmatmul.mubr.f32.gmra.mrb[4].mxu1 %v189_v17  ;;  %1235 = vmatprep.subr.bf16.mxu0 %v1234_v26  ;;  %v231_v26 = vld [vmem:[%s1768_s26 + $0x1a0] sm:$0xff]  ;;  %v236_v17 = vld [vmem:[%s1768_s26 + $0x1c8] sm:$0xff] }
  0x51   : > { %702 = vmatmul.mubr.f32.gmra.mrb[4].mxu0 %v191_v35  ;;  %1260 = vmatpush1.bf16.msra.mxu1 %v1512_v38  ;;  %v199_v38 = vld [vmem:[%s1768_s26 + $0xa0] sm:$0xff]  ;;  %v241_v35 = vld [vmem:[%s1768_s26 + $0x1f0] sm:$0xff] }
  0x52   : > { %546 = vmatprep.mubr.f32.mxu1 %v195_v37  ;;  %707 = vmatprep.mubr.f32.mxu0 %v197_v39  ;;  %v243_v37 = vld [vmem:[%s1768_s26 + $0x200] sm:$0xff] }
  0x53   : > { %1245 = vmatprep.subr.bf16.mxu1 %v1524_v43  ;;  %1237 = vmatpush1.bf16.msra.mxu0 %v1236_v25  ;;  %v205_v43 = vld [vmem:[%s1768_s26 + $0xd0] sm:$0xff]  ;;  %v247_v39 = vld [vmem:[%s1768_s26 + $0x220] sm:$0xff]  ;;  %v246_v25 = vld [vmem:[%s1768_s26 + $0x218] sm:$0xff] }
  0x54   : > { %547 = vmatmul.mubr.f32.gmra.mrb[6].mxu1 %v194_v30  ;;  %1239 = vmatprep.subr.bf16.mxu0 %v1238_v40  ;;  %v248_v40 = vld [vmem:[%s1768_s26 + $0x228] sm:$0xff]  ;;  %v253_v30 = vld [vmem:[%s1768_s26 + $0x250] sm:$0xff] }
  0x55   : > { %708 = vmatmul.mubr.f32.gmra.mrb[6].mxu0 %v196_v48  ;;  %1261 = vmatpush1.bf16.msra.mxu1 %v1545_v51  ;;  %v206_v51 = vld [vmem:[%s1768_s26 + $0xd8] sm:$0xff]  ;;  %v257_v48 = vld [vmem:[%s1768_s26 + $0x270] sm:$0xff] }
  0x56   : > { %552 = vmatprep.mubr.f32.mxu1 %v200_v49  ;;  %713 = vmatprep.mubr.f32.mxu0 %v202_v52  ;;  %v256_v49 = vld [vmem:[%s1768_s26 + $0x268] sm:$0xff]  ;;  %v258_v52 = vld [vmem:[%s1768_s26 + $0x278] sm:$0xff] }
  0x57   : > { %1246 = vmatprep.subr.bf16.mxu1 %v1557_v56  ;;  %1241 = vmatpush1.bf16.msra.mxu0 %v1240_v54  ;;  %v212_v56 = vld [vmem:[%s1768_s26 + $0x108] sm:$0xff] }
  0x58   : > { %553 = vmatmul.mubr.f32.gmra.mrb[8].mxu1 %v199_v38 }
  0x59   : > { %714 = vmatmul.mubr.f32.gmra.mrb[8].mxu0 %v201_v57  ;;  %1262 = vmatpush1.bf16.msra.mxu1 %v1575_v63  ;;  %v211_v63 = vld [vmem:[%s1768_s26 + $0x100] sm:$0xff] }
  0x5a   : > { %558 = vmatprep.mubr.f32.mxu1 %v205_v43  ;;  %719 = vmatprep.mubr.f32.mxu0 %v207_v58 }
  0x5b   : > { %1247 = vmatprep.subr.bf16.mxu1 %v1587_v4  ;;  %v214_v4 = vld [vmem:[%s1768_s26 + $0x118] sm:$0xff] }
  0x5c   : > { %559 = vmatmul.mubr.f32.gmra.mrb[10].mxu1 %v204_v59 }
  0x5d   : > { %720 = vmatmul.mubr.f32.gmra.mrb[10].mxu0 %v206_v51  ;;  %1263 = vmatpush1.bf16.msra.mxu1 %v1605_v13  ;;  %v216_v13 = vld [vmem:[%s1768_s26 + $0x128] sm:$0xff] }
  0x5e   : > { %564 = vmatprep.mubr.f32.mxu1 %v210_v62  ;;  %725 = vmatprep.mubr.f32.mxu0 %v212_v56  ;;  %v405_v56 = vlaneseq }
  0x5f   : > { %1248 = vmatprep.subr.bf16.mxu1 %v1617_v19  ;;  %v219_v19 = vld [vmem:[%s1768_s26 + $0x140] sm:$0xff] }
  0x60   : > { %565 = vmatmul.mubr.f32.gmra.mrb[12].mxu1 %v209_v0 }
  0x61   : > { %726 = vmatmul.mubr.f32.gmra.mrb[12].mxu0 %v211_v63  ;;  %1264 = vmatpush1.bf16.msra.mxu1 %v1639_v27  ;;  %v183_v27 = vld [vmem:[%s1768_s26 + $0x20] sm:$0xff] }
  0x62   : > { %570 = vmatprep.mubr.f32.mxu1 %v215_v1  ;;  %731 = vmatprep.mubr.f32.mxu0 %v217_v2  ;;  %v406_v1 = vshrl.u32 %v405_v56, 7 }
  0x63   : > { %1249 = vmatprep.subr.bf16.mxu1 %v1651_v33  ;;  %v224_v33 = vld [vmem:[%s1768_s26 + $0x168] sm:$0xff] }
  0x64   : > { %571 = vmatmul.mubr.f32.gmra.mrb[14].mxu1 %v214_v4 }
  0x65   : > { %732 = vmatmul.mubr.f32.gmra.mrb[14].mxu0 %v216_v13  ;;  %1265 = vmatpush1.bf16.msra.mxu1 %v1670_v41  ;;  %v188_v41 = vld [vmem:[%s1768_s26 + $0x48] sm:$0xff]  ;;  %v407_v13 = vsub.s32 0, %v406_v1 }
  0x66   : > { %576 = vmatprep.mubr.f32.mxu1 %v220_v5  ;;  %850 = vmatprep.mubr.f32.mxu0 %v1388_v8 }
  0x67   : > { %1250 = vmatprep.subr.bf16.mxu1 %v1682_v47  ;;  %v229_v47 = vld [vmem:[%s1768_s26 + $0x190] sm:$0xff] }
  0x68   : > { %577 = vmatmul.mubr.f32.gmra.mrb[16].mxu1 %v219_v19  ;;  %v403_v19 = vld [vmem:[%s2199_s2] sm:$0x3] }
  0x69   : > { %1079 = vmatmul.mubr.msk.f32.vlgmr.msra.gmra.mrb[0].mxu0 %vm415_vm0, %v183_v27  ;;  %1266 = vmatpush1.bf16.msra.mxu1 %v1705_v55  ;;  %v193_v55 = vld [vmem:[%s1768_s26 + $0x70] sm:$0xff] }
  0x6a   : > { %582 = vmatprep.mubr.f32.mxu1 %v225_v9  ;;  %856 = vmatprep.mubr.f32.mxu0 %v1388_v8  ;;  %v2112_v9 = vrot.slane %v403_v19, %v407_v13 }
  0x6b   : > { %1251 = vmatprep.subr.bf16.mxu1 %v1717_v61  ;;  %v234_v61 = vld [vmem:[%s1768_s26 + $0x1b8] sm:$0xff] }
  0x6c   : > { %583 = vmatmul.mubr.f32.gmra.mrb[18].mxu1 %v224_v33 }
  0x6d   : > { %1080 = vmatmul.mubr.msk.f32.gmra.mrb[2].mxu0 %vm415_vm0, %v188_v41  ;;  %1267 = vmatpush1.bf16.msra.mxu1 %v1736_v6  ;;  %v198_v6 = vld [vmem:[%s1768_s26 + $0x98] sm:$0xff] }
  0x6e   : > { %588 = vmatprep.mubr.f32.mxu1 %v230_v10  ;;  %862 = vmatprep.mubr.f32.mxu0 %v1388_v8 }
  0x6f   : > { %1252 = vmatprep.subr.bf16.mxu1 %v1748_v14  ;;  %v239_v14 = vld [vmem:[%s1768_s26 + $0x1e0] sm:$0xff] }
  0x70   : > { %589 = vmatmul.mubr.f32.gmra.mrb[20].mxu1 %v229_v47 }
  0x71   : > { %1081 = vmatmul.mubr.msk.f32.gmra.mrb[4].mxu0 %vm415_vm0, %v193_v55  ;;  %1268 = vmatpush1.bf16.msra.mxu1 %v1774_v24  ;;  %v203_v24 = vld [vmem:[%s1768_s26 + $0xc0] sm:$0xff] }
  0x72   : > { %594 = vmatprep.mubr.f32.mxu1 %v235_v11  ;;  %868 = vmatprep.mubr.f32.mxu0 %v1388_v8 }
  0x73   : > { %1253 = vmatprep.subr.bf16.mxu1 %v1786_v32  ;;  %v244_v32 = vld [vmem:[%s1768_s26 + $0x208] sm:$0xff] }
  0x74   : > { %595 = vmatmul.mubr.f32.gmra.mrb[22].mxu1 %v234_v61 }
  0x75   : > { %1082 = vmatmul.mubr.msk.f32.gmra.mrb[6].mxu0 %vm415_vm0, %v198_v6  ;;  %1269 = vmatpush1.bf16.msra.mxu1 %v1803_v44  ;;  %v208_v44 = vld [vmem:[%s1768_s26 + $0xe8] sm:$0xff] }
  0x76   : > { %600 = vmatprep.mubr.f32.mxu1 %v240_v7  ;;  %874 = vmatprep.mubr.f32.mxu0 %v1388_v8 }
  0x77   : > { %1254 = vmatprep.subr.bf16.mxu1 %v1815_v50  ;;  %v249_v50 = vld [vmem:[%s1768_s26 + $0x230] sm:$0xff] }
  0x78   : > { %601 = vmatmul.mubr.f32.gmra.mrb[24].mxu1 %v239_v14 }
  0x79   : > { %1083 = vmatmul.mubr.msk.f32.gmra.mrb[8].mxu0 %vm415_vm0, %v203_v24  ;;  %1270 = vmatpush1.bf16.msra.mxu1 %v1833_v60  ;;  %v213_v60 = vld [vmem:[%s1768_s26 + $0x110] sm:$0xff] }
  0x7a   : > { %606 = vmatprep.mubr.f32.mxu1 %v245_v15  ;;  %880 = vmatprep.mubr.f32.mxu0 %v1388_v8 }
  0x7b   : > { %1255 = vmatprep.subr.bf16.mxu1 %v1845_v3  ;;  %v254_v3 = vld [vmem:[%s1768_s26 + $0x258] sm:$0xff] }
  0x7c   : > { %607 = vmatmul.mubr.f32.gmra.mrb[26].mxu1 %v244_v32 }
  0x7d   : > { %1084 = vmatmul.mubr.msk.f32.gmra.mrb[10].mxu0 %vm415_vm0, %v208_v44  ;;  %1271 = vmatpush1.bf16.msra.mxu1 %v1863_v16  ;;  %v218_v16 = vld [vmem:[%s1768_s26 + $0x138] sm:$0xff] }
  0x7e   : > { %612 = vmatprep.mubr.f32.mxu1 %v250_v18  ;;  %886 = vmatprep.mubr.f32.mxu0 %v1388_v8 }
  0x7f   : > { %1256 = vmatprep.subr.bf16.mxu1 %v1875_v23  ;;  %v221_v23 = vld [vmem:[%s1768_s26 + $0x150] sm:$0xff] }
  0x80   : > { %613 = vmatmul.mubr.f32.gmra.mrb[28].mxu1 %v249_v50 }
  0x81   : > { %1085 = vmatmul.mubr.msk.f32.gmra.mrb[12].mxu0 %vm415_vm0, %v213_v60  ;;  %1272 = vmatpush1.bf16.msra.mxu1 %v1893_v36  ;;  %v223_v36 = vld [vmem:[%s1768_s26 + $0x160] sm:$0xff] }
  0x82   : > { %618 = vmatprep.mubr.f32.mxu1 %v255_v20  ;;  %892 = vmatprep.mubr.f32.mxu0 %v1388_v8 }
  0x83   : > { %1257 = vmatprep.subr.bf16.mxu1 %v1902_v42  ;;  %v226_v42 = vld [vmem:[%s1768_s26 + $0x178] sm:$0xff] }
  0x84   : > { %619 = vmatmul.mubr.f32.gmra.mrb[30].mxu1 %v254_v3 }
  0x85   : > { %1086 = vmatmul.mubr.msk.f32.gmra.mrb[14].mxu0 %vm415_vm0, %v218_v16  ;;  %1273 = vmatpush1.bf16.msra.mxu1 %v1917_v53  ;;  %v228_v53 = vld [vmem:[%s1768_s26 + $0x188] sm:$0xff] }
  0x86   : > { %737 = vmatprep.mubr.f32.mxu1 %v222_v21  ;;  %898 = vmatprep.mubr.f32.mxu0 %v1388_v8 }
  0x88   : > { %738 = vmatmul.mubr.f32.vlgmr.msra.gmra.mrb[16].mxu1 %v221_v23 }
  0x89   : > { %1087 = vmatmul.mubr.msk.f32.gmra.mrb[16].mxu0 %vm415_vm0, %v223_v36  ;;  %743 = vmatprep.mubr.f32.mxu1 %v227_v22 }
  0x8a   : > { %904 = vmatprep.mubr.f32.mxu0 %v1388_v8 }
  0x8c   : > { %744 = vmatmul.mubr.f32.gmra.mrb[18].mxu1 %v226_v42 }
  0x8d   : > { %1088 = vmatmul.mubr.msk.f32.gmra.mrb[18].mxu0 %vm415_vm0, %v228_v53  ;;  %749 = vmatprep.mubr.f32.mxu1 %v232_v12 }
  0x8e   : > { %910 = vmatprep.mubr.f32.mxu0 %v1388_v8 }
  0x90   : > { %750 = vmatmul.mubr.f32.gmra.mrb[20].mxu1 %v231_v26 }
  0x91   : > { %1089 = vmatmul.mubr.msk.f32.gmra.mrb[20].mxu0 %vm415_vm0, %v233_v28  ;;  %755 = vmatprep.mubr.f32.mxu1 %v237_v29 }
  0x92   : > { %916 = vmatprep.mubr.f32.mxu0 %v1388_v8 }
  0x94   : > { %756 = vmatmul.mubr.f32.gmra.mrb[22].mxu1 %v236_v17 }
  0x95   : > { %1090 = vmatmul.mubr.msk.f32.gmra.mrb[22].mxu0 %vm415_vm0, %v238_v31  ;;  %761 = vmatprep.mubr.f32.mxu1 %v242_v34 }
  0x96   : > { %922 = vmatprep.mubr.f32.mxu0 %v1388_v8 }
  0x98   : > { %762 = vmatmul.mubr.f32.gmra.mrb[24].mxu1 %v241_v35 }
  0x99   : > { %1091 = vmatmul.mubr.msk.f32.gmra.mrb[24].mxu0 %vm415_vm0, %v243_v37  ;;  %767 = vmatprep.mubr.f32.mxu1 %v247_v39 }
  0x9a   : > { %928 = vmatprep.mubr.f32.mxu0 %v1388_v8 }
  0x9c   : > { %768 = vmatmul.mubr.f32.gmra.mrb[26].mxu1 %v246_v25 }
  0x9d   : > { %1092 = vmatmul.mubr.msk.f32.gmra.mrb[26].mxu0 %vm415_vm0, %v248_v40  ;;  %773 = vmatprep.mubr.f32.mxu1 %v252_v45 }
  0x9e   : > { %934 = vmatprep.mubr.f32.mxu0 %v1388_v8 }
  0xa0   : > { %774 = vmatmul.mubr.f32.gmra.mrb[28].mxu1 %v251_v46 }
  0xa1   : > { %1093 = vmatmul.mubr.msk.f32.gmra.mrb[28].mxu0 %vm415_vm0, %v253_v30  ;;  %779 = vmatprep.mubr.f32.mxu1 %v257_v48 }
  0xa2   : > { %940 = vmatprep.mubr.f32.mxu0 %v1388_v8  ;;  %v411_v8 = vsub.s32 1, %v406_v1 }
  0xa4   : > { %780 = vmatmul.mubr.f32.gmra.mrb[30].mxu1 %v256_v49  ;;  %v2116_v41 = vrot.slane %v403_v19, %v411_v8 }
  0xa5   : > { %1094 = vmatmul.mubr.msk.f32.gmra.mrb[30].mxu0 %vm415_vm0, %v258_v52 }
 0x11b   : > { %v530_v54 = vpop.f32.mrb[0].mxu1 }
 0x11c   : > { %v532_v38 = vpop.f32.mrb[1].mxu1  ;;  %v531_v47 = vadd.f32 %v530_v54, %v2112_v9 }
 0x11d   : > { %v533_v55 = vadd.f32 %v532_v38, %v2116_v41 }
 0x11f   : > { %v536_v57 = vpop.f32.mrb[2].mxu1 }
 0x120   : > { %v538_v43 = vpop.f32.mrb[3].mxu1  ;;  %v537_v14 = vadd.f32 %v536_v57, %v2112_v9 }
 0x121   : > { %v539_v15 = vadd.f32 %v538_v43, %v2116_v41 }
 0x123   : > { %v542_v58 = vpop.f32.mrb[4].mxu1 }
 0x124   : > { %v544_v59 = vpop.f32.mrb[5].mxu1  ;;  %v543_v20 = vadd.f32 %v542_v58, %v2112_v9 }
 0x125   : > { %v545_v16 = vadd.f32 %v544_v59, %v2116_v41 }
 0x127   : > { %v548_v51 = vpop.f32.mrb[6].mxu1 }
 0x128   : > { %v550_v62 = vpop.f32.mrb[7].mxu1  ;;  %v549_v53 = vadd.f32 %v548_v51, %v2112_v9 }
 0x129   : > { %v551_v26 = vadd.f32 %v550_v62, %v2116_v41 }
 0x12b   : > { %v554_v0 = vpop.f32.mrb[8].mxu1 }
 0x12c   : > { %v556_v63 = vpop.f32.mrb[9].mxu1  ;;  %v555_v35 = vadd.f32 %v554_v0, %v2112_v9 }
 0x12d   : > { %v557_v39 = vadd.f32 %v556_v63, %v2116_v41 }
 0x12f   : > { %v560_v2 = vpop.f32.mrb[10].mxu1 }
 0x130   : > { %v562_v4 = vpop.f32.mrb[11].mxu1  ;;  %v561_v48 = vadd.f32 %v560_v2, %v2112_v9 }
 0x131   : > { %v563_v52 = vadd.f32 %v562_v4, %v2116_v41 }
 0x133   : > { %v2105_v5 = vpop.f32.mrb[12].mxu1 }
 0x134   : > { %v2110_v27 = vpop.f32.mrb[13].mxu1  ;;  %v567_v59 = vadd.f32 %v2105_v5, %v2112_v9 }
 0x135   : > { %v569_v62 = vadd.f32 %v2110_v27, %v2116_v41 }
 0x137   : > { %v2114_v33 = vpop.f32.mrb[14].mxu1 }
 0x138   : > { %v2118_v10 = vpop.f32.mrb[15].mxu1  ;;  %v573_v4 = vadd.f32 %v2114_v33, %v2112_v9 }
 0x139   : > { %v575_v5 = vadd.f32 %v2118_v10, %v2116_v41 }
 0x13c   : > { %v852_v11 = vpop.f32.mrb[0].mxu0 }
 0x13d   : > { %v1275_v61 = vadd.f32 %v852_v11, %v531_v47  ;;  %v854_v6 = vpop.f32.mrb[1].mxu0 }
 0x13e   : > { %v1277_v7 = vadd.f32 %v854_v6, %v533_v55 }
 0x13f   : > { %v947_v24 = vmax.f32 %v1275_v61, 0.0 }
 0x140   : > { %v948_v32 = vmax.f32 %v1277_v7, 0.0  ;;  %v858_v44 = vpop.f32.mrb[2].mxu0 }
 0x141   : > { %979 = vst [vmem:[%s2126_s15] sm:$0xff] %v947_v24  ;;  %v1279_v18 = vadd.f32 %v858_v44, %v537_v14  ;;  %v860_v50 = vpop.f32.mrb[3].mxu0 }
 0x142   : > { %980 = vst [vmem:[%s2126_s15 + $0x8] sm:$0xff] %v948_v32  ;;  %v1281_v60 = vadd.f32 %v860_v50, %v539_v15 }
 0x143   : > { %v949_v3 = vmax.f32 %v1279_v18, 0.0 }
 0x144   : > { %v950_v21 = vmax.f32 %v1281_v60, 0.0  ;;  %v864_v23 = vpop.f32.mrb[4].mxu0 }
 0x145   : > { %981 = vst [vmem:[%s2126_s15 + $0x10] sm:$0xff] %v949_v3  ;;  %v1283_v36 = vadd.f32 %v864_v23, %v543_v20  ;;  %v866_v22 = vpop.f32.mrb[5].mxu0 }
 0x146   : > { %982 = vst [vmem:[%s2126_s15 + $0x18] sm:$0xff] %v950_v21  ;;  %v1285_v42 = vadd.f32 %v866_v22, %v545_v16 }
 0x147   : > { %v951_v12 = vmax.f32 %v1283_v36, 0.0 }
 0x148   : > { %v952_v28 = vmax.f32 %v1285_v42, 0.0  ;;  %v870_v29 = vpop.f32.mrb[6].mxu0 }
 0x149   : > { %983 = vst [vmem:[%s2126_s15 + $0x20] sm:$0xff] %v951_v12  ;;  %v1287_v17 = vadd.f32 %v870_v29, %v549_v53  ;;  %v872_v31 = vpop.f32.mrb[7].mxu0 }
 0x14a   : > { %984 = vst [vmem:[%s2126_s15 + $0x28] sm:$0xff] %v952_v28  ;;  %v1289_v34 = vadd.f32 %v872_v31, %v551_v26 }
 0x14b   : > { %v953_v37 = vmax.f32 %v1287_v17, 0.0 }
 0x14c   : > { %v954_v25 = vmax.f32 %v1289_v34, 0.0  ;;  %v876_v40 = vpop.f32.mrb[8].mxu0 }
 0x14d   : > { %985 = vst [vmem:[%s2126_s15 + $0x30] sm:$0xff] %v953_v37  ;;  %v1291_v45 = vadd.f32 %v876_v40, %v555_v35  ;;  %v878_v46 = vpop.f32.mrb[9].mxu0 }
 0x14e   : > { %986 = vst [vmem:[%s2126_s15 + $0x38] sm:$0xff] %v954_v25  ;;  %v1293_v30 = vadd.f32 %v878_v46, %v557_v39 }
 0x14f   : > { %v955_v49 = vmax.f32 %v1291_v45, 0.0 }
 0x150   : > { %v956_v54 = vmax.f32 %v1293_v30, 0.0  ;;  %v882_v38 = vpop.f32.mrb[10].mxu0 }
 0x151   : > { %987 = vst [vmem:[%s2126_s15 + $0x40] sm:$0xff] %v955_v49  ;;  %v1295_v57 = vadd.f32 %v882_v38, %v561_v48  ;;  %v884_v43 = vpop.f32.mrb[11].mxu0 }
 0x152   : > { %988 = vst [vmem:[%s2126_s15 + $0x48] sm:$0xff] %v956_v54  ;;  %v1297_v58 = vadd.f32 %v884_v43, %v563_v52 }
 0x153   : > { %v957_v51 = vmax.f32 %v1295_v57, 0.0 }
 0x154   : > { %v958_v56 = vmax.f32 %v1297_v58, 0.0  ;;  %v888_v0 = vpop.f32.mrb[12].mxu0 }
 0x155   : > { %989 = vst [vmem:[%s2126_s15 + $0x50] sm:$0xff] %v957_v51  ;;  %v1299_v63 = vadd.f32 %v888_v0, %v567_v59  ;;  %v890_v1 = vpop.f32.mrb[13].mxu0 }
 0x156   : > { %990 = vst [vmem:[%s2126_s15 + $0x58] sm:$0xff] %v958_v56  ;;  %v1301_v2 = vadd.f32 %v890_v1, %v569_v62 }
 0x157   : > { %v959_v13 = vmax.f32 %v1299_v63, 0.0 }
 0x158   : > { %v960_v19 = vmax.f32 %v1301_v2, 0.0  ;;  %v894_v8 = vpop.f32.mrb[14].mxu0 }
 0x159   : > { %991 = vst [vmem:[%s2126_s15 + $0x60] sm:$0xff] %v959_v13  ;;  %v1303_v27 = vadd.f32 %v894_v8, %v573_v4  ;;  %v896_v47 = vpop.f32.mrb[15].mxu0 }
 0x15a   : > { %992 = vst [vmem:[%s2126_s15 + $0x68] sm:$0xff] %v960_v19  ;;  %v1305_v55 = vadd.f32 %v896_v47, %v575_v5 }
 0x15b   : > { %v961_v11 = vmax.f32 %v1303_v27, 0.0  ;;  %v739_v61 = vpop.f32.mrb[16].mxu1 }
 0x15c   : > { %v962_v6 = vmax.f32 %v1305_v55, 0.0  ;;  %v1306_v7 = vadd.f32 %v739_v61, %v2112_v9  ;;  %v741_v14 = vpop.f32.mrb[17].mxu1  ;;  %v900_v33 = vpop.f32.mrb[16].mxu0 }
 0x15d   : > { %993 = vst [vmem:[%s2126_s15 + $0x70] sm:$0xff] %v961_v11  ;;  %v1308_v10 = vadd.f32 %v741_v14, %v2116_v41  ;;  %v902_v24 = vpop.f32.mrb[17].mxu0 }
 0x15e   : > { %994 = vst [vmem:[%s2126_s15 + $0x78] sm:$0xff] %v962_v6  ;;  %v1307_v15 = vadd.f32 %v1306_v7, %v900_v33 }
 0x15f   : > { %v1309_v32 = vadd.f32 %v1308_v10, %v902_v24  ;;  %v745_v44 = vpop.f32.mrb[18].mxu1 }
 0x160   : > { %v963_v18 = vmax.f32 %v1307_v15, 0.0  ;;  %v1310_v50 = vadd.f32 %v745_v44, %v2112_v9  ;;  %v747_v60 = vpop.f32.mrb[19].mxu1  ;;  %v906_v20 = vpop.f32.mrb[18].mxu0 }
 0x161   : > { %v964_v3 = vmax.f32 %v1309_v32, 0.0  ;;  %v1312_v16 = vadd.f32 %v747_v60, %v2116_v41  ;;  %v908_v21 = vpop.f32.mrb[19].mxu0 }
 0x162   : > { %995 = vst [vmem:[%s2126_s15 + $0x80] sm:$0xff] %v963_v18  ;;  %v1311_v23 = vadd.f32 %v1310_v50, %v906_v20 }
 0x163   : > { %996 = vst [vmem:[%s2126_s15 + $0x88] sm:$0xff] %v964_v3  ;;  %v1313_v36 = vadd.f32 %v1312_v16, %v908_v21  ;;  %v751_v22 = vpop.f32.mrb[20].mxu1 }
 0x164   : > { %v965_v42 = vmax.f32 %v1311_v23, 0.0  ;;  %v1314_v53 = vadd.f32 %v751_v22, %v2112_v9  ;;  %v753_v12 = vpop.f32.mrb[21].mxu1  ;;  %v912_v26 = vpop.f32.mrb[20].mxu0 }
 0x165   : > { %v966_v28 = vmax.f32 %v1313_v36, 0.0  ;;  %v1316_v29 = vadd.f32 %v753_v12, %v2116_v41  ;;  %v914_v17 = vpop.f32.mrb[21].mxu0 }
 0x166   : > { %997 = vst [vmem:[%s2126_s15 + $0x90] sm:$0xff] %v965_v42  ;;  %v1315_v31 = vadd.f32 %v1314_v53, %v912_v26 }
 0x167   : > { %998 = vst [vmem:[%s2126_s15 + $0x98] sm:$0xff] %v966_v28  ;;  %v1317_v34 = vadd.f32 %v1316_v29, %v914_v17  ;;  %v757_v35 = vpop.f32.mrb[22].mxu1 }
 0x168   : > { %v967_v37 = vmax.f32 %v1315_v31, 0.0  ;;  %v1318_v39 = vadd.f32 %v757_v35, %v2112_v9  ;;  %v759_v25 = vpop.f32.mrb[23].mxu1  ;;  %v918_v40 = vpop.f32.mrb[22].mxu0 }
 0x169   : > { %v968_v45 = vmax.f32 %v1317_v34, 0.0  ;;  %v1320_v46 = vadd.f32 %v759_v25, %v2116_v41  ;;  %v920_v30 = vpop.f32.mrb[23].mxu0 }
 0x16a   : > { %999 = vst [vmem:[%s2126_s15 + $0xa0] sm:$0xff] %v967_v37  ;;  %v1319_v48 = vadd.f32 %v1318_v39, %v918_v40 }
 0x16b   : > { %1000 = vst [vmem:[%s2126_s15 + $0xa8] sm:$0xff] %v968_v45  ;;  %v1321_v49 = vadd.f32 %v1320_v46, %v920_v30  ;;  %v763_v52 = vpop.f32.mrb[24].mxu1 }
 0x16c   : > { %v969_v54 = vmax.f32 %v1319_v48, 0.0  ;;  %v1322_v38 = vadd.f32 %v763_v52, %v2112_v9  ;;  %v765_v57 = vpop.f32.mrb[25].mxu1  ;;  %v924_v43 = vpop.f32.mrb[24].mxu0 }
 0x16d   : > { %v970_v58 = vmax.f32 %v1321_v49, 0.0  ;;  %v1324_v59 = vadd.f32 %v765_v57, %v2116_v41  ;;  %v926_v51 = vpop.f32.mrb[25].mxu0 }
 0x16e   : > { %1001 = vst [vmem:[%s2126_s15 + $0xb0] sm:$0xff] %v969_v54  ;;  %v1323_v62 = vadd.f32 %v1322_v38, %v924_v43 }
 0x16f   : > { %1002 = vst [vmem:[%s2126_s15 + $0xb8] sm:$0xff] %v970_v58  ;;  %v1325_v56 = vadd.f32 %v1324_v59, %v926_v51  ;;  %v769_v0 = vpop.f32.mrb[26].mxu1 }
 0x170   : > { %v971_v63 = vmax.f32 %v1323_v62, 0.0  ;;  %v1326_v1 = vadd.f32 %v769_v0, %v2112_v9  ;;  %v771_v2 = vpop.f32.mrb[27].mxu1  ;;  %v930_v4 = vpop.f32.mrb[26].mxu0 }
 0x171   : > { %v972_v13 = vmax.f32 %v1325_v56, 0.0  ;;  %v1328_v5 = vadd.f32 %v771_v2, %v2116_v41  ;;  %v932_v19 = vpop.f32.mrb[27].mxu0 }
 0x172   : > { %1003 = vst [vmem:[%s2126_s15 + $0xc0] sm:$0xff] %v971_v63  ;;  %v1327_v8 = vadd.f32 %v1326_v1, %v930_v4 }
 0x173   : > { %1004 = vst [vmem:[%s2126_s15 + $0xc8] sm:$0xff] %v972_v13  ;;  %v1329_v27 = vadd.f32 %v1328_v5, %v932_v19  ;;  %v775_v47 = vpop.f32.mrb[28].mxu1 }
 0x174   : > { %v973_v55 = vmax.f32 %v1327_v8, 0.0  ;;  %v1330_v11 = vadd.f32 %v775_v47, %v2112_v9  ;;  %v777_v61 = vpop.f32.mrb[29].mxu1  ;;  %v936_v6 = vpop.f32.mrb[28].mxu0 }
 0x175   : > { %v974_v7 = vmax.f32 %v1329_v27, 0.0  ;;  %v1332_v14 = vadd.f32 %v777_v61, %v2116_v41  ;;  %v938_v33 = vpop.f32.mrb[29].mxu0 }
 0x176   : > { %1005 = vst [vmem:[%s2126_s15 + $0xd0] sm:$0xff] %v973_v55  ;;  %v1331_v10 = vadd.f32 %v1330_v11, %v936_v6 }
 0x177   : > { %1006 = vst [vmem:[%s2126_s15 + $0xd8] sm:$0xff] %v974_v7  ;;  %v1333_v24 = vadd.f32 %v1332_v14, %v938_v33  ;;  %v781_v15 = vpop.f32.mrb[30].mxu1 }
 0x178   : > { %v975_v32 = vmax.f32 %v1331_v10, 0.0  ;;  %v1334_v44 = vadd.f32 %v781_v15, %v2112_v9  ;;  %v783_v18 = vpop.f32.mrb[31].mxu1  ;;  %v942_v50 = vpop.f32.mrb[30].mxu0 }
 0x179   : > { %v976_v60 = vmax.f32 %v1333_v24, 0.0  ;;  %v1336_v20 = vadd.f32 %v783_v18, %v2116_v41  ;;  %v944_v3 = vpop.f32.mrb[31].mxu0 }
 0x17a   : > { %1007 = vst [vmem:[%s2126_s15 + $0xe0] sm:$0xff] %v975_v32  ;;  %v1335_v16 = vadd.f32 %v1334_v44, %v942_v50 }
 0x17b   : > { %1008 = vst [vmem:[%s2126_s15 + $0xe8] sm:$0xff] %v976_v60  ;;  %v1337_v21 = vadd.f32 %v1336_v20, %v944_v3 }
 0x17c   : > { %v977_v23 = vmax.f32 %v1335_v16, 0.0 }
 0x17d   : > { %v978_v36 = vmax.f32 %v1337_v21, 0.0 }
 0x17e   : > { %1009 = vst [vmem:[%s2126_s15 + $0xf0] sm:$0xff] %v977_v23 }
 0x17f   : > { %1010 = vst [vmem:[%s2126_s15 + $0xf8] sm:$0xff] %v978_v36 }
 0x180 PF: > { %s13_s12 = sadd.s32 1, %s1386_s12  }
 0x181   : > { %p10_p4 = scmp.ge.s32.totalorder %s13_s12, 6  }
 0x183   :  { %12 = sbr.rel (!%p10_p4) target bundleno = 1 (0x1), region = 62 }

// kernel: conv_decoder_2ch.5
= control target key start
LH: loop header
LB: loop body
LE: loop exit
PB: predicated region body
PF: predicated region fallthrough
CT: control target
= control target key end

     0   :  { %s2945_s12 = smov 0   ;;  %s2947_s13 = smov 0   ;;  %s3508_s0 = inlined_call_operand.vmem [shape: f32[2,64,3072], index: 0, kind: input, shape index: {}]   ;;  %s3509_s1 = inlined_call_operand.vmem [shape: f32[2,3072,128], index: 1, kind: input, shape index: {}]   ;;  %s3510_s2 = inlined_call_operand.vmem [shape: f32[2,1,128], index: 2, kind: input, shape index: {}]   ;;  %s3511_s3 = inlined_call_operand.vmem [shape: f32[2,64,128], index: 3, kind: output, shape index: {}]  }
   0x1   :  { %s2949_s14 = smov 0   ;;  %s2951_s15 = smov 0  }
   0x2   :  { %s2953_s16 = smov 0  }
   0x3 LB: > { %s22_s17 = sadd.s32 1, %s2915_s14  ;;  %s25_s18 = sadd.s32 1, %s2919_s15  ;;  %s2923_s16 = sphi %s2953_s16, %s13_s16   ;;  %s2919_s15 = sphi %s2951_s15, %s3516_s15   ;;  %s2915_s14 = sphi %s2949_s14, %s3515_s14   ;;  %s2911_s13 = sphi %s2947_s13, %s3514_s13   ;;  %s2907_s12 = sphi %s2945_s12, %s3513_s12  }
   0x4   : > { %p23_p0 = scmp.ge.s32.totalorder %s22_s17, 2  ;;  %p1900_p1 = scmp.ge.s32.totalorder %s2923_s16, 1 }
   0x5   : > { %p177_p2 = scmp.lt.s32.totalorder %s2923_s16, 5 }
   0x6   : > { %s3518_s17 = smov (%p23_p0, %s22_s17), 0  ;;  %s3520_s18 = smov (!%p23_p0, %s25_s18), %s2919_s15 }
   0x7   : > { %p178_p3 = pnand %p1900_p1, %p177_p2  ;;  %p27_p4 = scmp.ge.s32.totalorder %s3520_s18, 2 }
   0x8   : > { %p219_p5 = scmp.lt.s32.totalorder (!%p178_p3), %s2911_s13, 1  ;;  %s1901_s19 = sshll.u32 (!%p178_p3), %s2907_s12, 2 }
   0x9   : > { %s3522_s18 = smov (%p27_p4, %s3520_s18), 0  ;;  %181 = sbr.rel (%p178_p3) target bundleno = 473 (0x1d9), region = 32 }
   0xa   : > { %p2986_p6 = scmp.lt.s32.totalorder (!%p178_p3), %s1901_s19, 7 }
  0x10   : > { %s3524_s13 = smov (!%p219_p5, %s2911_s13), 1  ;;  %s3526_s19 = smov (!%p2986_p6, %s1901_s19), 7 }
  0x11   : > { %s2828_s20 = smul.u32 3072, %s3524_s13  ;;  %s236_s7 = scalar_lea.vmem %s3510_s2, %s3524_s13 }
  0x12   : > { %s2826_s25 = smul.u32 24, %s3526_s19  ;;  %s1905_s8 = sshll.u32 %s3524_s13, 3 }
  0x13   : > { %s2984_s23 = scalar_lea.vmem %s3509_s1, %s2828_s20  ;;  %s2827_s26 = smul.u32 192, %s3524_s13 }
  0x14   : > { %v359_v0 = vld [vmem:[%s2984_s23 + $0x80] sm:$0xff]  ;;  %v360_v1 = vld [vmem:[%s2984_s23 + $0x88] sm:$0xff]  ;;  %v361_v11 = vld [vmem:[%s2984_s23 + $0x90] sm:$0xff]  ;;  %s243_s9 = sadd.s32 %s1905_s8, %s3526_s19 }
  0x15   : > { %v343_v2 = vld [vmem:[%s2984_s23] sm:$0xff]  ;;  %v2442_v3 = vpack.c.bf16 %v360_v1, %v359_v0  ;;  %v344_v4 = vld [vmem:[%s2984_s23 + $0x8] sm:$0xff]  ;;  %v362_v13 = vld [vmem:[%s2984_s23 + $0x98] sm:$0xff]  ;;  %s3032_s27 = sadd.s32 %s2827_s26, %s2826_s25  ;;  %s1906_s10 = sshll.u32 %s243_s9, 3 }
  0x16   : > { %v391_v5 = vld [vmem:[%s2984_s23 + $0x180] sm:$0xff]  ;;  %v392_v6 = vld [vmem:[%s2984_s23 + $0x188] sm:$0xff]  ;;  %v2444_v7 = vpack.c.bf16 %v344_v4, %v343_v2  ;;  %v345_v14 = vld [vmem:[%s2984_s23 + $0x10] sm:$0xff]  ;;  %v2446_v16 = vpack.c.bf16 %v362_v13, %v361_v11  ;;  %s1902_s28 = sshll.u32 %s3032_s27, 3  ;;  %s245_s20 = scalar_lea.vmem %s3511_s3, %s1906_s10 }
  0x17   : > { %v2474_v8 = vpack.c.bf16 %v392_v6, %v391_v5  ;;  %v375_v9 = vld [vmem:[%s2984_s23 + $0x100] sm:$0xff]  ;;  %v376_v10 = vld [vmem:[%s2984_s23 + $0x108] sm:$0xff]  ;;  %2443 = vmatprep.subr.bf16.mxu0 %v2442_v3  ;;  %v346_v15 = vld [vmem:[%s2984_s23 + $0x18] sm:$0xff]  ;;  %s3052_s4 = scalar_lea.vmem %s3508_s0, %s1902_s28 }
  0x18   : > { %v2476_v12 = vpack.c.bf16 %v376_v10, %v375_v9  ;;  %2445 = vmatpush3.bf16.msra.mxu0 %v2444_v7  ;;  %v2448_v17 = vpack.c.bf16 %v346_v15, %v345_v14  ;;  %v393_v18 = vld [vmem:[%s2984_s23 + $0x190] sm:$0xff]  ;;  %v394_v19 = vld [vmem:[%s2984_s23 + $0x198] sm:$0xff]  ;;  %v363_v23 = vld [vmem:[%s2984_s23 + $0xa0] sm:$0xff] }
  0x19   : > { %2475 = vmatprep.subr.bf16.mxu1 %v2474_v8  ;;  %v377_v20 = vld [vmem:[%s2984_s23 + $0x110] sm:$0xff]  ;;  %v2478_v21 = vpack.c.bf16 %v394_v19, %v393_v18  ;;  %v378_v22 = vld [vmem:[%s2984_s23 + $0x118] sm:$0xff]  ;;  %v364_v24 = vld [vmem:[%s2984_s23 + $0xa8] sm:$0xff]  ;;  %2447 = vmatprep.subr.bf16.mxu0 %v2446_v16 }
  0x1a   : > { %2477 = vmatpush3.bf16.msra.mxu1 %v2476_v12  ;;  %v2480_v25 = vpack.c.bf16 %v378_v22, %v377_v20  ;;  %v2450_v26 = vpack.c.bf16 %v364_v24, %v363_v23  ;;  %v347_v27 = vld [vmem:[%s2984_s23 + $0x20] sm:$0xff]  ;;  %v348_v28 = vld [vmem:[%s2984_s23 + $0x28] sm:$0xff]  ;;  %v365_v35 = vld [vmem:[%s2984_s23 + $0xb0] sm:$0xff] }
  0x1b   : > { %v395_v29 = vld [vmem:[%s2984_s23 + $0x1a0] sm:$0xff]  ;;  %2479 = vmatprep.subr.bf16.mxu1 %v2478_v21  ;;  %v396_v30 = vld [vmem:[%s2984_s23 + $0x1a8] sm:$0xff]  ;;  %v2452_v33 = vpack.c.bf16 %v348_v28, %v347_v27  ;;  %v366_v36 = vld [vmem:[%s2984_s23 + $0xb8] sm:$0xff] }
  0x1c   : > { %v379_v31 = vld [vmem:[%s2984_s23 + $0x120] sm:$0xff]  ;;  %v380_v32 = vld [vmem:[%s2984_s23 + $0x128] sm:$0xff]  ;;  %2449 = vmatpush3.bf16.msra.mxu0 %v2448_v17  ;;  %v2482_v34 = vpack.c.bf16 %v396_v30, %v395_v29  ;;  %v349_v37 = vld [vmem:[%s2984_s23 + $0x30] sm:$0xff]  ;;  %v2454_v39 = vpack.c.bf16 %v366_v36, %v365_v35 }
  0x1d   : > { %2451 = vmatprep.subr.bf16.mxu0 %v2450_v26  ;;  %v2484_v38 = vpack.c.bf16 %v380_v32, %v379_v31  ;;  %v350_v40 = vld [vmem:[%s2984_s23 + $0x38] sm:$0xff]  ;;  %v397_v41 = vld [vmem:[%s2984_s23 + $0x1b0] sm:$0xff]  ;;  %v367_v46 = vld [vmem:[%s2984_s23 + $0xc0] sm:$0xff] }
  0x1e   : > { %2481 = vmatpush3.bf16.msra.mxu1 %v2480_v25  ;;  %v398_v42 = vld [vmem:[%s2984_s23 + $0x1b8] sm:$0xff]  ;;  %v381_v44 = vld [vmem:[%s2984_s23 + $0x130] sm:$0xff]  ;;  %v368_v47 = vld [vmem:[%s2984_s23 + $0xc8] sm:$0xff]  ;;  %v2456_v48 = vpack.c.bf16 %v350_v40, %v349_v37 }
  0x1f   : > { %2483 = vmatprep.subr.bf16.mxu1 %v2482_v34  ;;  %v2486_v43 = vpack.c.bf16 %v398_v42, %v397_v41  ;;  %v382_v45 = vld [vmem:[%s2984_s23 + $0x138] sm:$0xff]  ;;  %v399_v49 = vld [vmem:[%s2984_s23 + $0x1c0] sm:$0xff]  ;;  %v400_v50 = vld [vmem:[%s2984_s23 + $0x1c8] sm:$0xff]  ;;  %v2458_v52 = vpack.c.bf16 %v368_v47, %v367_v46 }
  0x20   : > { %2453 = vmatpush3.bf16.msra.mxu0 %v2452_v33  ;;  %v2488_v51 = vpack.c.bf16 %v382_v45, %v381_v44  ;;  %v351_v53 = vld [vmem:[%s2984_s23 + $0x40] sm:$0xff]  ;;  %v352_v54 = vld [vmem:[%s2984_s23 + $0x48] sm:$0xff]  ;;  %v2490_v56 = vpack.c.bf16 %v400_v50, %v399_v49  ;;  %v369_v58 = vld [vmem:[%s2984_s23 + $0xd0] sm:$0xff] }
  0x21   : > { %2455 = vmatprep.subr.bf16.mxu0 %v2454_v39  ;;  %v383_v55 = vld [vmem:[%s2984_s23 + $0x140] sm:$0xff]  ;;  %v384_v57 = vld [vmem:[%s2984_s23 + $0x148] sm:$0xff]  ;;  %v370_v59 = vld [vmem:[%s2984_s23 + $0xd8] sm:$0xff]  ;;  %v2460_v62 = vpack.c.bf16 %v352_v54, %v351_v53 }
  0x22   : > { %2485 = vmatpush3.bf16.msra.mxu1 %v2484_v38  ;;  %v401_v60 = vld [vmem:[%s2984_s23 + $0x1d0] sm:$0xff]  ;;  %v402_v61 = vld [vmem:[%s2984_s23 + $0x1d8] sm:$0xff]  ;;  %v2492_v63 = vpack.c.bf16 %v384_v57, %v383_v55  ;;  %v2462_v0 = vpack.c.bf16 %v370_v59, %v369_v58  ;;  %v371_v6 = vld [vmem:[%s2984_s23 + $0xe0] sm:$0xff] }
  0x23   : > { %2487 = vmatprep.subr.bf16.mxu1 %v2486_v43  ;;  %v353_v1 = vld [vmem:[%s2984_s23 + $0x50] sm:$0xff]  ;;  %v354_v2 = vld [vmem:[%s2984_s23 + $0x58] sm:$0xff]  ;;  %v2494_v4 = vpack.c.bf16 %v402_v61, %v401_v60  ;;  %v372_v7 = vld [vmem:[%s2984_s23 + $0xe8] sm:$0xff] }
  0x24   : > { %2457 = vmatpush3.bf16.msra.mxu0 %v2456_v48  ;;  %v385_v3 = vld [vmem:[%s2984_s23 + $0x150] sm:$0xff]  ;;  %v386_v5 = vld [vmem:[%s2984_s23 + $0x158] sm:$0xff]  ;;  %v403_v8 = vld [vmem:[%s2984_s23 + $0x1e0] sm:$0xff]  ;;  %v2464_v10 = vpack.c.bf16 %v354_v2, %v353_v1  ;;  %v2466_v14 = vpack.c.bf16 %v372_v7, %v371_v6 }
  0x25   : > { %2459 = vmatprep.subr.bf16.mxu0 %v2458_v52  ;;  %v404_v9 = vld [vmem:[%s2984_s23 + $0x1e8] sm:$0xff]  ;;  %v355_v11 = vld [vmem:[%s2984_s23 + $0x60] sm:$0xff]  ;;  %v2496_v13 = vpack.c.bf16 %v386_v5, %v385_v3  ;;  %v373_v19 = vld [vmem:[%s2984_s23 + $0xf0] sm:$0xff] }
  0x26   : > { %2489 = vmatpush3.bf16.msra.mxu1 %v2488_v51  ;;  %v356_v12 = vld [vmem:[%s2984_s23 + $0x68] sm:$0xff]  ;;  %v387_v15 = vld [vmem:[%s2984_s23 + $0x160] sm:$0xff]  ;;  %v2498_v18 = vpack.c.bf16 %v404_v9, %v403_v8  ;;  %v374_v20 = vld [vmem:[%s2984_s23 + $0xf8] sm:$0xff] }
  0x27   : > { %2491 = vmatprep.subr.bf16.mxu1 %v2490_v56  ;;  %v388_v16 = vld [vmem:[%s2984_s23 + $0x168] sm:$0xff]  ;;  %v250_v21 = vld [vmem:[%s3052_s4 + $0x18] sm:$0xff]  ;;  %v405_v22 = vld [vmem:[%s2984_s23 + $0x1f0] sm:$0xff]  ;;  %v2468_v24 = vpack.c.bf16 %v356_v12, %v355_v11  ;;  %v2470_v26 = vpack.c.bf16 %v374_v20, %v373_v19 }
  0x28   : > { %2461 = vmatpush3.bf16.msra.mxu0 %v2460_v62  ;;  %v248_v17 = vld [vmem:[%s3052_s4 + $0x8] sm:$0xff]  ;;  %v406_v23 = vld [vmem:[%s2984_s23 + $0x1f8] sm:$0xff]  ;;  %883 = vmatprep.mubr.f32.mxu1 %v250_v21  ;;  %v2500_v25 = vpack.c.bf16 %v388_v16, %v387_v15  ;;  %v357_v27 = vld [vmem:[%s2984_s23 + $0x70] sm:$0xff] }
  0x29   : > { %2463 = vmatprep.subr.bf16.mxu0 %v2462_v0  ;;  %798 = vmatprep.mubr.f32.mxu0 %v248_v17  ;;  %v358_v28 = vld [vmem:[%s2984_s23 + $0x78] sm:$0xff]  ;;  %v389_v29 = vld [vmem:[%s2984_s23 + $0x170] sm:$0xff]  ;;  %v2502_v30 = vpack.c.bf16 %v406_v23, %v405_v22  ;;  %v423_v32 = vld [vmem:[%s2984_s23 + $0x280] sm:$0xff] }
  0x2a   : > { %2493 = vmatpush3.bf16.msra.mxu1 %v2492_v63  ;;  %v390_v31 = vld [vmem:[%s2984_s23 + $0x178] sm:$0xff]  ;;  %v424_v33 = vld [vmem:[%s2984_s23 + $0x288] sm:$0xff]  ;;  %v455_v34 = vld [vmem:[%s2984_s23 + $0x380] sm:$0xff]  ;;  %v2472_v36 = vpack.c.bf16 %v358_v28, %v357_v27 }
  0x2b   : > { %2495 = vmatprep.subr.bf16.mxu1 %v2494_v4  ;;  %v456_v35 = vld [vmem:[%s2984_s23 + $0x388] sm:$0xff]  ;;  %v2504_v37 = vpack.c.bf16 %v390_v31, %v389_v29  ;;  %v2506_v38 = vpack.c.bf16 %v424_v33, %v423_v32  ;;  %v407_v39 = vld [vmem:[%s2984_s23 + $0x200] sm:$0xff]  ;;  %v425_v44 = vld [vmem:[%s2984_s23 + $0x290] sm:$0xff] }
  0x2c   : > { %2465 = vmatpush3.bf16.msra.mxu0 %v2464_v10  ;;  %v408_v40 = vld [vmem:[%s2984_s23 + $0x208] sm:$0xff]  ;;  %v439_v41 = vld [vmem:[%s2984_s23 + $0x300] sm:$0xff]  ;;  %v2538_v42 = vpack.c.bf16 %v456_v35, %v455_v34  ;;  %v426_v45 = vld [vmem:[%s2984_s23 + $0x298] sm:$0xff] }
  0x2d   : > { %2467 = vmatprep.subr.bf16.mxu0 %v2466_v14  ;;  %v440_v43 = vld [vmem:[%s2984_s23 + $0x308] sm:$0xff]  ;;  %v457_v46 = vld [vmem:[%s2984_s23 + $0x390] sm:$0xff]  ;;  %v458_v47 = vld [vmem:[%s2984_s23 + $0x398] sm:$0xff]  ;;  %v2508_v49 = vpack.c.bf16 %v408_v40, %v407_v39  ;;  %v2510_v52 = vpack.c.bf16 %v426_v45, %v425_v44 }
  0x2e   : > { %2497 = vmatpush3.bf16.msra.mxu1 %v2496_v13  ;;  %v247_v48 = vld [vmem:[%s3052_s4] sm:$0xff]  ;;  %v249_v50 = vld [vmem:[%s3052_s4 + $0x10] sm:$0xff]  ;;  %v2540_v51 = vpack.c.bf16 %v440_v43, %v439_v41  ;;  %v410_v54 = vld [vmem:[%s2984_s23 + $0x218] sm:$0xff]  ;;  %v2542_v56 = vpack.c.bf16 %v458_v47, %v457_v46 }
  0x2f   : > { %2499 = vmatprep.subr.bf16.mxu1 %v2498_v18  ;;  %v409_v53 = vld [vmem:[%s2984_s23 + $0x210] sm:$0xff]  ;;  %v442_v57 = vld [vmem:[%s2984_s23 + $0x318] sm:$0xff]  ;;  %v427_v58 = vld [vmem:[%s2984_s23 + $0x2a0] sm:$0xff] }
  0x30   : > { %2469 = vmatpush3.bf16.msra.mxu0 %v2468_v24  ;;  %v441_v55 = vld [vmem:[%s2984_s23 + $0x310] sm:$0xff]  ;;  %v428_v59 = vld [vmem:[%s2984_s23 + $0x2a8] sm:$0xff]  ;;  %v459_v60 = vld [vmem:[%s2984_s23 + $0x3a0] sm:$0xff]  ;;  %v2512_v62 = vpack.c.bf16 %v410_v54, %v409_v53 }
  0x31   : > { %2471 = vmatprep.subr.bf16.mxu0 %v2470_v26  ;;  %v460_v61 = vld [vmem:[%s2984_s23 + $0x3a8] sm:$0xff]  ;;  %v411_v63 = vld [vmem:[%s2984_s23 + $0x220] sm:$0xff]  ;;  %v2544_v2 = vpack.c.bf16 %v442_v57, %v441_v55  ;;  %v2514_v3 = vpack.c.bf16 %v428_v59, %v427_v58  ;;  %v274_v6 = vld [vmem:[%s3052_s4 + $0xd8] sm:$0xff] }
  0x32   : > { %2501 = vmatpush3.bf16.msra.mxu1 %v2500_v25  ;;  %v272_v0 = vld [vmem:[%s3052_s4 + $0xc8] sm:$0xff]  ;;  %v271_v1 = vld [vmem:[%s3052_s4 + $0xc0] sm:$0xff]  ;;  %v2546_v7 = vpack.c.bf16 %v460_v61, %v459_v60  ;;  %v429_v9 = vld [vmem:[%s2984_s23 + $0x2b0] sm:$0xff] }
  0x33   : > { %2503 = vmatprep.subr.bf16.mxu1 %v2502_v30  ;;  %v412_v4 = vld [vmem:[%s2984_s23 + $0x228] sm:$0xff]  ;;  %v443_v5 = vld [vmem:[%s2984_s23 + $0x320] sm:$0xff]  ;;  %v430_v10 = vld [vmem:[%s2984_s23 + $0x2b8] sm:$0xff] }
  0x34   : > { %2473 = vmatpush3.bf16.msra.mxu0 %v2472_v36  ;;  %v444_v8 = vld [vmem:[%s2984_s23 + $0x328] sm:$0xff]  ;;  %v461_v11 = vld [vmem:[%s2984_s23 + $0x3b0] sm:$0xff]  ;;  %v462_v12 = vld [vmem:[%s2984_s23 + $0x3b8] sm:$0xff]  ;;  %v2516_v14 = vpack.c.bf16 %v412_v4, %v411_v63  ;;  %v2518_v19 = vpack.c.bf16 %v430_v10, %v429_v9 }
  0x35   : > { %2507 = vmatprep.subr.bf16.mxu0 %v2506_v38  ;;  %v273_v13 = vld [vmem:[%s3052_s4 + $0xd0] sm:$0xff]  ;;  %v296_v16 = vld [vmem:[%s3052_s4 + $0x188] sm:$0xff]  ;;  %v295_v17 = vld [vmem:[%s3052_s4 + $0x180] sm:$0xff]  ;;  %v2548_v18 = vpack.c.bf16 %v444_v8, %v443_v5  ;;  %v2550_v23 = vpack.c.bf16 %v462_v12, %v461_v11 }
  0x36   : > { %2505 = vmatpush3.bf16.msra.mxu1 %v2504_v37  ;;  %v413_v15 = vld [vmem:[%s2984_s23 + $0x230] sm:$0xff]  ;;  %v414_v20 = vld [vmem:[%s2984_s23 + $0x238] sm:$0xff]  ;;  %v431_v25 = vld [vmem:[%s2984_s23 + $0x2c0] sm:$0xff] }
  0x37   : > { %2539 = vmatprep.subr.bf16.mxu1 %v2538_v42  ;;  %799 = vmatmul.mubr.f32.vlgmr.msra.gmra.mrb[0].mxu0 %v247_v48  ;;  %v445_v21 = vld [vmem:[%s2984_s23 + $0x330] sm:$0xff]  ;;  %v298_v22 = vld [vmem:[%s3052_s4 + $0x198] sm:$0xff]  ;;  %v432_v26 = vld [vmem:[%s2984_s23 + $0x2c8] sm:$0xff]  ;;  %v2520_v30 = vpack.c.bf16 %v414_v20, %v413_v15 }
  0x38   : > { %2509 = vmatpush3.bf16.msra.mxu0 %v2508_v49  ;;  %803 = vmatprep.mubr.f32.mxu0 %v272_v0  ;;  %v446_v24 = vld [vmem:[%s2984_s23 + $0x338] sm:$0xff]  ;;  %v463_v27 = vld [vmem:[%s2984_s23 + $0x3c0] sm:$0xff]  ;;  %v464_v28 = vld [vmem:[%s2984_s23 + $0x3c8] sm:$0xff]  ;;  %v2522_v35 = vpack.c.bf16 %v432_v26, %v431_v25 }
  0x39   : > { %884 = vmatmul.mubr.f32.vlgmr.msra.gmra.mrb[0].mxu1 %v249_v50  ;;  %2511 = vmatprep.subr.bf16.mxu0 %v2510_v52  ;;  %v297_v29 = vld [vmem:[%s3052_s4 + $0x190] sm:$0xff]  ;;  %v415_v31 = vld [vmem:[%s2984_s23 + $0x240] sm:$0xff]  ;;  %v320_v32 = vld [vmem:[%s3052_s4 + $0x248] sm:$0xff]  ;;  %v2552_v34 = vpack.c.bf16 %v446_v24, %v445_v21  ;;  %v2554_v39 = vpack.c.bf16 %v464_v28, %v463_v27 }
  0x3a   : > { %2541 = vmatpush3.bf16.msra.mxu1 %v2540_v51  ;;  %888 = vmatprep.mubr.f32.mxu1 %v274_v6  ;;  %v319_v33 = vld [vmem:[%s3052_s4 + $0x240] sm:$0xff]  ;;  %v416_v36 = vld [vmem:[%s2984_s23 + $0x248] sm:$0xff]  ;;  %v322_v38 = vld [vmem:[%s3052_s4 + $0x258] sm:$0xff] }
  0x3b   : > { %2543 = vmatprep.subr.bf16.mxu1 %v2542_v56  ;;  %804 = vmatmul.mubr.f32.gmra.mrb[2].mxu0 %v271_v1  ;;  %v447_v37 = vld [vmem:[%s2984_s23 + $0x340] sm:$0xff]  ;;  %v448_v40 = vld [vmem:[%s2984_s23 + $0x348] sm:$0xff]  ;;  %v433_v41 = vld [vmem:[%s2984_s23 + $0x2d0] sm:$0xff]  ;;  %v2524_v46 = vpack.c.bf16 %v416_v36, %v415_v31 }
  0x3c   : > { %2513 = vmatpush3.bf16.msra.mxu0 %v2512_v62  ;;  %808 = vmatprep.mubr.f32.mxu0 %v296_v16  ;;  %v434_v42 = vld [vmem:[%s2984_s23 + $0x2d8] sm:$0xff]  ;;  %v465_v43 = vld [vmem:[%s2984_s23 + $0x3d0] sm:$0xff]  ;;  %v252_v48 = vld [vmem:[%s3052_s4 + $0x28] sm:$0xff]  ;;  %v2556_v49 = vpack.c.bf16 %v448_v40, %v447_v37 }
  0x3d   : > { %889 = vmatmul.mubr.f32.gmra.mrb[2].mxu1 %v273_v13  ;;  %2515 = vmatprep.subr.bf16.mxu0 %v2514_v3  ;;  %v466_v44 = vld [vmem:[%s2984_s23 + $0x3d8] sm:$0xff]  ;;  %v321_v45 = vld [vmem:[%s3052_s4 + $0x250] sm:$0xff]  ;;  %v2526_v50 = vpack.c.bf16 %v434_v42, %v433_v41  ;;  %v435_v56 = vld [vmem:[%s2984_s23 + $0x2e0] sm:$0xff] }
  0x3e   : > { %2545 = vmatpush3.bf16.msra.mxu1 %v2544_v2  ;;  %893 = vmatprep.mubr.f32.mxu1 %v298_v22  ;;  %v417_v47 = vld [vmem:[%s2984_s23 + $0x250] sm:$0xff]  ;;  %v418_v51 = vld [vmem:[%s2984_s23 + $0x258] sm:$0xff]  ;;  %v2558_v54 = vpack.c.bf16 %v466_v44, %v465_v43  ;;  %v436_v57 = vld [vmem:[%s2984_s23 + $0x2e8] sm:$0xff] }
  0x3f   : > { %2547 = vmatprep.subr.bf16.mxu1 %v2546_v7  ;;  %809 = vmatmul.mubr.f32.gmra.mrb[4].mxu0 %v295_v17  ;;  %v449_v52 = vld [vmem:[%s2984_s23 + $0x350] sm:$0xff]  ;;  %v254_v53 = vld [vmem:[%s3052_s4 + $0x38] sm:$0xff]  ;;  %v467_v58 = vld [vmem:[%s2984_s23 + $0x3e0] sm:$0xff]  ;;  %v2528_v60 = vpack.c.bf16 %v418_v51, %v417_v47  ;;  %v2530_v62 = vpack.c.bf16 %v436_v57, %v435_v56 }
  0x40   : > { %2517 = vmatpush3.bf16.msra.mxu0 %v2516_v14  ;;  %813 = vmatprep.mubr.f32.mxu0 %v320_v32  ;;  %v450_v55 = vld [vmem:[%s2984_s23 + $0x358] sm:$0xff]  ;;  %v468_v59 = vld [vmem:[%s2984_s23 + $0x3e8] sm:$0xff]  ;;  %v419_v63 = vld [vmem:[%s2984_s23 + $0x260] sm:$0xff] }
  0x41   : > { %894 = vmatmul.mubr.f32.gmra.mrb[4].mxu1 %v297_v29  ;;  %2519 = vmatprep.subr.bf16.mxu0 %v2518_v19  ;;  %v2560_v61 = vpack.c.bf16 %v450_v55, %v449_v52  ;;  %v420_v0 = vld [vmem:[%s2984_s23 + $0x268] sm:$0xff]  ;;  %v451_v1 = vld [vmem:[%s2984_s23 + $0x360] sm:$0xff]  ;;  %v2562_v2 = vpack.c.bf16 %v468_v59, %v467_v58  ;;  %v437_v4 = vld [vmem:[%s2984_s23 + $0x2f0] sm:$0xff] }
  0x42   : > { %2549 = vmatpush3.bf16.msra.mxu1 %v2548_v18  ;;  %898 = vmatprep.mubr.f32.mxu1 %v322_v38  ;;  %v452_v3 = vld [vmem:[%s2984_s23 + $0x368] sm:$0xff]  ;;  %v438_v5 = vld [vmem:[%s2984_s23 + $0x2f8] sm:$0xff]  ;;  %v469_v6 = vld [vmem:[%s2984_s23 + $0x3f0] sm:$0xff]  ;;  %v2532_v8 = vpack.c.bf16 %v420_v0, %v419_v63 }
  0x43   : > { %2551 = vmatprep.subr.bf16.mxu1 %v2550_v23  ;;  %814 = vmatmul.mubr.f32.gmra.mrb[6].mxu0 %v319_v33  ;;  %v470_v7 = vld [vmem:[%s2984_s23 + $0x3f8] sm:$0xff]  ;;  %v2564_v9 = vpack.c.bf16 %v452_v3, %v451_v1  ;;  %v2534_v10 = vpack.c.bf16 %v438_v5, %v437_v4  ;;  %v421_v11 = vld [vmem:[%s2984_s23 + $0x270] sm:$0xff]  ;;  %v487_v16 = vld [vmem:[%s2984_s23 + $0x480] sm:$0xff] }
  0x44   : > { %2521 = vmatpush3.bf16.msra.mxu0 %v2520_v30  ;;  %968 = vmatprep.mubr.f32.mxu0 %v252_v48  ;;  %v422_v12 = vld [vmem:[%s2984_s23 + $0x278] sm:$0xff]  ;;  %v453_v13 = vld [vmem:[%s2984_s23 + $0x370] sm:$0xff]  ;;  %v2566_v14 = vpack.c.bf16 %v470_v7, %v469_v6  ;;  %v488_v17 = vld [vmem:[%s2984_s23 + $0x488] sm:$0xff] }
  0x45   : > { %899 = vmatmul.mubr.f32.gmra.mrb[6].mxu1 %v321_v45  ;;  %2523 = vmatprep.subr.bf16.mxu0 %v2522_v35  ;;  %v454_v15 = vld [vmem:[%s2984_s23 + $0x378] sm:$0xff]  ;;  %v519_v18 = vld [vmem:[%s2984_s23 + $0x580] sm:$0xff]  ;;  %v520_v19 = vld [vmem:[%s2984_s23 + $0x588] sm:$0xff]  ;;  %v2536_v20 = vpack.c.bf16 %v422_v12, %v421_v11  ;;  %v2570_v22 = vpack.c.bf16 %v488_v17, %v487_v16 }
  0x46   : > { %2553 = vmatpush3.bf16.msra.mxu1 %v2552_v34  ;;  %1053 = vmatprep.mubr.f32.mxu1 %v254_v53  ;;  %v2568_v21 = vpack.c.bf16 %v454_v15, %v453_v13  ;;  %v471_v23 = vld [vmem:[%s2984_s23 + $0x400] sm:$0xff]  ;;  %v472_v24 = vld [vmem:[%s2984_s23 + $0x408] sm:$0xff]  ;;  %v2602_v25 = vpack.c.bf16 %v520_v19, %v519_v18  ;;  %v489_v29 = vld [vmem:[%s2984_s23 + $0x490] sm:$0xff] }
  0x47   : > { %2555 = vmatprep.subr.bf16.mxu1 %v2554_v39  ;;  %v503_v26 = vld [vmem:[%s2984_s23 + $0x500] sm:$0xff]  ;;  %v504_v27 = vld [vmem:[%s2984_s23 + $0x508] sm:$0xff]  ;;  %v490_v30 = vld [vmem:[%s2984_s23 + $0x498] sm:$0xff]  ;;  %v2572_v31 = vpack.c.bf16 %v472_v24, %v471_v23 }
  0x48   : > { %2525 = vmatpush3.bf16.msra.mxu0 %v2524_v46  ;;  %v251_v28 = vld [vmem:[%s3052_s4 + $0x20] sm:$0xff]  ;;  %v253_v32 = vld [vmem:[%s3052_s4 + $0x30] sm:$0xff]  ;;  %v522_v34 = vld [vmem:[%s2984_s23 + $0x598] sm:$0xff]  ;;  %v2604_v35 = vpack.c.bf16 %v504_v27, %v503_v26  ;;  %v2574_v40 = vpack.c.bf16 %v490_v30, %v489_v29 }
  0x49   : > { %2527 = vmatprep.subr.bf16.mxu0 %v2526_v50  ;;  %v521_v33 = vld [vmem:[%s2984_s23 + $0x590] sm:$0xff]  ;;  %v276_v36 = vld [vmem:[%s3052_s4 + $0xe8] sm:$0xff]  ;;  %v474_v38 = vld [vmem:[%s2984_s23 + $0x418] sm:$0xff] }
  0x4a   : > { %2557 = vmatpush3.bf16.msra.mxu1 %v2556_v49  ;;  %v473_v37 = vld [vmem:[%s2984_s23 + $0x410] sm:$0xff]  ;;  %v275_v39 = vld [vmem:[%s3052_s4 + $0xe0] sm:$0xff]  ;;  %v506_v42 = vld [vmem:[%s2984_s23 + $0x518] sm:$0xff]  ;;  %v2606_v44 = vpack.c.bf16 %v522_v34, %v521_v33 }
  0x4b   : > { %2559 = vmatprep.subr.bf16.mxu1 %v2558_v54  ;;  %v505_v41 = vld [vmem:[%s2984_s23 + $0x510] sm:$0xff]  ;;  %v278_v43 = vld [vmem:[%s3052_s4 + $0xf8] sm:$0xff]  ;;  %v491_v45 = vld [vmem:[%s2984_s23 + $0x4a0] sm:$0xff]  ;;  %v2576_v47 = vpack.c.bf16 %v474_v38, %v473_v37 }
  0x4c   : > { %2529 = vmatpush3.bf16.msra.mxu0 %v2528_v60  ;;  %v492_v46 = vld [vmem:[%s2984_s23 + $0x4a8] sm:$0xff]  ;;  %v277_v48 = vld [vmem:[%s3052_s4 + $0xf0] sm:$0xff]  ;;  %v523_v49 = vld [vmem:[%s2984_s23 + $0x5a0] sm:$0xff]  ;;  %v2608_v51 = vpack.c.bf16 %v506_v42, %v505_v41 }
  0x4d   : > { %2531 = vmatprep.subr.bf16.mxu0 %v2530_v62  ;;  %v524_v50 = vld [vmem:[%s2984_s23 + $0x5a8] sm:$0xff]  ;;  %v475_v53 = vld [vmem:[%s2984_s23 + $0x420] sm:$0xff]  ;;  %v2578_v56 = vpack.c.bf16 %v492_v46, %v491_v45  ;;  %v302_v57 = vld [vmem:[%s3052_s4 + $0x1b8] sm:$0xff] }
  0x4e   : > { %2561 = vmatpush3.bf16.msra.mxu1 %v2560_v61  ;;  %v300_v52 = vld [vmem:[%s3052_s4 + $0x1a8] sm:$0xff]  ;;  %v299_v55 = vld [vmem:[%s3052_s4 + $0x1a0] sm:$0xff]  ;;  %v2610_v60 = vpack.c.bf16 %v524_v50, %v523_v49  ;;  %v301_v61 = vld [vmem:[%s3052_s4 + $0x1b0] sm:$0xff] }
  0x4f   : > { %2563 = vmatprep.subr.bf16.mxu1 %v2562_v2  ;;  %v476_v54 = vld [vmem:[%s2984_s23 + $0x428] sm:$0xff]  ;;  %v507_v58 = vld [vmem:[%s2984_s23 + $0x520] sm:$0xff]  ;;  %v493_v62 = vld [vmem:[%s2984_s23 + $0x4b0] sm:$0xff] }
  0x50   : > { %2533 = vmatpush3.bf16.msra.mxu0 %v2532_v8  ;;  %v508_v59 = vld [vmem:[%s2984_s23 + $0x528] sm:$0xff]  ;;  %v494_v63 = vld [vmem:[%s2984_s23 + $0x4b8] sm:$0xff]  ;;  %v2580_v0 = vpack.c.bf16 %v476_v54, %v475_v53  ;;  %v525_v2 = vld [vmem:[%s2984_s23 + $0x5b0] sm:$0xff] }
  0x51   : > { %2535 = vmatprep.subr.bf16.mxu0 %v2534_v10  ;;  %v324_v1 = vld [vmem:[%s3052_s4 + $0x268] sm:$0xff]  ;;  %v526_v3 = vld [vmem:[%s2984_s23 + $0x5b8] sm:$0xff]  ;;  %v2612_v4 = vpack.c.bf16 %v508_v59, %v507_v58  ;;  %v477_v5 = vld [vmem:[%s2984_s23 + $0x430] sm:$0xff]  ;;  %v2582_v8 = vpack.c.bf16 %v494_v63, %v493_v62 }
  0x52   : > { %2565 = vmatpush3.bf16.msra.mxu1 %v2564_v9  ;;  %v478_v6 = vld [vmem:[%s2984_s23 + $0x438] sm:$0xff]  ;;  %v509_v7 = vld [vmem:[%s2984_s23 + $0x530] sm:$0xff]  ;;  %v495_v10 = vld [vmem:[%s2984_s23 + $0x4c0] sm:$0xff]  ;;  %v2614_v13 = vpack.c.bf16 %v526_v3, %v525_v2 }
  0x53   : > { %2567 = vmatprep.subr.bf16.mxu1 %v2566_v14  ;;  %v510_v9 = vld [vmem:[%s2984_s23 + $0x538] sm:$0xff]  ;;  %v496_v11 = vld [vmem:[%s2984_s23 + $0x4c8] sm:$0xff]  ;;  %v527_v14 = vld [vmem:[%s2984_s23 + $0x5c0] sm:$0xff]  ;;  %v2584_v17 = vpack.c.bf16 %v478_v6, %v477_v5 }
  0x54   : > { %2537 = vmatpush3.bf16.msra.mxu0 %v2536_v20  ;;  %v326_v12 = vld [vmem:[%s3052_s4 + $0x278] sm:$0xff]  ;;  %v528_v15 = vld [vmem:[%s2984_s23 + $0x5c8] sm:$0xff]  ;;  %v323_v16 = vld [vmem:[%s3052_s4 + $0x260] sm:$0xff]  ;;  %v2616_v19 = vpack.c.bf16 %v510_v9, %v509_v7  ;;  %v2586_v20 = vpack.c.bf16 %v496_v11, %v495_v10 }
  0x55   : > { %2571 = vmatprep.subr.bf16.mxu0 %v2570_v22  ;;  %v325_v18 = vld [vmem:[%s3052_s4 + $0x270] sm:$0xff]  ;;  %v480_v22 = vld [vmem:[%s2984_s23 + $0x448] sm:$0xff]  ;;  %v511_v23 = vld [vmem:[%s2984_s23 + $0x540] sm:$0xff]  ;;  %v2618_v24 = vpack.c.bf16 %v528_v15, %v527_v14 }
  0x56   : > { %2569 = vmatpush3.bf16.msra.mxu1 %v2568_v21  ;;  %v479_v21 = vld [vmem:[%s2984_s23 + $0x440] sm:$0xff]  ;;  %v497_v26 = vld [vmem:[%s2984_s23 + $0x4d0] sm:$0xff]  ;;  %v498_v27 = vld [vmem:[%s2984_s23 + $0x4d8] sm:$0xff] }
  0x57   : > { %2603 = vmatprep.subr.bf16.mxu1 %v2602_v25  ;;  %969 = vmatmul.mubr.f32.vlgmr.msra.gmra.mrb[8].mxu0 %v251_v28  ;;  %v512_v25 = vld [vmem:[%s2984_s23 + $0x548] sm:$0xff]  ;;  %v529_v28 = vld [vmem:[%s2984_s23 + $0x5d0] sm:$0xff]  ;;  %v530_v29 = vld [vmem:[%s2984_s23 + $0x5d8] sm:$0xff]  ;;  %v2590_v34 = vpack.c.bf16 %v498_v27, %v497_v26 }
  0x58   : > { %2573 = vmatpush3.bf16.msra.mxu0 %v2572_v31  ;;  %973 = vmatprep.mubr.f32.mxu0 %v276_v36  ;;  %v256_v30 = vld [vmem:[%s3052_s4 + $0x48] sm:$0xff]  ;;  %v2588_v31 = vpack.c.bf16 %v480_v22, %v479_v21  ;;  %v2620_v33 = vpack.c.bf16 %v512_v25, %v511_v23  ;;  %v482_v36 = vld [vmem:[%s2984_s23 + $0x458] sm:$0xff]  ;;  %v513_v37 = vld [vmem:[%s2984_s23 + $0x550] sm:$0xff]  ;;  %v2622_v38 = vpack.c.bf16 %v530_v29, %v529_v28 }
  0x59   : > { %1054 = vmatmul.mubr.f32.vlgmr.msra.gmra.mrb[8].mxu1 %v253_v32  ;;  %2575 = vmatprep.subr.bf16.mxu0 %v2574_v40  ;;  %v258_v32 = vld [vmem:[%s3052_s4 + $0x58] sm:$0xff]  ;;  %v499_v40 = vld [vmem:[%s2984_s23 + $0x4e0] sm:$0xff]  ;;  %v500_v41 = vld [vmem:[%s2984_s23 + $0x4e8] sm:$0xff] }
  0x5a   : > { %2605 = vmatpush3.bf16.msra.mxu1 %v2604_v35  ;;  %1058 = vmatprep.mubr.f32.mxu1 %v278_v43  ;;  %v481_v35 = vld [vmem:[%s2984_s23 + $0x450] sm:$0xff]  ;;  %v531_v42 = vld [vmem:[%s2984_s23 + $0x5e0] sm:$0xff]  ;;  %v532_v43 = vld [vmem:[%s2984_s23 + $0x5e8] sm:$0xff]  ;;  %v2594_v46 = vpack.c.bf16 %v500_v41, %v499_v40 }
  0x5b   : > { %974 = vmatmul.mubr.f32.gmra.mrb[10].mxu0 %v275_v39  ;;  %2607 = vmatprep.subr.bf16.mxu1 %v2606_v44  ;;  %v514_v39 = vld [vmem:[%s2984_s23 + $0x558] sm:$0xff]  ;;  %v2592_v44 = vpack.c.bf16 %v482_v36, %v481_v35  ;;  %v515_v49 = vld [vmem:[%s2984_s23 + $0x560] sm:$0xff]  ;;  %v2626_v50 = vpack.c.bf16 %v532_v43, %v531_v42  ;;  %v533_v54 = vld [vmem:[%s2984_s23 + $0x5f0] sm:$0xff] }
  0x5c   : > { %2577 = vmatpush3.bf16.msra.mxu0 %v2576_v47  ;;  %978 = vmatprep.mubr.f32.mxu0 %v300_v52  ;;  %v2624_v45 = vpack.c.bf16 %v514_v39, %v513_v37  ;;  %v483_v47 = vld [vmem:[%s2984_s23 + $0x460] sm:$0xff]  ;;  %v501_v52 = vld [vmem:[%s2984_s23 + $0x4f0] sm:$0xff]  ;;  %v502_v53 = vld [vmem:[%s2984_s23 + $0x4f8] sm:$0xff] }
  0x5d   : > { %1059 = vmatmul.mubr.f32.gmra.mrb[10].mxu1 %v277_v48  ;;  %2579 = vmatprep.subr.bf16.mxu0 %v2578_v56  ;;  %v484_v48 = vld [vmem:[%s2984_s23 + $0x468] sm:$0xff]  ;;  %v2598_v58 = vpack.c.bf16 %v502_v53, %v501_v52  ;;  %v485_v59 = vld [vmem:[%s2984_s23 + $0x470] sm:$0xff]  ;;  %v518_v63 = vld [vmem:[%s2984_s23 + $0x578] sm:$0xff] }
  0x5e   : > { %2609 = vmatpush3.bf16.msra.mxu1 %v2608_v51  ;;  %1063 = vmatprep.mubr.f32.mxu1 %v302_v57  ;;  %v516_v51 = vld [vmem:[%s2984_s23 + $0x568] sm:$0xff]  ;;  %v2596_v56 = vpack.c.bf16 %v484_v48, %v483_v47  ;;  %v583_v2 = vld [vmem:[%s2984_s23 + $0x780] sm:$0xff]  ;;  %v554_v14 = vld [vmem:[%s2984_s23 + $0x698] sm:$0xff] }
  0x5f   : > { %979 = vmatmul.mubr.f32.gmra.mrb[12].mxu0 %v299_v55  ;;  %2611 = vmatprep.subr.bf16.mxu1 %v2610_v60  ;;  %v534_v55 = vld [vmem:[%s2984_s23 + $0x5f8] sm:$0xff]  ;;  %v2628_v57 = vpack.c.bf16 %v516_v51, %v515_v49  ;;  %v584_v3 = vld [vmem:[%s2984_s23 + $0x788] sm:$0xff]  ;;  %v535_v7 = vld [vmem:[%s2984_s23 + $0x600] sm:$0xff] }
  0x60   : > { %2581 = vmatpush3.bf16.msra.mxu0 %v2580_v0  ;;  %983 = vmatprep.mubr.f32.mxu0 %v324_v1  ;;  %v486_v60 = vld [vmem:[%s2984_s23 + $0x478] sm:$0xff]  ;;  %v2630_v62 = vpack.c.bf16 %v534_v55, %v533_v54  ;;  %v551_v0 = vld [vmem:[%s2984_s23 + $0x680] sm:$0xff]  ;;  %v552_v1 = vld [vmem:[%s2984_s23 + $0x688] sm:$0xff]  ;;  %v2666_v9 = vpack.c.bf16 %v584_v3, %v583_v2 }
  0x61   : > { %1064 = vmatmul.mubr.f32.gmra.mrb[12].mxu1 %v301_v61  ;;  %2583 = vmatprep.subr.bf16.mxu0 %v2582_v8  ;;  %v517_v61 = vld [vmem:[%s2984_s23 + $0x570] sm:$0xff]  ;;  %v2634_v6 = vpack.c.bf16 %v552_v1, %v551_v0  ;;  %v536_v8 = vld [vmem:[%s2984_s23 + $0x608] sm:$0xff]  ;;  %v567_v10 = vld [vmem:[%s2984_s23 + $0x700] sm:$0xff] }
  0x62   : > { %2613 = vmatpush3.bf16.msra.mxu1 %v2612_v4  ;;  %1068 = vmatprep.mubr.f32.mxu1 %v326_v12  ;;  %v2600_v4 = vpack.c.bf16 %v486_v60, %v485_v59  ;;  %v2632_v5 = vpack.c.bf16 %v518_v63, %v517_v61  ;;  %v568_v11 = vld [vmem:[%s2984_s23 + $0x708] sm:$0xff]  ;;  %v255_v12 = vld [vmem:[%s3052_s4 + $0x40] sm:$0xff]  ;;  %v2636_v15 = vpack.c.bf16 %v536_v8, %v535_v7  ;;  %v537_v21 = vld [vmem:[%s2984_s23 + $0x610] sm:$0xff] }
  0x63   : > { %984 = vmatmul.mubr.f32.gmra.mrb[14].mxu0 %v323_v16  ;;  %2615 = vmatprep.subr.bf16.mxu1 %v2614_v13  ;;  %v553_v13 = vld [vmem:[%s2984_s23 + $0x690] sm:$0xff]  ;;  %v538_v22 = vld [vmem:[%s2984_s23 + $0x618] sm:$0xff]  ;;  %v279_v23 = vld [vmem:[%s3052_s4 + $0x100] sm:$0xff] }
  0x64   : > { %2585 = vmatpush3.bf16.msra.mxu0 %v2584_v17  ;;  %1138 = vmatprep.mubr.f32.mxu0 %v256_v30  ;;  %v257_v16 = vld [vmem:[%s3052_s4 + $0x50] sm:$0xff]  ;;  %v570_v26 = vld [vmem:[%s2984_s23 + $0x718] sm:$0xff]  ;;  %v555_v29 = vld [vmem:[%s2984_s23 + $0x6a0] sm:$0xff] }
  0x65   : > { %1069 = vmatmul.mubr.f32.gmra.mrb[14].mxu1 %v325_v18  ;;  %2587 = vmatprep.subr.bf16.mxu0 %v2586_v20  ;;  %v585_v17 = vld [vmem:[%s2984_s23 + $0x790] sm:$0xff]  ;;  %v586_v18 = vld [vmem:[%s2984_s23 + $0x798] sm:$0xff]  ;;  %v280_v20 = vld [vmem:[%s3052_s4 + $0x108] sm:$0xff] }
  0x66   : > { %2617 = vmatpush3.bf16.msra.mxu1 %v2616_v19  ;;  %1223 = vmatprep.mubr.f32.mxu1 %v258_v32  ;;  %v2668_v19 = vpack.c.bf16 %v568_v11, %v567_v10  ;;  %v569_v25 = vld [vmem:[%s2984_s23 + $0x710] sm:$0xff]  ;;  %v282_v27 = vld [vmem:[%s3052_s4 + $0x118] sm:$0xff]  ;;  %v2670_v28 = vpack.c.bf16 %v586_v18, %v585_v17  ;;  %v556_v30 = vld [vmem:[%s2984_s23 + $0x6a8] sm:$0xff] }
  0x67   : > { %2619 = vmatprep.subr.bf16.mxu1 %v2618_v24  ;;  %v2638_v24 = vpack.c.bf16 %v554_v14, %v553_v13  ;;  %v281_v32 = vld [vmem:[%s3052_s4 + $0x110] sm:$0xff]  ;;  %v2672_v35 = vpack.c.bf16 %v570_v26, %v569_v25  ;;  %v304_v36 = vld [vmem:[%s3052_s4 + $0x1c8] sm:$0xff]  ;;  %v539_v37 = vld [vmem:[%s2984_s23 + $0x620] sm:$0xff]  ;;  %v2642_v40 = vpack.c.bf16 %v556_v30, %v555_v29 }
  0x68   : > { %2589 = vmatpush3.bf16.msra.mxu0 %v2588_v31  ;;  %v2640_v31 = vpack.c.bf16 %v538_v22, %v537_v21  ;;  %v303_v39 = vld [vmem:[%s3052_s4 + $0x1c0] sm:$0xff]  ;;  %v306_v41 = vld [vmem:[%s3052_s4 + $0x1d8] sm:$0xff]  ;;  %v572_v43 = vld [vmem:[%s2984_s23 + $0x728] sm:$0xff] }
  0x69   : > { %2591 = vmatprep.subr.bf16.mxu0 %v2590_v34  ;;  %v588_v34 = vld [vmem:[%s2984_s23 + $0x7a8] sm:$0xff]  ;;  %v571_v42 = vld [vmem:[%s2984_s23 + $0x720] sm:$0xff]  ;;  %v558_v47 = vld [vmem:[%s2984_s23 + $0x6b8] sm:$0xff] }
  0x6a   : > { %2621 = vmatpush3.bf16.msra.mxu1 %v2620_v33  ;;  %v587_v33 = vld [vmem:[%s2984_s23 + $0x7a0] sm:$0xff]  ;;  %v328_v49 = vld [vmem:[%s3052_s4 + $0x288] sm:$0xff]  ;;  %v590_v51 = vld [vmem:[%s2984_s23 + $0x7b8] sm:$0xff]  ;;  %v2676_v52 = vpack.c.bf16 %v572_v43, %v571_v42 }
  0x6b   : > { %2623 = vmatprep.subr.bf16.mxu1 %v2622_v38  ;;  %v540_v38 = vld [vmem:[%s2984_s23 + $0x628] sm:$0xff]  ;;  %v541_v53 = vld [vmem:[%s2984_s23 + $0x630] sm:$0xff]  ;;  %v542_v54 = vld [vmem:[%s2984_s23 + $0x638] sm:$0xff] }
  0x6c   : > { %2593 = vmatpush3.bf16.msra.mxu0 %v2592_v44  ;;  %v2674_v44 = vpack.c.bf16 %v588_v34, %v587_v33  ;;  %v2644_v48 = vpack.c.bf16 %v540_v38, %v539_v37  ;;  %v573_v55 = vld [vmem:[%s2984_s23 + $0x730] sm:$0xff]  ;;  %v560_v59 = vld [vmem:[%s2984_s23 + $0x6c8] sm:$0xff]  ;;  %v330_v60 = vld [vmem:[%s3052_s4 + $0x298] sm:$0xff]  ;;  %v2648_v1 = vpack.c.bf16 %v542_v54, %v541_v53 }
  0x6d   : > { %2595 = vmatprep.subr.bf16.mxu0 %v2594_v46  ;;  %v557_v46 = vld [vmem:[%s2984_s23 + $0x6b0] sm:$0xff]  ;;  %v592_v63 = vld [vmem:[%s2984_s23 + $0x7c8] sm:$0xff]  ;;  %v327_v0 = vld [vmem:[%s3052_s4 + $0x280] sm:$0xff] }
  0x6e   : > { %2625 = vmatpush3.bf16.msra.mxu1 %v2624_v45  ;;  %v305_v45 = vld [vmem:[%s3052_s4 + $0x1d0] sm:$0xff]  ;;  %v575_v7 = vld [vmem:[%s2984_s23 + $0x740] sm:$0xff]  ;;  %v562_v11 = vld [vmem:[%s2984_s23 + $0x6d8] sm:$0xff] }
  0x6f   : > { %2627 = vmatprep.subr.bf16.mxu1 %v2626_v50  ;;  %v589_v50 = vld [vmem:[%s2984_s23 + $0x7b0] sm:$0xff]  ;;  %v594_v13 = vld [vmem:[%s2984_s23 + $0x7d8] sm:$0xff]  ;;  %v260_v14 = vld [vmem:[%s3052_s4 + $0x68] sm:$0xff] }
  0x70   : > { %2597 = vmatpush3.bf16.msra.mxu0 %v2596_v56  ;;  %v2646_v56 = vpack.c.bf16 %v558_v47, %v557_v46  ;;  %v2678_v61 = vpack.c.bf16 %v590_v51, %v589_v50  ;;  %v329_v2 = vld [vmem:[%s3052_s4 + $0x290] sm:$0xff]  ;;  %v564_v25 = vld [vmem:[%s2984_s23 + $0x6e8] sm:$0xff]  ;;  %v595_v26 = vld [vmem:[%s2984_s23 + $0x7e0] sm:$0xff] }
  0x71   : > { %2599 = vmatprep.subr.bf16.mxu0 %v2598_v58  ;;  %v559_v58 = vld [vmem:[%s2984_s23 + $0x6c0] sm:$0xff]  ;;  %v561_v10 = vld [vmem:[%s2984_s23 + $0x6d0] sm:$0xff]  ;;  %v566_v37 = vld [vmem:[%s2984_s23 + $0x6f8] sm:$0xff] }
  0x72   : > { %2629 = vmatpush3.bf16.msra.mxu1 %v2628_v57  ;;  %v574_v57 = vld [vmem:[%s2984_s23 + $0x738] sm:$0xff]  ;;  %v2654_v18 = vpack.c.bf16 %v562_v11, %v561_v10  ;;  %v577_v21 = vld [vmem:[%s2984_s23 + $0x750] sm:$0xff]  ;;  %v579_v33 = vld [vmem:[%s2984_s23 + $0x760] sm:$0xff] }
  0x73   : > { %2631 = vmatprep.subr.bf16.mxu1 %v2630_v62  ;;  %v591_v62 = vld [vmem:[%s2984_s23 + $0x7c0] sm:$0xff]  ;;  %v2680_v3 = vpack.c.bf16 %v574_v57, %v573_v55  ;;  %v597_v38 = vld [vmem:[%s2984_s23 + $0x7f0] sm:$0xff]  ;;  %v582_v47 = vld [vmem:[%s2984_s23 + $0x778] sm:$0xff] }
  0x74   : > { %2601 = vmatpush3.bf16.msra.mxu0 %v2600_v4  ;;  %v2650_v4 = vpack.c.bf16 %v560_v59, %v559_v58  ;;  %v2682_v8 = vpack.c.bf16 %v592_v63, %v591_v62  ;;  %v549_v43 = vld [vmem:[%s2984_s23 + $0x670] sm:$0xff]  ;;  %v647_v50 = vld [vmem:[%s2984_s23 + $0x980] sm:$0xff]  ;;  %v648_v51 = vld [vmem:[%s2984_s23 + $0x988] sm:$0xff] }
  0x75   : > { %2635 = vmatprep.subr.bf16.mxu0 %v2634_v6  ;;  %v544_v6 = vld [vmem:[%s2984_s23 + $0x648] sm:$0xff]  ;;  %v599_v55 = vld [vmem:[%s2984_s23 + $0x800] sm:$0xff]  ;;  %v2730_v57 = vpack.c.bf16 %v648_v51, %v647_v50  ;;  %v618_v62 = vld [vmem:[%s2984_s23 + $0x898] sm:$0xff] }
  0x76   : > { %2633 = vmatpush3.bf16.msra.mxu1 %v2632_v5  ;;  %v543_v5 = vld [vmem:[%s2984_s23 + $0x640] sm:$0xff]  ;;  %v632_v59 = vld [vmem:[%s2984_s23 + $0x908] sm:$0xff]  ;;  %v634_v10 = vld [vmem:[%s2984_s23 + $0x918] sm:$0xff] }
  0x77   : > { %2667 = vmatprep.subr.bf16.mxu1 %v2666_v9  ;;  %1139 = vmatmul.mubr.f32.vlgmr.msra.gmra.mrb[16].mxu0 %v255_v12  ;;  %v576_v9 = vld [vmem:[%s2984_s23 + $0x748] sm:$0xff]  ;;  %v593_v12 = vld [vmem:[%s2984_s23 + $0x7d0] sm:$0xff]  ;;  %v631_v58 = vld [vmem:[%s2984_s23 + $0x900] sm:$0xff] }
  0x78   : > { %2637 = vmatpush3.bf16.msra.mxu0 %v2636_v15  ;;  %1143 = vmatprep.mubr.f32.mxu0 %v280_v20  ;;  %v2652_v15 = vpack.c.bf16 %v544_v6, %v543_v5  ;;  %v2684_v17 = vpack.c.bf16 %v576_v9, %v575_v7  ;;  %v546_v20 = vld [vmem:[%s2984_s23 + $0x658] sm:$0xff]  ;;  %v2686_v22 = vpack.c.bf16 %v594_v13, %v593_v12  ;;  %v601_v5 = vld [vmem:[%s2984_s23 + $0x810] sm:$0xff]  ;;  %v283_v7 = vld [vmem:[%s3052_s4 + $0x120] sm:$0xff] }
  0x79   : > { %1224 = vmatmul.mubr.f32.vlgmr.msra.gmra.mrb[16].mxu1 %v257_v16  ;;  %2639 = vmatprep.subr.bf16.mxu0 %v2638_v24  ;;  %v262_v16 = vld [vmem:[%s3052_s4 + $0x78] sm:$0xff]  ;;  %v563_v24 = vld [vmem:[%s2984_s23 + $0x6e0] sm:$0xff]  ;;  %v633_v9 = vld [vmem:[%s2984_s23 + $0x910] sm:$0xff] }
  0x7a   : > { %2669 = vmatpush3.bf16.msra.mxu1 %v2668_v19  ;;  %1228 = vmatprep.mubr.f32.mxu1 %v282_v27  ;;  %v545_v19 = vld [vmem:[%s2984_s23 + $0x650] sm:$0xff]  ;;  %v596_v27 = vld [vmem:[%s2984_s23 + $0x7e8] sm:$0xff]  ;;  %v2658_v30 = vpack.c.bf16 %v564_v25, %v563_v24  ;;  %v602_v6 = vld [vmem:[%s2984_s23 + $0x818] sm:$0xff] }
  0x7b   : > { %1144 = vmatmul.mubr.f32.gmra.mrb[18].mxu0 %v279_v23  ;;  %2671 = vmatprep.subr.bf16.mxu1 %v2670_v28  ;;  %v578_v23 = vld [vmem:[%s2984_s23 + $0x758] sm:$0xff]  ;;  %v2656_v28 = vpack.c.bf16 %v546_v20, %v545_v19  ;;  %v2690_v34 = vpack.c.bf16 %v596_v27, %v595_v26  ;;  %v619_v13 = vld [vmem:[%s2984_s23 + $0x8a0] sm:$0xff]  ;;  %v2736_v19 = vpack.c.bf16 %v634_v10, %v633_v9  ;;  %v308_v20 = vld [vmem:[%s3052_s4 + $0x1e8] sm:$0xff] }
  0x7c   : > { %2641 = vmatpush3.bf16.msra.mxu0 %v2640_v31  ;;  %1148 = vmatprep.mubr.f32.mxu0 %v304_v36  ;;  %v2688_v29 = vpack.c.bf16 %v578_v23, %v577_v21  ;;  %v547_v31 = vld [vmem:[%s2984_s23 + $0x660] sm:$0xff]  ;;  %v565_v36 = vld [vmem:[%s2984_s23 + $0x6f0] sm:$0xff]  ;;  %v286_v11 = vld [vmem:[%s3052_s4 + $0x138] sm:$0xff] }
  0x7d   : > { %1229 = vmatmul.mubr.f32.gmra.mrb[18].mxu1 %v281_v32  ;;  %2643 = vmatprep.subr.bf16.mxu0 %v2642_v40  ;;  %v548_v32 = vld [vmem:[%s2984_s23 + $0x668] sm:$0xff]  ;;  %v2662_v42 = vpack.c.bf16 %v566_v37, %v565_v36  ;;  %v603_v21 = vld [vmem:[%s2984_s23 + $0x820] sm:$0xff]  ;;  %v310_v25 = vld [vmem:[%s3052_s4 + $0x1f8] sm:$0xff] }
  0x7e   : > { %2673 = vmatpush3.bf16.msra.mxu1 %v2672_v35  ;;  %1233 = vmatprep.mubr.f32.mxu1 %v306_v41  ;;  %v580_v35 = vld [vmem:[%s2984_s23 + $0x768] sm:$0xff]  ;;  %v2660_v40 = vpack.c.bf16 %v548_v32, %v547_v31  ;;  %v307_v23 = vld [vmem:[%s3052_s4 + $0x1e0] sm:$0xff]  ;;  %v622_v31 = vld [vmem:[%s2984_s23 + $0x8b8] sm:$0xff] }
  0x7f   : > { %1149 = vmatmul.mubr.f32.gmra.mrb[20].mxu0 %v303_v39  ;;  %2675 = vmatprep.subr.bf16.mxu1 %v2674_v44  ;;  %v598_v39 = vld [vmem:[%s2984_s23 + $0x7f8] sm:$0xff]  ;;  %v2692_v41 = vpack.c.bf16 %v580_v35, %v579_v33  ;;  %v635_v26 = vld [vmem:[%s2984_s23 + $0x920] sm:$0xff]  ;;  %v636_v27 = vld [vmem:[%s2984_s23 + $0x928] sm:$0xff] }
  0x80   : > { %2645 = vmatpush3.bf16.msra.mxu0 %v2644_v48  ;;  %1153 = vmatprep.mubr.f32.mxu0 %v328_v49  ;;  %v550_v44 = vld [vmem:[%s2984_s23 + $0x678] sm:$0xff]  ;;  %v2694_v46 = vpack.c.bf16 %v598_v39, %v597_v38  ;;  %v615_v48 = vld [vmem:[%s2984_s23 + $0x880] sm:$0xff]  ;;  %v616_v49 = vld [vmem:[%s2984_s23 + $0x888] sm:$0xff]  ;;  %v2740_v36 = vpack.c.bf16 %v636_v27, %v635_v26 }
  0x81   : > { %1234 = vmatmul.mubr.f32.gmra.mrb[20].mxu1 %v305_v45  ;;  %2647 = vmatprep.subr.bf16.mxu0 %v2646_v56  ;;  %v581_v45 = vld [vmem:[%s2984_s23 + $0x770] sm:$0xff]  ;;  %v2698_v54 = vpack.c.bf16 %v616_v49, %v615_v48  ;;  %v600_v56 = vld [vmem:[%s2984_s23 + $0x808] sm:$0xff]  ;;  %v654_v35 = vld [vmem:[%s2984_s23 + $0x9b8] sm:$0xff] }
  0x82   : > { %2677 = vmatpush3.bf16.msra.mxu1 %v2676_v52  ;;  %1238 = vmatprep.mubr.f32.mxu1 %v330_v60  ;;  %v2664_v52 = vpack.c.bf16 %v550_v44, %v549_v43  ;;  %v2696_v53 = vpack.c.bf16 %v582_v47, %v581_v45  ;;  %v259_v60 = vld [vmem:[%s3052_s4 + $0x60] sm:$0xff]  ;;  %v2700_v63 = vpack.c.bf16 %v600_v56, %v599_v55  ;;  %v332_v33 = vld [vmem:[%s3052_s4 + $0x2a8] sm:$0xff]  ;;  %v605_v37 = vld [vmem:[%s2984_s23 + $0x830] sm:$0xff] }
  0x83   : > { %1154 = vmatmul.mubr.f32.gmra.mrb[22].mxu0 %v327_v0  ;;  %2679 = vmatprep.subr.bf16.mxu1 %v2678_v61  ;;  %v617_v61 = vld [vmem:[%s2984_s23 + $0x890] sm:$0xff]  ;;  %v606_v38 = vld [vmem:[%s2984_s23 + $0x838] sm:$0xff]  ;;  %v624_v43 = vld [vmem:[%s2984_s23 + $0x8c8] sm:$0xff] }
  0x84   : > { %2649 = vmatpush3.bf16.msra.mxu0 %v2648_v1  ;;  %1308 = vmatprep.mubr.f32.mxu0 %v260_v14  ;;  %v261_v0 = vld [vmem:[%s3052_s4 + $0x70] sm:$0xff]  ;;  %v620_v14 = vld [vmem:[%s2984_s23 + $0x8a8] sm:$0xff]  ;;  %v334_v44 = vld [vmem:[%s3052_s4 + $0x2b8] sm:$0xff]  ;;  %v2712_v49 = vpack.c.bf16 %v606_v38, %v605_v37 }
  0x85   : > { %1239 = vmatmul.mubr.f32.gmra.mrb[22].mxu1 %v329_v2  ;;  %2651 = vmatprep.subr.bf16.mxu0 %v2650_v4  ;;  %v649_v1 = vld [vmem:[%s2984_s23 + $0x990] sm:$0xff]  ;;  %v650_v2 = vld [vmem:[%s2984_s23 + $0x998] sm:$0xff]  ;;  %v284_v4 = vld [vmem:[%s3052_s4 + $0x128] sm:$0xff]  ;;  %v2706_v24 = vpack.c.bf16 %v620_v14, %v619_v13 }
  0x86   : > { %2681 = vmatpush3.bf16.msra.mxu1 %v2680_v3  ;;  %1393 = vmatprep.mubr.f32.mxu1 %v262_v16  ;;  %v2732_v3 = vpack.c.bf16 %v632_v59, %v631_v58  ;;  %v2734_v12 = vpack.c.bf16 %v650_v2, %v649_v1  ;;  %v285_v16 = vld [vmem:[%s3052_s4 + $0x130] sm:$0xff]  ;;  %v656_v47 = vld [vmem:[%s2984_s23 + $0x9c8] sm:$0xff]  ;;  %v331_v48 = vld [vmem:[%s3052_s4 + $0x2a0] sm:$0xff] }
  0x87   : > { %2683 = vmatprep.subr.bf16.mxu1 %v2682_v8  ;;  %v2702_v8 = vpack.c.bf16 %v618_v62, %v617_v61  ;;  %v637_v39 = vld [vmem:[%s2984_s23 + $0x930] sm:$0xff]  ;;  %v639_v55 = vld [vmem:[%s2984_s23 + $0x940] sm:$0xff]  ;;  %v626_v59 = vld [vmem:[%s2984_s23 + $0x8d8] sm:$0xff] }
  0x88   : > { %2653 = vmatpush3.bf16.msra.mxu0 %v2652_v15  ;;  %v2704_v15 = vpack.c.bf16 %v602_v6, %v601_v5  ;;  %v333_v50 = vld [vmem:[%s3052_s4 + $0x2b0] sm:$0xff]  ;;  %v658_v61 = vld [vmem:[%s2984_s23 + $0x9d8] sm:$0xff]  ;;  %v264_v62 = vld [vmem:[%s3052_s4 + $0x88] sm:$0xff] }
  0x89   : > { %2655 = vmatprep.subr.bf16.mxu0 %v2654_v18  ;;  %v652_v18 = vld [vmem:[%s2984_s23 + $0x9a8] sm:$0xff]  ;;  %v625_v58 = vld [vmem:[%s2984_s23 + $0x8d0] sm:$0xff]  ;;  %v659_v10 = vld [vmem:[%s2984_s23 + $0x9e0] sm:$0xff] }
  0x8a   : > { %2685 = vmatpush3.bf16.msra.mxu1 %v2684_v17  ;;  %v651_v17 = vld [vmem:[%s2984_s23 + $0x9a0] sm:$0xff]  ;;  %v2718_v2 = vpack.c.bf16 %v626_v59, %v625_v58  ;;  %v641_v5 = vld [vmem:[%s2984_s23 + $0x950] sm:$0xff]  ;;  %v628_v9 = vld [vmem:[%s2984_s23 + $0x8e8] sm:$0xff] }
  0x8b   : > { %2687 = vmatprep.subr.bf16.mxu1 %v2686_v22  ;;  %v604_v22 = vld [vmem:[%s2984_s23 + $0x828] sm:$0xff]  ;;  %v613_v27 = vld [vmem:[%s2984_s23 + $0x870] sm:$0xff]  ;;  %v698_v58 = vld [vmem:[%s2984_s23 + $0xb18] sm:$0xff] }
  0x8c   : > { %2657 = vmatpush3.bf16.msra.mxu0 %v2656_v28  ;;  %v2738_v28 = vpack.c.bf16 %v652_v18, %v651_v17  ;;  %v2708_v32 = vpack.c.bf16 %v604_v22, %v603_v21  ;;  %v643_v17 = vld [vmem:[%s2984_s23 + $0x960] sm:$0xff]  ;;  %v630_v21 = vld [vmem:[%s2984_s23 + $0x8f8] sm:$0xff]  ;;  %v661_v22 = vld [vmem:[%s2984_s23 + $0x9f0] sm:$0xff] }
  0x8d   : > { %2659 = vmatprep.subr.bf16.mxu0 %v2658_v30  ;;  %v621_v30 = vld [vmem:[%s2984_s23 + $0x8b0] sm:$0xff]  ;;  %v290_v59 = vld [vmem:[%s3052_s4 + $0x158] sm:$0xff] }
  0x8e   : > { %2689 = vmatpush3.bf16.msra.mxu1 %v2688_v29  ;;  %v309_v29 = vld [vmem:[%s3052_s4 + $0x1f0] sm:$0xff] }
  0x8f   : > { %2691 = vmatprep.subr.bf16.mxu1 %v2690_v34  ;;  %v653_v34 = vld [vmem:[%s2984_s23 + $0x9b0] sm:$0xff] }
  0x90   : > { %2661 = vmatpush3.bf16.msra.mxu0 %v2660_v40  ;;  %v2710_v40 = vpack.c.bf16 %v622_v31, %v621_v30  ;;  %v2742_v45 = vpack.c.bf16 %v654_v35, %v653_v34  ;;  %v646_v31 = vld [vmem:[%s2984_s23 + $0x978] sm:$0xff]  ;;  %v711_v34 = vld [vmem:[%s2984_s23 + $0xb80] sm:$0xff]  ;;  %v712_v35 = vld [vmem:[%s2984_s23 + $0xb88] sm:$0xff] }
  0x91   : > { %2663 = vmatprep.subr.bf16.mxu0 %v2662_v42  ;;  %v623_v42 = vld [vmem:[%s2984_s23 + $0x8c0] sm:$0xff] }
  0x92   : > { %2693 = vmatpush3.bf16.msra.mxu1 %v2692_v41  ;;  %v638_v41 = vld [vmem:[%s2984_s23 + $0x938] sm:$0xff] }
  0x93   : > { %2695 = vmatprep.subr.bf16.mxu1 %v2694_v46  ;;  %v655_v46 = vld [vmem:[%s2984_s23 + $0x9c0] sm:$0xff]  ;;  %v2744_v51 = vpack.c.bf16 %v638_v41, %v637_v39  ;;  %v2794_v41 = vpack.c.bf16 %v712_v35, %v711_v34  ;;  %v337_v34 = vld [vmem:[%s3052_s4 + $0x2d0] sm:$0xff] }
  0x94   : > { %2665 = vmatpush3.bf16.msra.mxu0 %v2664_v52  ;;  %v2714_v52 = vpack.c.bf16 %v624_v43, %v623_v42  ;;  %v2746_v56 = vpack.c.bf16 %v656_v47, %v655_v46  ;;  %v663_v39 = vld [vmem:[%s2984_s23 + $0xa00] sm:$0xff]  ;;  %v696_v43 = vld [vmem:[%s2984_s23 + $0xb08] sm:$0xff]  ;;  %v682_v46 = vld [vmem:[%s2984_s23 + $0xa98] sm:$0xff] }
  0x95   : > { %2699 = vmatprep.subr.bf16.mxu0 %v2698_v54  ;;  %v608_v54 = vld [vmem:[%s2984_s23 + $0x848] sm:$0xff]  ;;  %v695_v42 = vld [vmem:[%s2984_s23 + $0xb00] sm:$0xff] }
  0x96   : > { %2697 = vmatpush3.bf16.msra.mxu1 %v2696_v53  ;;  %v607_v53 = vld [vmem:[%s2984_s23 + $0x840] sm:$0xff] }
  0x97   : > { %2731 = vmatprep.subr.bf16.mxu1 %v2730_v57  ;;  %1309 = vmatmul.mubr.f32.vlgmr.msra.gmra.mrb[24].mxu0 %v259_v60  ;;  %v640_v57 = vld [vmem:[%s2984_s23 + $0x948] sm:$0xff]  ;;  %v657_v60 = vld [vmem:[%s2984_s23 + $0x9d0] sm:$0xff] }
  0x98   : > { %2701 = vmatpush3.bf16.msra.mxu0 %v2700_v63  ;;  %1313 = vmatprep.mubr.f32.mxu0 %v284_v4  ;;  %v2716_v63 = vpack.c.bf16 %v608_v54, %v607_v53  ;;  %v2748_v1 = vpack.c.bf16 %v640_v57, %v639_v55  ;;  %v610_v4 = vld [vmem:[%s2984_s23 + $0x858] sm:$0xff]  ;;  %v2750_v6 = vpack.c.bf16 %v658_v61, %v657_v60  ;;  %v665_v53 = vld [vmem:[%s2984_s23 + $0xa10] sm:$0xff]  ;;  %v287_v55 = vld [vmem:[%s3052_s4 + $0x140] sm:$0xff] }
  0x99   : > { %1394 = vmatmul.mubr.f32.vlgmr.msra.gmra.mrb[24].mxu1 %v261_v0  ;;  %2703 = vmatprep.subr.bf16.mxu0 %v2702_v8  ;;  %v266_v0 = vld [vmem:[%s3052_s4 + $0x98] sm:$0xff]  ;;  %v627_v8 = vld [vmem:[%s2984_s23 + $0x8e0] sm:$0xff]  ;;  %v697_v57 = vld [vmem:[%s2984_s23 + $0xb10] sm:$0xff] }
  0x9a   : > { %2733 = vmatpush3.bf16.msra.mxu1 %v2732_v3  ;;  %1398 = vmatprep.mubr.f32.mxu1 %v286_v11  ;;  %v609_v3 = vld [vmem:[%s2984_s23 + $0x850] sm:$0xff]  ;;  %v660_v11 = vld [vmem:[%s2984_s23 + $0x9e8] sm:$0xff]  ;;  %v2722_v14 = vpack.c.bf16 %v628_v9, %v627_v8  ;;  %v666_v54 = vld [vmem:[%s2984_s23 + $0xa18] sm:$0xff] }
  0x9b   : > { %1314 = vmatmul.mubr.f32.gmra.mrb[26].mxu0 %v283_v7  ;;  %2735 = vmatprep.subr.bf16.mxu1 %v2734_v12  ;;  %v642_v7 = vld [vmem:[%s2984_s23 + $0x958] sm:$0xff]  ;;  %v2720_v12 = vpack.c.bf16 %v610_v4, %v609_v3  ;;  %v2754_v18 = vpack.c.bf16 %v660_v11, %v659_v10  ;;  %v683_v61 = vld [vmem:[%s2984_s23 + $0xaa0] sm:$0xff]  ;;  %v2800_v3 = vpack.c.bf16 %v698_v58, %v697_v57  ;;  %v312_v4 = vld [vmem:[%s3052_s4 + $0x208] sm:$0xff] }
  0x9c   : > { %2705 = vmatpush3.bf16.msra.mxu0 %v2704_v15  ;;  %1318 = vmatprep.mubr.f32.mxu0 %v308_v20  ;;  %v2752_v13 = vpack.c.bf16 %v642_v7, %v641_v5  ;;  %v611_v15 = vld [vmem:[%s2984_s23 + $0x860] sm:$0xff]  ;;  %v629_v20 = vld [vmem:[%s2984_s23 + $0x8f0] sm:$0xff]  ;;  %v314_v9 = vld [vmem:[%s3052_s4 + $0x218] sm:$0xff] }
  0x9d   : > { %1399 = vmatmul.mubr.f32.gmra.mrb[26].mxu1 %v285_v16  ;;  %2707 = vmatprep.subr.bf16.mxu0 %v2706_v24  ;;  %v612_v16 = vld [vmem:[%s2984_s23 + $0x868] sm:$0xff]  ;;  %v2726_v26 = vpack.c.bf16 %v630_v21, %v629_v20  ;;  %v667_v5 = vld [vmem:[%s2984_s23 + $0xa20] sm:$0xff]  ;;  %v669_v21 = vld [vmem:[%s2984_s23 + $0xa30] sm:$0xff] }
  0x9e   : > { %2737 = vmatpush3.bf16.msra.mxu1 %v2736_v19  ;;  %1403 = vmatprep.mubr.f32.mxu1 %v310_v25  ;;  %v644_v19 = vld [vmem:[%s2984_s23 + $0x968] sm:$0xff]  ;;  %v2724_v24 = vpack.c.bf16 %v612_v16, %v611_v15  ;;  %v311_v7 = vld [vmem:[%s3052_s4 + $0x200] sm:$0xff]  ;;  %v686_v15 = vld [vmem:[%s2984_s23 + $0xab8] sm:$0xff] }
  0x9f   : > { %1319 = vmatmul.mubr.f32.gmra.mrb[28].mxu0 %v307_v23  ;;  %2739 = vmatprep.subr.bf16.mxu1 %v2738_v28  ;;  %v662_v23 = vld [vmem:[%s2984_s23 + $0x9f8] sm:$0xff]  ;;  %v2756_v25 = vpack.c.bf16 %v644_v19, %v643_v17  ;;  %v699_v10 = vld [vmem:[%s2984_s23 + $0xb20] sm:$0xff]  ;;  %v700_v11 = vld [vmem:[%s2984_s23 + $0xb28] sm:$0xff] }
  0xa0   : > { %2709 = vmatpush3.bf16.msra.mxu0 %v2708_v32  ;;  %1323 = vmatprep.mubr.f32.mxu0 %v332_v33  ;;  %v614_v28 = vld [vmem:[%s2984_s23 + $0x878] sm:$0xff]  ;;  %v2758_v30 = vpack.c.bf16 %v662_v23, %v661_v22  ;;  %v679_v32 = vld [vmem:[%s2984_s23 + $0xa80] sm:$0xff]  ;;  %v680_v33 = vld [vmem:[%s2984_s23 + $0xa88] sm:$0xff]  ;;  %v2804_v20 = vpack.c.bf16 %v700_v11, %v699_v10 }
  0xa1   : > { %1404 = vmatmul.mubr.f32.gmra.mrb[28].mxu1 %v309_v29  ;;  %2711 = vmatprep.subr.bf16.mxu0 %v2710_v40  ;;  %v645_v29 = vld [vmem:[%s2984_s23 + $0x970] sm:$0xff]  ;;  %v2762_v38 = vpack.c.bf16 %v680_v33, %v679_v32  ;;  %v664_v40 = vld [vmem:[%s2984_s23 + $0xa08] sm:$0xff]  ;;  %v718_v19 = vld [vmem:[%s2984_s23 + $0xbb8] sm:$0xff] }
  0xa2   : > { %2741 = vmatpush3.bf16.msra.mxu1 %v2740_v36  ;;  %1408 = vmatprep.mubr.f32.mxu1 %v334_v44  ;;  %v2728_v36 = vpack.c.bf16 %v614_v28, %v613_v27  ;;  %v2760_v37 = vpack.c.bf16 %v646_v31, %v645_v29  ;;  %v263_v44 = vld [vmem:[%s3052_s4 + $0x80] sm:$0xff]  ;;  %v2764_v47 = vpack.c.bf16 %v664_v40, %v663_v39  ;;  %v336_v17 = vld [vmem:[%s3052_s4 + $0x2c8] sm:$0xff]  ;;  %v670_v22 = vld [vmem:[%s2984_s23 + $0xa38] sm:$0xff] }
  0xa3   : > { %1324 = vmatmul.mubr.f32.gmra.mrb[30].mxu0 %v331_v48  ;;  %2743 = vmatprep.subr.bf16.mxu1 %v2742_v45  ;;  %v681_v45 = vld [vmem:[%s2984_s23 + $0xa90] sm:$0xff]  ;;  %v688_v27 = vld [vmem:[%s2984_s23 + $0xac8] sm:$0xff]  ;;  %v338_v28 = vld [vmem:[%s3052_s4 + $0x2d8] sm:$0xff]  ;;  %v2776_v33 = vpack.c.bf16 %v670_v22, %v669_v21 }
  0xa4   : > { %2713 = vmatpush3.bf16.msra.mxu0 %v2712_v49  ;;  %1478 = vmatprep.mubr.f32.mxu0 %v264_v62  ;;  %v265_v48 = vld [vmem:[%s3052_s4 + $0x90] sm:$0xff]  ;;  %v684_v62 = vld [vmem:[%s2984_s23 + $0xaa8] sm:$0xff]  ;;  %v335_v32 = vld [vmem:[%s3052_s4 + $0x2c0] sm:$0xff] }
  0xa5   : > { %1409 = vmatmul.mubr.f32.gmra.mrb[30].mxu1 %v333_v50  ;;  %2715 = vmatprep.subr.bf16.mxu0 %v2714_v52  ;;  %v713_v49 = vld [vmem:[%s2984_s23 + $0xb90] sm:$0xff]  ;;  %v714_v50 = vld [vmem:[%s2984_s23 + $0xb98] sm:$0xff]  ;;  %v288_v52 = vld [vmem:[%s3052_s4 + $0x148] sm:$0xff]  ;;  %v2770_v8 = vpack.c.bf16 %v684_v62, %v683_v61 }
  0xa6   : > { %2745 = vmatpush3.bf16.msra.mxu1 %v2744_v51  ;;  %1563 = vmatprep.mubr.f32.mxu1 %v266_v0  ;;  %v2796_v51 = vpack.c.bf16 %v696_v43, %v695_v42  ;;  %v2798_v60 = vpack.c.bf16 %v714_v50, %v713_v49  ;;  %v289_v0 = vld [vmem:[%s3052_s4 + $0x150] sm:$0xff]  ;;  %v720_v31 = vld [vmem:[%s2984_s23 + $0xbc8] sm:$0xff]  ;;  %v703_v39 = vld [vmem:[%s2984_s23 + $0xb40] sm:$0xff] }
  0xa7   : > { %2747 = vmatprep.subr.bf16.mxu1 %v2746_v56  ;;  %v2766_v56 = vpack.c.bf16 %v682_v46, %v681_v45  ;;  %v701_v23 = vld [vmem:[%s2984_s23 + $0xb30] sm:$0xff]  ;;  %v690_v43 = vld [vmem:[%s2984_s23 + $0xad8] sm:$0xff]  ;;  %v268_v46 = vld [vmem:[%s3052_s4 + $0xa8] sm:$0xff] }
  0xa8   : > { %2717 = vmatpush3.bf16.msra.mxu0 %v2716_v63  ;;  %v2768_v63 = vpack.c.bf16 %v666_v54, %v665_v53  ;;  %v689_v42 = vld [vmem:[%s2984_s23 + $0xad0] sm:$0xff]  ;;  %v722_v45 = vld [vmem:[%s2984_s23 + $0xbd8] sm:$0xff]  ;;  %v692_v57 = vld [vmem:[%s2984_s23 + $0xae8] sm:$0xff] }
  0xa9   : > { %2719 = vmatprep.subr.bf16.mxu0 %v2718_v2  ;;  %v716_v2 = vld [vmem:[%s2984_s23 + $0xba8] sm:$0xff]  ;;  %v2782_v50 = vpack.c.bf16 %v690_v43, %v689_v42  ;;  %v705_v53 = vld [vmem:[%s2984_s23 + $0xb50] sm:$0xff]  ;;  %v723_v58 = vld [vmem:[%s2984_s23 + $0xbe0] sm:$0xff] }
  0xaa   : > { %2749 = vmatpush3.bf16.msra.mxu1 %v2748_v1  ;;  %v715_v1 = vld [vmem:[%s2984_s23 + $0xba0] sm:$0xff]  ;;  %v677_v11 = vld [vmem:[%s2984_s23 + $0xa70] sm:$0xff]  ;;  %v294_v21 = vld [vmem:[%s3052_s4 + $0x178] sm:$0xff] }
  0xab   : > { %2751 = vmatprep.subr.bf16.mxu1 %v2750_v6  ;;  %v668_v6 = vld [vmem:[%s2984_s23 + $0xa28] sm:$0xff]  ;;  %v291_v22 = vld [vmem:[%s3052_s4 + $0x160] sm:$0xff] }
  0xac   : > { %2721 = vmatpush3.bf16.msra.mxu0 %v2720_v12  ;;  %v2802_v12 = vpack.c.bf16 %v716_v2, %v715_v1  ;;  %v2772_v16 = vpack.c.bf16 %v668_v6, %v667_v5  ;;  %v707_v1 = vld [vmem:[%s2984_s23 + $0xb60] sm:$0xff]  ;;  %v694_v5 = vld [vmem:[%s2984_s23 + $0xaf8] sm:$0xff]  ;;  %v725_v6 = vld [vmem:[%s2984_s23 + $0xbf0] sm:$0xff] }
  0xad   : > { %2723 = vmatprep.subr.bf16.mxu0 %v2722_v14  ;;  %v685_v14 = vld [vmem:[%s2984_s23 + $0xab0] sm:$0xff] }
  0xae   : > { %2753 = vmatpush3.bf16.msra.mxu1 %v2752_v13  ;;  %v313_v13 = vld [vmem:[%s3052_s4 + $0x210] sm:$0xff] }
  0xaf   : > { %2755 = vmatprep.subr.bf16.mxu1 %v2754_v18  ;;  %v717_v18 = vld [vmem:[%s2984_s23 + $0xbb0] sm:$0xff] }
  0xb0   : > { %2725 = vmatpush3.bf16.msra.mxu0 %v2724_v24  ;;  %v2774_v24 = vpack.c.bf16 %v686_v15, %v685_v14  ;;  %v2806_v29 = vpack.c.bf16 %v718_v19, %v717_v18  ;;  %v709_v14 = vld [vmem:[%s2984_s23 + $0xb70] sm:$0xff]  ;;  %v710_v15 = vld [vmem:[%s2984_s23 + $0xb78] sm:$0xff]  ;;  %v267_v18 = vld [vmem:[%s3052_s4 + $0xa0] sm:$0xff] }
  0xb1   : > { %2727 = vmatprep.subr.bf16.mxu0 %v2726_v26  ;;  %v687_v26 = vld [vmem:[%s2984_s23 + $0xac0] sm:$0xff]  ;;  %v269_v19 = vld [vmem:[%s3052_s4 + $0xb0] sm:$0xff] }
  0xb2   : > { %2757 = vmatpush3.bf16.msra.mxu1 %v2756_v25  ;;  %v702_v25 = vld [vmem:[%s2984_s23 + $0xb38] sm:$0xff] }
  0xb3   : > { %2759 = vmatprep.subr.bf16.mxu1 %v2758_v30  ;;  %v719_v30 = vld [vmem:[%s2984_s23 + $0xbc0] sm:$0xff]  ;;  %v2808_v35 = vpack.c.bf16 %v702_v25, %v701_v23  ;;  %v293_v23 = vld [vmem:[%s3052_s4 + $0x170] sm:$0xff]  ;;  %v318_v25 = vld [vmem:[%s3052_s4 + $0x238] sm:$0xff] }
  0xb4   : > { %2729 = vmatpush3.bf16.msra.mxu0 %v2728_v36  ;;  %v2778_v36 = vpack.c.bf16 %v688_v27, %v687_v26  ;;  %v2810_v40 = vpack.c.bf16 %v720_v31, %v719_v30  ;;  %v315_v26 = vld [vmem:[%s3052_s4 + $0x220] sm:$0xff]  ;;  %v317_v27 = vld [vmem:[%s3052_s4 + $0x230] sm:$0xff] }
  0xb5   : > { %2763 = vmatprep.subr.bf16.mxu0 %v2762_v38  ;;  %v672_v38 = vld [vmem:[%s2984_s23 + $0xa48] sm:$0xff]  ;;  %v339_v30 = vld [vmem:[%s3052_s4 + $0x2e0] sm:$0xff]  ;;  %v341_v31 = vld [vmem:[%s3052_s4 + $0x2f0] sm:$0xff] }
  0xb6   : > { %2761 = vmatpush3.bf16.msra.mxu1 %v2760_v37  ;;  %v671_v37 = vld [vmem:[%s2984_s23 + $0xa40] sm:$0xff] }
  0xb7   : > { %2795 = vmatprep.subr.bf16.mxu1 %v2794_v41  ;;  %1479 = vmatmul.mubr.f32.vlgmr.msra.gmra.mrb[32].mxu0 %v263_v44  ;;  %v704_v41 = vld [vmem:[%s2984_s23 + $0xb48] sm:$0xff]  ;;  %v721_v44 = vld [vmem:[%s2984_s23 + $0xbd0] sm:$0xff] }
  0xb8   : > { %2765 = vmatpush3.bf16.msra.mxu0 %v2764_v47  ;;  %1483 = vmatprep.mubr.f32.mxu0 %v288_v52  ;;  %v2780_v47 = vpack.c.bf16 %v672_v38, %v671_v37  ;;  %v2812_v49 = vpack.c.bf16 %v704_v41, %v703_v39  ;;  %v674_v52 = vld [vmem:[%s2984_s23 + $0xa58] sm:$0xff]  ;;  %v2814_v54 = vpack.c.bf16 %v722_v45, %v721_v44 }
  0xb9   : > { %1564 = vmatmul.mubr.f32.vlgmr.msra.gmra.mrb[32].mxu1 %v265_v48  ;;  %2767 = vmatprep.subr.bf16.mxu0 %v2766_v56  ;;  %v270_v48 = vld [vmem:[%s3052_s4 + $0xb8] sm:$0xff]  ;;  %v691_v56 = vld [vmem:[%s2984_s23 + $0xae0] sm:$0xff] }
  0xba   : > { %2797 = vmatpush3.bf16.msra.mxu1 %v2796_v51  ;;  %1568 = vmatprep.mubr.f32.mxu1 %v290_v59  ;;  %v673_v51 = vld [vmem:[%s2984_s23 + $0xa50] sm:$0xff]  ;;  %v724_v59 = vld [vmem:[%s2984_s23 + $0xbe8] sm:$0xff]  ;;  %v2786_v62 = vpack.c.bf16 %v692_v57, %v691_v56 }
  0xbb   : > { %1484 = vmatmul.mubr.f32.gmra.mrb[34].mxu0 %v287_v55  ;;  %2799 = vmatprep.subr.bf16.mxu1 %v2798_v60  ;;  %v706_v55 = vld [vmem:[%s2984_s23 + $0xb58] sm:$0xff]  ;;  %v2784_v60 = vpack.c.bf16 %v674_v52, %v673_v51  ;;  %v2818_v2 = vpack.c.bf16 %v724_v59, %v723_v58 }
  0xbc   : > { %2769 = vmatpush3.bf16.msra.mxu0 %v2768_v63  ;;  %1488 = vmatprep.mubr.f32.mxu0 %v312_v4  ;;  %v2816_v61 = vpack.c.bf16 %v706_v55, %v705_v53  ;;  %v675_v63 = vld [vmem:[%s2984_s23 + $0xa60] sm:$0xff]  ;;  %v693_v4 = vld [vmem:[%s2984_s23 + $0xaf0] sm:$0xff] }
  0xbd   : > { %1569 = vmatmul.mubr.f32.gmra.mrb[34].mxu1 %v289_v0  ;;  %2771 = vmatprep.subr.bf16.mxu0 %v2770_v8  ;;  %v676_v0 = vld [vmem:[%s2984_s23 + $0xa68] sm:$0xff]  ;;  %v2790_v10 = vpack.c.bf16 %v694_v5, %v693_v4 }
  0xbe   : > { %2801 = vmatpush3.bf16.msra.mxu1 %v2800_v3  ;;  %1573 = vmatprep.mubr.f32.mxu1 %v314_v9  ;;  %v708_v3 = vld [vmem:[%s2984_s23 + $0xb68] sm:$0xff]  ;;  %v2788_v8 = vpack.c.bf16 %v676_v0, %v675_v63 }
  0xbf   : > { %1489 = vmatmul.mubr.f32.gmra.mrb[36].mxu0 %v311_v7  ;;  %2803 = vmatprep.subr.bf16.mxu1 %v2802_v12  ;;  %v726_v7 = vld [vmem:[%s2984_s23 + $0xbf8] sm:$0xff]  ;;  %v2820_v9 = vpack.c.bf16 %v708_v3, %v707_v1 }
  0xc0   : > { %2773 = vmatpush3.bf16.msra.mxu0 %v2772_v16  ;;  %1493 = vmatprep.mubr.f32.mxu0 %v336_v17  ;;  %v678_v12 = vld [vmem:[%s2984_s23 + $0xa78] sm:$0xff]  ;;  %v2824_v17 = vpack.c.bf16 %v710_v15, %v709_v14 }
  0xc1   : > { %1574 = vmatmul.mubr.f32.gmra.mrb[36].mxu1 %v313_v13  ;;  %2775 = vmatprep.subr.bf16.mxu0 %v2774_v24  ;;  %v2822_v13 = vpack.c.bf16 %v726_v7, %v725_v6  ;;  %v2792_v16 = vpack.c.bf16 %v678_v12, %v677_v11  ;;  %v316_v24 = vld [vmem:[%s3052_s4 + $0x228] sm:$0xff] }
  0xc2   : > { %2805 = vmatpush3.bf16.msra.mxu1 %v2804_v20  ;;  %1578 = vmatprep.mubr.f32.mxu1 %v338_v28  ;;  %v292_v20 = vld [vmem:[%s3052_s4 + $0x168] sm:$0xff] }
  0xc3   : > { %1494 = vmatmul.mubr.f32.gmra.mrb[38].mxu0 %v335_v32  ;;  %2807 = vmatprep.subr.bf16.mxu1 %v2806_v29  ;;  %v340_v28 = vld [vmem:[%s3052_s4 + $0x2e8] sm:$0xff]  ;;  %v342_v29 = vld [vmem:[%s3052_s4 + $0x2f8] sm:$0xff] }
  0xc4   : > { %2777 = vmatpush3.bf16.msra.mxu0 %v2776_v33  ;;  %1648 = vmatprep.mubr.f32.mxu0 %v268_v46  ;;  %v1907_v33 = vld [vmem:[%s236_s7] ss:$0 sm:$0xff] }
  0xc5   : > { %1579 = vmatmul.mubr.f32.gmra.mrb[38].mxu1 %v337_v34  ;;  %2779 = vmatprep.subr.bf16.mxu0 %v2778_v36 }
  0xc6   : > { %2809 = vmatpush3.bf16.msra.mxu1 %v2808_v35  ;;  %1733 = vmatprep.mubr.f32.mxu1 %v270_v48 }
  0xc7   : > { %2811 = vmatprep.subr.bf16.mxu1 %v2810_v40 }
  0xc8   : > { %2781 = vmatpush3.bf16.msra.mxu0 %v2780_v47 }
  0xc9   : > { %2783 = vmatprep.subr.bf16.mxu0 %v2782_v50 }
  0xca   : > { %2813 = vmatpush3.bf16.msra.mxu1 %v2812_v49 }
  0xcb   : > { %2815 = vmatprep.subr.bf16.mxu1 %v2814_v54 }
  0xcc   : > { %2785 = vmatpush3.bf16.msra.mxu0 %v2784_v60 }
  0xcd   : > { %2787 = vmatprep.subr.bf16.mxu0 %v2786_v62 }
  0xce   : > { %2817 = vmatpush3.bf16.msra.mxu1 %v2816_v61 }
  0xcf   : > { %2819 = vmatprep.subr.bf16.mxu1 %v2818_v2 }
  0xd0   : > { %2789 = vmatpush3.bf16.msra.mxu0 %v2788_v8 }
  0xd1   : > { %2791 = vmatprep.subr.bf16.mxu0 %v2790_v10 }
  0xd2   : > { %2821 = vmatpush3.bf16.msra.mxu1 %v2820_v9 }
  0xd3   : > { %2823 = vmatprep.subr.bf16.mxu1 %v2822_v13 }
  0xd4   : > { %2793 = vmatpush3.bf16.msra.mxu0 %v2792_v16 }
  0xd6   : > { %2825 = vmatpush3.bf16.msra.mxu1 %v2824_v17 }
  0xd7   : > { %1649 = vmatmul.mubr.f32.vlgmr.msra.gmra.mrb[40].mxu0 %v267_v18 }
  0xd8   : > { %1653 = vmatprep.mubr.f32.mxu0 %v292_v20 }
  0xd9   : > { %1734 = vmatmul.mubr.f32.vlgmr.msra.gmra.mrb[40].mxu1 %v269_v19 }
  0xda   : > { %1738 = vmatprep.mubr.f32.mxu1 %v294_v21 }
  0xdb   : > { %1654 = vmatmul.mubr.f32.gmra.mrb[42].mxu0 %v291_v22 }
  0xdc   : > { %1658 = vmatprep.mubr.f32.mxu0 %v316_v24 }
  0xdd   : > { %1739 = vmatmul.mubr.f32.gmra.mrb[42].mxu1 %v293_v23 }
  0xde   : > { %1743 = vmatprep.mubr.f32.mxu1 %v318_v25 }
  0xdf   : > { %1659 = vmatmul.mubr.f32.gmra.mrb[44].mxu0 %v315_v26 }
  0xe0   : > { %1663 = vmatprep.mubr.f32.mxu0 %v340_v28 }
  0xe1   : > { %1744 = vmatmul.mubr.f32.gmra.mrb[44].mxu1 %v317_v27 }
  0xe2   : > { %1748 = vmatprep.mubr.f32.mxu1 %v342_v29 }
  0xe3   : > { %1664 = vmatmul.mubr.f32.gmra.mrb[46].mxu0 %v339_v30 }
  0xe5   : > { %1749 = vmatmul.mubr.f32.gmra.mrb[46].mxu1 %v341_v31 }
 0x10a   : > { %v1946_v32 = vpop.f32.mrb[0].mxu0 }
 0x10b   : > { %v1947_v34 = vpop.f32.mrb[1].mxu0 }
 0x10c   : > { %v1990_v35 = vpop.f32.mrb[0].mxu1  ;;  %v1948_v36 = vadd.f32 %v1947_v34, %v1946_v32 }
 0x10d   : > { %v1991_v37 = vpop.f32.mrb[1].mxu1 }
 0x10e   : > { %v1992_v38 = vadd.f32 %v1991_v37, %v1990_v35  ;;  %v801_v39 = vadd.f32 %v1948_v36, %v1907_v33  ;;  %v1949_v40 = vpop.f32.mrb[2].mxu0 }
 0x10f   : > { %v1950_v41 = vpop.f32.mrb[3].mxu0 }
 0x110   : > { %v1993_v42 = vpop.f32.mrb[2].mxu1  ;;  %v886_v43 = vadd.f32 %v1992_v38, %v801_v39  ;;  %v1951_v44 = vadd.f32 %v1950_v41, %v1949_v40 }
 0x111   : > { %v1994_v45 = vpop.f32.mrb[3].mxu1 }
 0x112   : > { %v1995_v46 = vadd.f32 %v1994_v45, %v1993_v42  ;;  %v806_v47 = vadd.f32 %v1951_v44, %v1907_v33  ;;  %v1952_v48 = vpop.f32.mrb[4].mxu0 }
 0x113   : > { %v1953_v49 = vpop.f32.mrb[5].mxu0 }
 0x114   : > { %v1996_v50 = vpop.f32.mrb[4].mxu1  ;;  %v891_v51 = vadd.f32 %v1995_v46, %v806_v47  ;;  %v1954_v52 = vadd.f32 %v1953_v49, %v1952_v48 }
 0x115   : > { %v1997_v53 = vpop.f32.mrb[5].mxu1 }
 0x116   : > { %v1998_v54 = vadd.f32 %v1997_v53, %v1996_v50  ;;  %v811_v55 = vadd.f32 %v1954_v52, %v1907_v33  ;;  %v1955_v56 = vpop.f32.mrb[6].mxu0 }
 0x117   : > { %v1956_v57 = vpop.f32.mrb[7].mxu0 }
 0x118   : > { %v1999_v58 = vpop.f32.mrb[6].mxu1  ;;  %v896_v59 = vadd.f32 %v1998_v54, %v811_v55  ;;  %v1957_v60 = vadd.f32 %v1956_v57, %v1955_v56 }
 0x119   : > { %v2000_v61 = vpop.f32.mrb[7].mxu1 }
 0x11a   : > { %v2001_v62 = vadd.f32 %v2000_v61, %v1999_v58  ;;  %v816_v63 = vadd.f32 %v1957_v60, %v1907_v33 }
 0x11c   : > { %v901_v0 = vadd.f32 %v2001_v62, %v816_v63 }
 0x12a   : > { %v2034_v1 = vpop.f32.mrb[8].mxu0 }
 0x12b   : > { %v2035_v2 = vpop.f32.mrb[9].mxu0 }
 0x12c   : > { %v2078_v3 = vpop.f32.mrb[8].mxu1  ;;  %v2036_v4 = vadd.f32 %v2035_v2, %v2034_v1 }
 0x12d   : > { %v2079_v5 = vpop.f32.mrb[9].mxu1 }
 0x12e   : > { %v2080_v6 = vadd.f32 %v2079_v5, %v2078_v3  ;;  %v971_v7 = vadd.f32 %v2036_v4, %v886_v43  ;;  %v2037_v8 = vpop.f32.mrb[10].mxu0 }
 0x12f   : > { %v2038_v9 = vpop.f32.mrb[11].mxu0 }
 0x130   : > { %v2081_v10 = vpop.f32.mrb[10].mxu1  ;;  %v1056_v11 = vadd.f32 %v2080_v6, %v971_v7  ;;  %v2039_v12 = vadd.f32 %v2038_v9, %v2037_v8 }
 0x131   : > { %v2082_v13 = vpop.f32.mrb[11].mxu1 }
 0x132   : > { %v2083_v14 = vadd.f32 %v2082_v13, %v2081_v10  ;;  %v976_v15 = vadd.f32 %v2039_v12, %v891_v51  ;;  %v2040_v16 = vpop.f32.mrb[12].mxu0 }
 0x133   : > { %v2041_v17 = vpop.f32.mrb[13].mxu0 }
 0x134   : > { %v2084_v18 = vpop.f32.mrb[12].mxu1  ;;  %v1061_v19 = vadd.f32 %v2083_v14, %v976_v15  ;;  %v2042_v20 = vadd.f32 %v2041_v17, %v2040_v16 }
 0x135   : > { %v2085_v21 = vpop.f32.mrb[13].mxu1 }
 0x136   : > { %v2086_v22 = vadd.f32 %v2085_v21, %v2084_v18  ;;  %v981_v23 = vadd.f32 %v2042_v20, %v896_v59  ;;  %v2043_v24 = vpop.f32.mrb[14].mxu0 }
 0x137   : > { %v2044_v25 = vpop.f32.mrb[15].mxu0 }
 0x138   : > { %v2087_v26 = vpop.f32.mrb[14].mxu1  ;;  %v1066_v27 = vadd.f32 %v2086_v22, %v981_v23  ;;  %v2045_v28 = vadd.f32 %v2044_v25, %v2043_v24 }
 0x139   : > { %v2088_v29 = vpop.f32.mrb[15].mxu1 }
 0x13a   : > { %v2089_v30 = vadd.f32 %v2088_v29, %v2087_v26  ;;  %v986_v31 = vadd.f32 %v2045_v28, %v901_v0 }
 0x13c   : > { %v1071_v32 = vadd.f32 %v2089_v30, %v986_v31 }
 0x14a   : > { %v2122_v33 = vpop.f32.mrb[16].mxu0 }
 0x14b   : > { %v2123_v34 = vpop.f32.mrb[17].mxu0 }
 0x14c   : > { %v2166_v35 = vpop.f32.mrb[16].mxu1  ;;  %v2124_v36 = vadd.f32 %v2123_v34, %v2122_v33 }
 0x14d   : > { %v2167_v37 = vpop.f32.mrb[17].mxu1 }
 0x14e   : > { %v2168_v38 = vadd.f32 %v2167_v37, %v2166_v35  ;;  %v1141_v39 = vadd.f32 %v2124_v36, %v1056_v11  ;;  %v2125_v40 = vpop.f32.mrb[18].mxu0 }
 0x14f   : > { %v2126_v41 = vpop.f32.mrb[19].mxu0 }
 0x150   : > { %v2169_v42 = vpop.f32.mrb[18].mxu1  ;;  %v1226_v43 = vadd.f32 %v2168_v38, %v1141_v39  ;;  %v2127_v44 = vadd.f32 %v2126_v41, %v2125_v40 }
 0x151   : > { %v2170_v45 = vpop.f32.mrb[19].mxu1 }
 0x152   : > { %v2171_v46 = vadd.f32 %v2170_v45, %v2169_v42  ;;  %v1146_v47 = vadd.f32 %v2127_v44, %v1061_v19  ;;  %v2128_v48 = vpop.f32.mrb[20].mxu0 }
 0x153   : > { %v2129_v49 = vpop.f32.mrb[21].mxu0 }
 0x154   : > { %v2172_v50 = vpop.f32.mrb[20].mxu1  ;;  %v1231_v51 = vadd.f32 %v2171_v46, %v1146_v47  ;;  %v2130_v52 = vadd.f32 %v2129_v49, %v2128_v48 }
 0x155   : > { %v2173_v53 = vpop.f32.mrb[21].mxu1 }
 0x156   : > { %v2174_v54 = vadd.f32 %v2173_v53, %v2172_v50  ;;  %v1151_v55 = vadd.f32 %v2130_v52, %v1066_v27  ;;  %v2131_v56 = vpop.f32.mrb[22].mxu0 }
 0x157   : > { %v2132_v57 = vpop.f32.mrb[23].mxu0 }
 0x158   : > { %v2175_v58 = vpop.f32.mrb[22].mxu1  ;;  %v1236_v59 = vadd.f32 %v2174_v54, %v1151_v55  ;;  %v2133_v60 = vadd.f32 %v2132_v57, %v2131_v56 }
 0x159   : > { %v2176_v61 = vpop.f32.mrb[23].mxu1 }
 0x15a   : > { %v2177_v62 = vadd.f32 %v2176_v61, %v2175_v58  ;;  %v1156_v63 = vadd.f32 %v2133_v60, %v1071_v32 }
 0x15c   : > { %v1241_v0 = vadd.f32 %v2177_v62, %v1156_v63 }
 0x16a   : > { %v2210_v1 = vpop.f32.mrb[24].mxu0 }
 0x16b   : > { %v2211_v2 = vpop.f32.mrb[25].mxu0 }
 0x16c   : > { %v2254_v3 = vpop.f32.mrb[24].mxu1  ;;  %v2212_v4 = vadd.f32 %v2211_v2, %v2210_v1 }
 0x16d   : > { %v2255_v5 = vpop.f32.mrb[25].mxu1 }
 0x16e   : > { %v2256_v6 = vadd.f32 %v2255_v5, %v2254_v3  ;;  %v1311_v7 = vadd.f32 %v2212_v4, %v1226_v43  ;;  %v2213_v8 = vpop.f32.mrb[26].mxu0 }
 0x16f   : > { %v2214_v9 = vpop.f32.mrb[27].mxu0 }
 0x170   : > { %v2257_v10 = vpop.f32.mrb[26].mxu1  ;;  %v1396_v11 = vadd.f32 %v2256_v6, %v1311_v7  ;;  %v2215_v12 = vadd.f32 %v2214_v9, %v2213_v8 }
 0x171   : > { %v2258_v13 = vpop.f32.mrb[27].mxu1 }
 0x172   : > { %v2259_v14 = vadd.f32 %v2258_v13, %v2257_v10  ;;  %v1316_v15 = vadd.f32 %v2215_v12, %v1231_v51  ;;  %v2216_v16 = vpop.f32.mrb[28].mxu0 }
 0x173   : > { %v2217_v17 = vpop.f32.mrb[29].mxu0 }
 0x174   : > { %v2260_v18 = vpop.f32.mrb[28].mxu1  ;;  %v1401_v19 = vadd.f32 %v2259_v14, %v1316_v15  ;;  %v2218_v20 = vadd.f32 %v2217_v17, %v2216_v16 }
 0x175   : > { %v2261_v21 = vpop.f32.mrb[29].mxu1 }
 0x176   : > { %v2262_v22 = vadd.f32 %v2261_v21, %v2260_v18  ;;  %v1321_v23 = vadd.f32 %v2218_v20, %v1236_v59  ;;  %v2219_v24 = vpop.f32.mrb[30].mxu0 }
 0x177   : > { %v2220_v25 = vpop.f32.mrb[31].mxu0 }
 0x178   : > { %v2263_v26 = vpop.f32.mrb[30].mxu1  ;;  %v1406_v27 = vadd.f32 %v2262_v22, %v1321_v23  ;;  %v2221_v28 = vadd.f32 %v2220_v25, %v2219_v24 }
 0x179   : > { %v2264_v29 = vpop.f32.mrb[31].mxu1 }
 0x17a   : > { %v2265_v30 = vadd.f32 %v2264_v29, %v2263_v26  ;;  %v1326_v31 = vadd.f32 %v2221_v28, %v1241_v0 }
 0x17c   : > { %v1411_v32 = vadd.f32 %v2265_v30, %v1326_v31 }
 0x18a   : > { %v2298_v33 = vpop.f32.mrb[32].mxu0 }
 0x18b   : > { %v2299_v34 = vpop.f32.mrb[33].mxu0 }
 0x18c   : > { %v2342_v35 = vpop.f32.mrb[32].mxu1  ;;  %v2300_v36 = vadd.f32 %v2299_v34, %v2298_v33 }
 0x18d   : > { %v2343_v37 = vpop.f32.mrb[33].mxu1 }
 0x18e   : > { %v2344_v38 = vadd.f32 %v2343_v37, %v2342_v35  ;;  %v1481_v39 = vadd.f32 %v2300_v36, %v1396_v11  ;;  %v2301_v40 = vpop.f32.mrb[34].mxu0 }
 0x18f   : > { %v2302_v41 = vpop.f32.mrb[35].mxu0 }
 0x190   : > { %v2345_v42 = vpop.f32.mrb[34].mxu1  ;;  %v1566_v43 = vadd.f32 %v2344_v38, %v1481_v39  ;;  %v2303_v44 = vadd.f32 %v2302_v41, %v2301_v40 }
 0x191   : > { %v2346_v45 = vpop.f32.mrb[35].mxu1 }
 0x192   : > { %v2347_v46 = vadd.f32 %v2346_v45, %v2345_v42  ;;  %v1486_v47 = vadd.f32 %v2303_v44, %v1401_v19  ;;  %v2304_v48 = vpop.f32.mrb[36].mxu0 }
 0x193   : > { %v2305_v49 = vpop.f32.mrb[37].mxu0 }
 0x194   : > { %v2348_v50 = vpop.f32.mrb[36].mxu1  ;;  %v1571_v51 = vadd.f32 %v2347_v46, %v1486_v47  ;;  %v2306_v52 = vadd.f32 %v2305_v49, %v2304_v48 }
 0x195   : > { %v2349_v53 = vpop.f32.mrb[37].mxu1 }
 0x196   : > { %v2350_v54 = vadd.f32 %v2349_v53, %v2348_v50  ;;  %v1491_v55 = vadd.f32 %v2306_v52, %v1406_v27  ;;  %v2307_v56 = vpop.f32.mrb[38].mxu0 }
 0x197   : > { %v2308_v57 = vpop.f32.mrb[39].mxu0 }
 0x198   : > { %v2351_v58 = vpop.f32.mrb[38].mxu1  ;;  %v1576_v59 = vadd.f32 %v2350_v54, %v1491_v55  ;;  %v2309_v60 = vadd.f32 %v2308_v57, %v2307_v56 }
 0x199   : > { %v2352_v61 = vpop.f32.mrb[39].mxu1 }
 0x19a   : > { %v2353_v62 = vadd.f32 %v2352_v61, %v2351_v58  ;;  %v1496_v63 = vadd.f32 %v2309_v60, %v1411_v32 }
 0x19c   : > { %v1581_v0 = vadd.f32 %v2353_v62, %v1496_v63 }
 0x1aa   : > { %v2386_v1 = vpop.f32.mrb[40].mxu0 }
 0x1ab   : > { %v2387_v2 = vpop.f32.mrb[41].mxu0 }
 0x1ac   : > { %v2430_v3 = vpop.f32.mrb[40].mxu1  ;;  %v2388_v4 = vadd.f32 %v2387_v2, %v2386_v1 }
 0x1ad   : > { %v2431_v5 = vpop.f32.mrb[41].mxu1 }
 0x1ae   : > { %v2432_v6 = vadd.f32 %v2431_v5, %v2430_v3  ;;  %v1651_v7 = vadd.f32 %v2388_v4, %v1566_v43  ;;  %v2389_v8 = vpop.f32.mrb[42].mxu0 }
 0x1af   : > { %v2390_v9 = vpop.f32.mrb[43].mxu0 }
 0x1b0   : > { %v2433_v10 = vpop.f32.mrb[42].mxu1  ;;  %v1736_v11 = vadd.f32 %v2432_v6, %v1651_v7  ;;  %v2391_v12 = vadd.f32 %v2390_v9, %v2389_v8 }
 0x1b1   : > { %v2434_v13 = vpop.f32.mrb[43].mxu1 }
 0x1b2   : > { %v2435_v14 = vadd.f32 %v2434_v13, %v2433_v10  ;;  %v1908_v15 = vmul.f32 -1.442695, %v1736_v11  ;;  %v1656_v16 = vadd.f32 %v2391_v12, %v1571_v51  ;;  %v2392_v17 = vpop.f32.mrb[44].mxu0 }
 0x1b3   : > { %v2393_v18 = vpop.f32.mrb[45].mxu0 }
 0x1b4   : > { %v2436_v19 = vpop.f32.mrb[44].mxu1  ;;  %2869 = vpow2.f32 %v1908_v15  ;;  %v1741_v20 = vadd.f32 %v2435_v14, %v1656_v16  ;;  %v2394_v21 = vadd.f32 %v2393_v18, %v2392_v17 }
 0x1b5   : > { %v2437_v22 = vpop.f32.mrb[45].mxu1 }
 0x1b6   : > { %v2438_v23 = vadd.f32 %v2437_v22, %v2436_v19  ;;  %v1909_v24 = vmul.f32 -1.442695, %v1741_v20  ;;  %v1661_v25 = vadd.f32 %v2394_v21, %v1576_v59  ;;  %v2395_v26 = vpop.f32.mrb[46].mxu0 }
 0x1b7   : > { %v2396_v27 = vpop.f32.mrb[47].mxu0 }
 0x1b8   : > { %v2439_v28 = vpop.f32.mrb[46].mxu1  ;;  %2871 = vpow2.f32 %v1909_v24  ;;  %v1746_v29 = vadd.f32 %v2438_v23, %v1661_v25  ;;  %v2397_v30 = vadd.f32 %v2396_v27, %v2395_v26 }
 0x1b9   : > { %v2440_v31 = vpop.f32.mrb[47].mxu1 }
 0x1ba   : > { %v2441_v32 = vadd.f32 %v2440_v31, %v2439_v28  ;;  %v1910_v33 = vmul.f32 -1.442695, %v1746_v29  ;;  %v1666_v34 = vadd.f32 %v2397_v30, %v1581_v0 }
 0x1bc   : > { %2873 = vpow2.f32 %v1910_v33  ;;  %v1751_v35 = vadd.f32 %v2441_v32, %v1666_v34 }
 0x1be   : > { %v2870_v36 = vpop.eup %2869  ;;  %v1911_v37 = vmul.f32 -1.442695, %v1751_v35 }
 0x1bf   : > { %v1766_v38 = vadd.f32 1.0, %v2870_v36 }
 0x1c0   : > { %2875 = vpow2.f32 %v1911_v37 }
 0x1c1   : > { %2877 = vrcp.f32 %v1766_v38 }
 0x1c2   : > { %v2872_v39 = vpop.eup %2871 }
 0x1c3   : > { %v1767_v40 = vadd.f32 1.0, %v2872_v39 }
 0x1c5   : > { %2879 = vrcp.f32 %v1767_v40 }
 0x1c6   : > { %v2874_v41 = vpop.eup %2873 }
 0x1c7   : > { %v1768_v42 = vadd.f32 1.0, %v2874_v41 }
 0x1c9   : > { %2881 = vrcp.f32 %v1768_v42 }
 0x1ca   : > { %v2876_v43 = vpop.eup %2875 }
 0x1cb   : > { %v2878_v44 = vpop.eup %2877  ;;  %v1769_v45 = vadd.f32 1.0, %v2876_v43 }
 0x1cc   : > { %1778 = vst [vmem:[%s245_s20] sm:$0xff] %v2878_v44 }
 0x1cd   : > { %2883 = vrcp.f32 %v1769_v45 }
 0x1cf   : > { %v2880_v46 = vpop.eup %2879 }
 0x1d0   : > { %1779 = vst [vmem:[%s245_s20 + $0x8] sm:$0xff] %v2880_v46 }
 0x1d3   : > { %v2882_v47 = vpop.eup %2881 }
 0x1d4   : > { %1780 = vst [vmem:[%s245_s20 + $0x10] sm:$0xff] %v2882_v47 }
 0x1d7   : > { %v2884_v48 = vpop.eup %2883 }
 0x1d8   : > { %1781 = vst [vmem:[%s245_s20 + $0x18] sm:$0xff] %v2884_v48 }
 0x1d9 PF: > { %s13_s16 = sadd.s32 1, %s2923_s16   ;;  %s3513_s12 = smov %s2915_s14 }
 0x1da   : > { %p10_p7 = scmp.ge.s32.totalorder %s13_s16, 6   ;;  %s3514_s13 = smov %s2919_s15 }
 0x1db   : > { %s3515_s14 = smov %s3518_s17  ;;  %s3516_s15 = smov %s3522_s18 }
 0x1dc   :  { %12 = sbr.rel (!%p10_p7) target bundleno = 3 (0x3), region = 68 }

</bundles_post_ra>
